<compile_context>
chip_gen: v7x
topology: tpu7x:2x2x1
jax: 0.10.0
libtpu: 0.0.40
codegen_flags: <defaults>
</compile_context>

<pallas_src>
import math
from functools import partial

import numpy as np
import jax
import jax.numpy as jnp
from jax import lax
from jax.experimental import pallas as pl
from jax.experimental.pallas import tpu as pltpu

BN_EPS = 1e-5
SUPPORTED_OPS = ('none', 'skip_connect', 'nor_conv_3x3', 'avg_pool_3x3')


def _round_up(x, m):
    return ((x + m - 1) // m) * m


# ----------------------------- Pallas kernels -------------------------------

def _mm_fused_kernel(a_ref, b_ref, scale_ref, shift_ref, o_ref, *, relu_in):
    """o = (relu?(a) @ b) * scale + shift.  Single K/N block, tiled over M."""
    a = a_ref[...]
    if relu_in:
        a = jnp.maximum(a, 0.0)
    acc = jnp.dot(a, b_ref[...], preferred_element_type=jnp.float32)
    o_ref[...] = acc * scale_ref[...] + shift_ref[...]


def _conv3_tap_kernel(a_ref, b_ref, scale_ref, shift_ref, o_ref, *, Wo, relu_in):
    """Stride-1 3x3 conv for one image.  a: (Hp*Wo, 3*Cin) -- the kw taps were folded
    into channels at the wrapper; the kh taps are gathered here from VMEM via aligned
    static slices (row offsets di*Wo, multiples of 8) so no 9x im2col hits HBM."""
    HoWo, N = o_ref.shape
    a = a_ref[...].astype(jnp.float32)              # bf16 DMA, f32 compute
    if relu_in:
        a = jnp.maximum(a, 0.0)
    acc = jnp.zeros((HoWo, N), jnp.float32)
    for di in range(3):
        rows = a[di * Wo: di * Wo + HoWo, :]
        w_di = b_ref[di].astype(jnp.float32)        # (3*Cin, N)
        acc = acc + jnp.dot(rows, w_di, preferred_element_type=jnp.float32)
    o_ref[...] = acc * scale_ref[...] + shift_ref[...]


def _head_kernel(x_ref, scale_ref, shift_ref, wc_ref, bc_ref, out_ref, logit_ref):
    """Fused lastact (BN + ReLU) + global average pool + classifier."""
    y = jnp.maximum(x_ref[...] * scale_ref[...] + shift_ref[...], 0.0)   # (B, HW, C)
    pooled = jnp.mean(y, axis=1)                                         # (B, C)
    out_ref[...] = pooled
    logit_ref[...] = (jnp.dot(pooled, wc_ref[...],
                              preferred_element_type=jnp.float32) + bc_ref[...])


# ----------------------------- Pallas wrappers -------------------------------

def fused_matmul(a, b, scale, shift, relu_in):
    """(M,K)@(K,N) with fused pre-ReLU and per-column scale/shift epilogue.
    K and N are small in this model, so they are single full-extent blocks; only M is
    tiled (and zero-padded to the tile)."""
    M, K = a.shape
    K2, N = b.shape
    assert K == K2
    Mp16 = max(16, _round_up(M, 16))          # bf16 sublane tiling = 16
    if Mp16 >= 512:
        tm = 256                              # feed the 256-wide MXU on v6e/v7x
    elif Mp16 >= 128 and (Mp16 // 2) % 16 == 0:
        tm = Mp16 // 2                        # >=2 M tiles -> megacore can split
    else:
        tm = Mp16
    Mp = _round_up(M, tm)
    a_p = a if Mp == M else jnp.pad(a, ((0, Mp - M), (0, 0)))
    a_bf = a_p.astype(jnp.bfloat16)
    b_bf = b.astype(jnp.bfloat16)
    sc = scale.reshape(1, N).astype(jnp.float32)
    sh = shift.reshape(1, N).astype(jnp.float32)
    out = pl.pallas_call(
        partial(_mm_fused_kernel, relu_in=relu_in),
        out_shape=jax.ShapeDtypeStruct((Mp, N), jnp.float32),
        grid=(Mp // tm,),
        in_specs=[pl.BlockSpec((tm, K), lambda i: (i, 0)),
                  pl.BlockSpec((K, N), lambda i: (0, 0)),
                  pl.BlockSpec((1, N), lambda i: (0, 0)),
                  pl.BlockSpec((1, N), lambda i: (0, 0))],
        out_specs=pl.BlockSpec((tm, N), lambda i: (i, 0)),
        compiler_params=pltpu.CompilerParams(dimension_semantics=("parallel",)),
    )(a_bf, b_bf, sc, sh)
    return out if Mp == M else out[:M]


def _im2col3(x, stride):
    """im2col for 3x3/pad=1 convs (used only for stride-2 or tiny-spatial cases)."""
    B, H, W, Cin = x.shape
    Ho = (H - 1) // stride + 1
    Wo = (W - 1) // stride + 1
    xp = jnp.pad(x, ((0, 0), (1, 1), (1, 1), (0, 0)))
    cols = []
    for di in range(3):
        for dj in range(3):
            cols.append(xp[:, di:di + stride * (Ho - 1) + 1:stride,
                              dj:dj + stride * (Wo - 1) + 1:stride, :])
    return jnp.concatenate(cols, axis=-1).reshape(B * Ho * Wo, 9 * Cin)


def conv3x3_fused(x, w, scale, shift, stride, relu_in):
    """3x3 conv, padding=1, NHWC, with fused pre-ReLU and BN scale/shift."""
    B, H, W, Cin = x.shape
    Cout = w.shape[0]
    Ho = (H - 1) // stride + 1
    Wo = (W - 1) // stride + 1
    if stride == 1 and Wo % 8 == 0 and ((Ho + 2) * Wo) % 16 == 0:
        Hp = H + 2
        xp = jnp.pad(x, ((0, 0), (1, 1), (1, 1), (0, 0)))
        # fold the kw taps into channels -> (B, Hp, Wo, 3*Cin)  (3x input, not 9x)
        xw = jnp.concatenate([xp[:, :, dj:dj + Wo, :] for dj in range(3)], axis=-1)
        a = xw.reshape(B * Hp * Wo, 3 * Cin).astype(jnp.bfloat16)
        wm = jnp.transpose(w, (2, 3, 1, 0)).reshape(3, 3 * Cin, Cout).astype(jnp.bfloat16)
        sc = scale.reshape(1, Cout).astype(jnp.float32)
        sh = shift.reshape(1, Cout).astype(jnp.float32)
        out = pl.pallas_call(
            partial(_conv3_tap_kernel, Wo=Wo, relu_in=relu_in),
            out_shape=jax.ShapeDtypeStruct((B * Ho * Wo, Cout), jnp.float32),
            grid=(B,),
            in_specs=[pl.BlockSpec((Hp * Wo, 3 * Cin), lambda b: (b, 0)),
                      pl.BlockSpec((3, 3 * Cin, Cout), lambda b: (0, 0, 0)),
                      pl.BlockSpec((1, Cout), lambda b: (0, 0)),
                      pl.BlockSpec((1, Cout), lambda b: (0, 0))],
            out_specs=pl.BlockSpec((Ho * Wo, Cout), lambda b: (b, 0)),
            compiler_params=pltpu.CompilerParams(dimension_semantics=("parallel",)),
        )(a, wm, sc, sh)
        return out.reshape(B, Ho, Wo, Cout)
    # general path: im2col + fused matmul (stride 2 / spatial < 8)
    a = _im2col3(x, stride)
    wm = jnp.transpose(w, (2, 3, 1, 0)).reshape(9 * Cin, Cout)
    out = fused_matmul(a, wm, scale, shift, relu_in)
    return out.reshape(B, Ho, Wo, Cout)


def conv1x1_fused(x, w, scale, shift, relu_in):
    B, H, W, Cin = x.shape
    Cout = w.shape[0]
    a = x.reshape(B * H * W, Cin)
    wm = w.reshape(Cout, Cin).T
    out = fused_matmul(a, wm, scale, shift, relu_in)
    return out.reshape(B, H, W, Cout)


def fr_group(x, plist, alphas):
    """Batched FactorizedReduce (relu -> two stride-2 1x1 convs on even/odd pixel
    grids -> channel concat -> BN) for several parameter sets sharing one input.
    One fused matmul: A = [x_even | x_odd], block-diagonal weights concatenated along
    Cout across edges; arch weights folded into the BN scale/shift epilogue."""
    B, H, W, Cin = x.shape
    Ho, Wo = H // 2, W // 2
    a_even = x[:, ::2, ::2, :].reshape(B * Ho * Wo, Cin)
    a_odd = x[:, 1::2, 1::2, :].reshape(B * Ho * Wo, Cin)
    a = jnp.concatenate([a_even, a_odd], axis=-1)                # (M, 2*Cin)
    wms, scs, shs, couts = [], [], [], []
    for p, al in zip(plist, alphas):
        c1, c2 = p['w1'].shape[0], p['w2'].shape[0]
        wm = jnp.zeros((2 * Cin, c1 + c2), jnp.float32)
        wm = wm.at[:Cin, :c1].set(p['w1'].reshape(c1, Cin).T)
        wm = wm.at[Cin:, c1:].set(p['w2'].reshape(c2, Cin).T)
        wms.append(wm)
        scs.append(al * p['bn']['scale'])
        shs.append(al * p['bn']['shift'])
        couts.append(c1 + c2)
    out = fused_matmul(a, jnp.concatenate(wms, axis=1),
                       jnp.concatenate(scs), jnp.concatenate(shs), relu_in=True)
    res, off = [], 0
    for c in couts:
        res.append(out[:, off:off + c].reshape(B, Ho, Wo, c))
        off += c
    return res


def conv3x3_group(x, plist, alphas, stride):
    """nor_conv_3x3 (ReLU-Conv-BN) for several edges sharing the same input: one conv
    with weights concatenated along Cout, arch weights folded into the BN epilogue."""
    cout = plist[0]['w'].shape[0]
    wc = jnp.concatenate([p['w'] for p in plist], axis=0)
    sc = jnp.concatenate([al * p['bn']['scale'] for p, al in zip(plist, alphas)])
    sh = jnp.concatenate([al * p['bn']['shift'] for p, al in zip(plist, alphas)])
    y = conv3x3_fused(x, wc, sc, sh, stride, relu_in=True)
    return [y[..., k * cout:(k + 1) * cout] for k in range(len(plist))]


def avg_pool3(x, stride):
    """AvgPool2d(3, stride, padding=1, count_include_pad=False), NHWC.
    Divisor is a trace-time numpy constant (no second reduce_window)."""
    # TODO(synk): pooling stays as an XLA reduce_window rather than a Pallas kernel.
    B, H, W, C = x.shape
    s = lax.reduce_window(x, 0.0, lax.add, (1, 3, 3, 1), (1, stride, stride, 1),
                          ((0, 0), (1, 1), (1, 1), (0, 0)))
    Ho, Wo = s.shape[1], s.shape[2]

    def _cnt(L, Lo):
        start = np.arange(Lo) * stride - 1
        return np.minimum(start + 3, L) - np.maximum(start, 0)

    counts = (_cnt(H, Ho)[:, None] * _cnt(W, Wo)[None, :]).astype(np.float32)
    return s / jnp.asarray(counts)[None, :, :, None]


def pallas_head(x, bn, cls):
    """lastact (BN+ReLU) + AdaptiveAvgPool2d(1) + flatten + Linear in one kernel."""
    B, H, W, C = x.shape
    x3 = x.reshape(B, H * W, C).astype(jnp.float32)
    sc = bn['scale'].reshape(1, 1, C).astype(jnp.float32)
    sh = bn['shift'].reshape(1, 1, C).astype(jnp.float32)
    wc = cls['w'].T.astype(jnp.float32)                  # (C, num_classes)
    bc = cls['b'].reshape(1, -1).astype(jnp.float32)
    nc = wc.shape[1]
    out, logits = pl.pallas_call(
        _head_kernel,
        out_shape=(jax.ShapeDtypeStruct((B, C), jnp.float32),
                   jax.ShapeDtypeStruct((B, nc), jnp.float32)),
        grid=(1,),
        in_specs=[pl.BlockSpec((B, H * W, C), lambda i: (0, 0, 0)),
                  pl.BlockSpec((1, 1, C), lambda i: (0, 0, 0)),
                  pl.BlockSpec((1, 1, C), lambda i: (0, 0, 0)),
                  pl.BlockSpec((C, nc), lambda i: (0, 0)),
                  pl.BlockSpec((1, nc), lambda i: (0, 0))],
        out_specs=[pl.BlockSpec((B, C), lambda i: (0, 0)),
                   pl.BlockSpec((B, nc), lambda i: (0, 0))],
    )(x3, sc, sh, wc, bc)
    return out, logits


# ------------------------------- cell forward -------------------------------

def cell_forward(ccfg, cp, s0, s1, ww, op_names, steps, multiplier):
    # preprocess
    if ccfg['reduction_prev']:
        s0 = fr_group(s0, [cp['pre0']], [1.0])[0]
    else:
        p = cp['pre0']
        s0 = conv1x1_fused(s0, p['w'], p['bn']['scale'], p['bn']['shift'], relu_in=True)
    p = cp['pre1']
    s1 = conv1x1_fused(s1, p['w'], p['bn']['scale'], p['bn']['shift'], relu_in=True)

    states = [s0, s1]
    acc = [None] * steps
    e2i = ccfg['edge2index']
    reduction = ccfg['reduction']
    k_of = {name: k for k, name in enumerate(op_names)}

    def _add(i, v):
        acc[i] = v if acc[i] is None else acc[i] + v

    # Edges are processed grouped by source state: every edge/op that reads states[j]
    # shares one input (and one batched conv / FR matmul) per group.
    for j in range(steps + 1):
        state = states[j]
        stride = 2 if (reduction and j < 2) else 1
        targets = list(range(max(0, j - 1), steps))
        if targets:
            def alpha(i, name):
                return ww[e2i[f"{i}<-{j}"], k_of[name]]

            if 'nor_conv_3x3' in k_of:
                plist = [cp['edges'][f"{i}<-{j}"]['nor_conv_3x3'] for i in targets]
                outs = conv3x3_group(state, plist,
                                     [alpha(i, 'nor_conv_3x3') for i in targets], stride)
                for i, o in zip(targets, outs):
                    _add(i, o)
            if 'skip_connect' in k_of:
                if stride == 1:
                    for i in targets:
                        _add(i, alpha(i, 'skip_connect') * state)
                else:
                    plist = [cp['edges'][f"{i}<-{j}"]['skip_connect'] for i in targets]
                    outs = fr_group(state, plist,
                                    [alpha(i, 'skip_connect') for i in targets])
                    for i, o in zip(targets, outs):
                        _add(i, o)
            if 'avg_pool_3x3' in k_of:
                pooled = avg_pool3(state, stride)
                for i in targets:
                    _add(i, alpha(i, 'avg_pool_3x3') * pooled)
            # 'none' contributes exactly zero -> skipped entirely.
        if j >= 1:
            node = acc[j - 1]
            if node is None:                       # only possible if space is all-'none'
                r = 2 if reduction else 1
                node = jnp.zeros((s1.shape[0], s1.shape[1] // r,
                                  s1.shape[2] // r, s1.shape[3]), jnp.float32)
            states.append(node)
    return jnp.concatenate(states[-multiplier:], axis=-1)


# ----------------------------- parameter init -------------------------------

def _bn_params(C):
    # eval-mode BN with fresh init: scale = 1/sqrt(running_var + eps), shift = 0
    return {'scale': jnp.full((C,), 1.0 / math.sqrt(1.0 + BN_EPS), jnp.float32),
            'shift': jnp.zeros((C,), jnp.float32)}


def _conv_w(key, cout, cin, kh, kw):
    fan = cin * kh * kw
    return jax.random.normal(key, (cout, cin, kh, kw), jnp.float32) / math.sqrt(fan)


def build_model(key, C, N, steps, multiplier, stem_multiplier, num_classes,
                search_space, depth=-1, use_stem=True):
    assert all(op in SUPPORTED_OPS for op in search_space), search_space
    keys = iter(jax.random.split(key, 4096))
    nk = lambda: next(keys)
    params = {}
    C_stem = C * stem_multiplier
    stem_in = 3 if use_stem else min(3, C)
    params['stem'] = {'w': _conv_w(nk(), C_stem, stem_in, 3, 3), 'bn': _bn_params(C_stem)}

    layer_channels = [C] * N + [C * 2] + [C * 2] * (N - 1) + [C * 4] + [C * 4] * (N - 1)
    layer_reductions = [False] * N + [True] + [False] * (N - 1) + [True] + [False] * (N - 1)

    edge_keys = sorted([f"{i}<-{j}" for i in range(steps) for j in range(2 + i)])
    edge2index = {k: i for i, k in enumerate(edge_keys)}
    num_edge = len(edge_keys)

    C_pp, C_p, reduction_prev = C_stem, C_stem, False
    cells_cfg, cells_p = [], []
    for index, (C_curr, reduction) in enumerate(zip(layer_channels, layer_reductions)):
        if depth > 0 and index >= depth:
            break
        cp = {}
        if reduction_prev:   # preprocess0 = FactorizedReduce(C_pp, C_curr, stride=2)
            cp['pre0'] = {'w1': _conv_w(nk(), C_curr // 2, C_pp, 1, 1),
                          'w2': _conv_w(nk(), C_curr - C_curr // 2, C_pp, 1, 1),
                          'bn': _bn_params(C_curr)}
        else:                # preprocess0 = ReLUConvBN 1x1
            cp['pre0'] = {'w': _conv_w(nk(), C_curr, C_pp, 1, 1), 'bn': _bn_params(C_curr)}
        cp['pre1'] = {'w': _conv_w(nk(), C_curr, C_p, 1, 1), 'bn': _bn_params(C_curr)}
        edges = {}
        for i in range(steps):
            for j in range(2 + i):
                node_str = f"{i}<-{j}"
                stride = 2 if reduction and j < 2 else 1
                op_ps = {}
                for name in search_space:
                    if name == 'nor_conv_3x3':
                        op_ps[name] = {'w': _conv_w(nk(), C_curr, C_curr, 3, 3),
                                       'bn': _bn_params(C_curr)}
                    elif name == 'skip_connect' and stride == 2:
                        op_ps[name] = {'w1': _conv_w(nk(), C_curr // 2, C_curr, 1, 1),
                                       'w2': _conv_w(nk(), C_curr - C_curr // 2, C_curr, 1, 1),
                                       'bn': _bn_params(C_curr)}
                    else:
                        op_ps[name] = {}
                edges[node_str] = op_ps
        cp['edges'] = edges
        cells_cfg.append({'reduction': reduction, 'reduction_prev': reduction_prev,
                          'edge2index': edge2index})
        cells_p.append(cp)
        C_pp, C_p, reduction_prev = C_p, multiplier * C_curr, reduction

    params['cells'] = cells_p
    params['lastact_bn'] = _bn_params(C_p)
    params['classifier'] = {'w': jax.random.normal(nk(), (num_classes, C_p), jnp.float32)
                                 / math.sqrt(C_p),
                            'b': jnp.zeros((num_classes,), jnp.float32)}
    params['arch_normal'] = 0.001 * jax.random.normal(nk(), (num_edge, len(search_space)),
                                                      jnp.float32)
    params['arch_reduce'] = 0.001 * jax.random.normal(nk(), (num_edge, len(search_space)),
                                                      jnp.float32)
    cfg = {'steps': steps, 'multiplier': multiplier, 'use_stem': use_stem,
           'op_names': list(search_space), 'cells': cells_cfg, 'C_prev': C_p}
    return cfg, params


# -------------------------------- forward -----------------------------------

def forward(cfg, params, x):
    normal_w = jax.nn.softmax(params['arch_normal'], axis=1)
    reduce_w = jax.nn.softmax(params['arch_reduce'], axis=1)
    # TODO(synk): SearchCell.forward_darts also receives the raw detached alphas; the
    # standard DARTS mixed-op consumes only the softmax weights, so they are unused.
    x = jnp.transpose(x, (0, 2, 3, 1))                        # NCHW -> NHWC
    if cfg['use_stem']:
        st = params['stem']
        s = conv3x3_fused(x, st['w'], st['bn']['scale'], st['bn']['shift'],
                          stride=1, relu_in=False)
        s0 = s1 = s
    else:
        s0 = s1 = x
    for ccfg, cp in zip(cfg['cells'], params['cells']):
        ww = reduce_w if ccfg['reduction'] else normal_w
        s0, s1 = s1, cell_forward(ccfg, cp, s0, s1, ww,
                                  cfg['op_names'], cfg['steps'], cfg['multiplier'])
    out, logits = pallas_head(s1, params['lastact_bn'], params['classifier'])
    return out, logits


# --------------------------------- main --------------------------------------

if __name__ == "__main__":
    key = jax.random.PRNGKey(0)
    kp, kx = jax.random.split(key)
    search_space = ['none', 'skip_connect', 'nor_conv_3x3', 'avg_pool_3x3']
    # Small config: C=4, N=1, steps=2, multiplier=2, stem_multiplier=3, 10 classes.
    cfg, params = build_model(kp, C=4, N=1, steps=2, multiplier=2, stem_multiplier=3,
                              num_classes=10, search_space=search_space,
                              depth=-1, use_stem=True)
    x = jax.random.normal(kx, (2, 3, 16, 16), jnp.float32)

    fwd = jax.jit(partial(forward, cfg))
    out, logits = fwd(params, x)
    jax.block_until_ready((out, logits))

    assert out.shape == (2, cfg['C_prev']), out.shape      # (2, 32)
    assert logits.shape == (2, 10), logits.shape
    assert bool(jnp.all(jnp.isfinite(out))) and bool(jnp.all(jnp.isfinite(logits)))
    print("KERNEL_OK")
</pallas_src>

<mosaic_0001>
module attributes {stable_mosaic.version = 11 : i64} {
  func.func @_conv3_tap_kernel(%arg0: i32, %arg1: memref<288x9xbf16, #tpu.memory_space<vmem>>, %arg2: memref<3x9x12xbf16, #tpu.memory_space<vmem>>, %arg3: memref<1x12xf32, #tpu.memory_space<vmem>>, %arg4: memref<1x12xf32, #tpu.memory_space<vmem>>, %arg5: memref<256x12xf32, #tpu.memory_space<vmem>>) attributes {dimension_semantics = [#tpu.dimension_semantics<parallel>], iteration_bounds = array<i64: 2>, scalar_prefetch = 0 : i64, scratch_operands = 0 : i64, tpu.core_type = #tpu.core_type<tc>, window_params = [{transform_indices = @transform_0, window_bounds = array<i64: 288, 9>}, {pipeline_mode = #tpu.pipeline_mode<synchronous>, transform_indices = @transform_1, window_bounds = array<i64: 3, 9, 12>}, {pipeline_mode = #tpu.pipeline_mode<synchronous>, transform_indices = @transform_2, window_bounds = array<i64: 1, 12>}, {pipeline_mode = #tpu.pipeline_mode<synchronous>, transform_indices = @transform_3, window_bounds = array<i64: 1, 12>}, {transform_indices = @transform_4, window_bounds = array<i64: 256, 12>}]} {
    %c0 = arith.constant 0 : index
    %c0_0 = arith.constant 0 : index
    %0 = vector.load %arg1[%c0, %c0_0] : memref<288x9xbf16, #tpu.memory_space<vmem>>, vector<288x9xbf16>
    %1 = arith.extf %0 : vector<288x9xbf16> to vector<288x9xf32>
    %cst = arith.constant 0.000000e+00 : f32
    %2 = vector.broadcast %cst : f32 to vector<256x12xf32>
    %3 = vector.extract_strided_slice %1 {offsets = [0, 0], sizes = [256, 9], strides = [1, 1]} : vector<288x9xf32> to vector<256x9xf32>
    %c0_1 = arith.constant 0 : index
    %c0_2 = arith.constant 0 : index
    %c0_3 = arith.constant 0 : index
    %4 = vector.load %arg2[%c0_1, %c0_2, %c0_3] : memref<3x9x12xbf16, #tpu.memory_space<vmem>>, vector<1x9x12xbf16>
    %5 = vector.shape_cast %4 : vector<1x9x12xbf16> to vector<9x12xbf16>
    %6 = arith.extf %5 : vector<9x12xbf16> to vector<9x12xf32>
    %cst_4 = arith.constant dense<0.000000e+00> : vector<256x12xf32>
    %7 = tpu.matmul %3, %6, %cst_4 {dimension_numbers = #tpu.dot_dimension_numbers<[1], [0], [0], [1], [0, 0, 1, 1], [], []>} : vector<256x9xf32>, vector<9x12xf32>, vector<256x12xf32> -> vector<256x12xf32>
    %8 = arith.addf %2, %7 : vector<256x12xf32>
    %9 = vector.extract_strided_slice %1 {offsets = [16, 0], sizes = [256, 9], strides = [1, 1]} : vector<288x9xf32> to vector<256x9xf32>
    %c1 = arith.constant 1 : index
    %c0_5 = arith.constant 0 : index
    %c0_6 = arith.constant 0 : index
    %10 = vector.load %arg2[%c1, %c0_5, %c0_6] : memref<3x9x12xbf16, #tpu.memory_space<vmem>>, vector<1x9x12xbf16>
    %11 = vector.shape_cast %10 : vector<1x9x12xbf16> to vector<9x12xbf16>
    %12 = arith.extf %11 : vector<9x12xbf16> to vector<9x12xf32>
    %cst_7 = arith.constant dense<0.000000e+00> : vector<256x12xf32>
    %13 = tpu.matmul %9, %12, %cst_7 {dimension_numbers = #tpu.dot_dimension_numbers<[1], [0], [0], [1], [0, 0, 1, 1], [], []>} : vector<256x9xf32>, vector<9x12xf32>, vector<256x12xf32> -> vector<256x12xf32>
    %14 = arith.addf %8, %13 : vector<256x12xf32>
    %15 = vector.extract_strided_slice %1 {offsets = [32, 0], sizes = [256, 9], strides = [1, 1]} : vector<288x9xf32> to vector<256x9xf32>
    %c2 = arith.constant 2 : index
    %c0_8 = arith.constant 0 : index
    %c0_9 = arith.constant 0 : index
    %16 = vector.load %arg2[%c2, %c0_8, %c0_9] : memref<3x9x12xbf16, #tpu.memory_space<vmem>>, vector<1x9x12xbf16>
    %17 = vector.shape_cast %16 : vector<1x9x12xbf16> to vector<9x12xbf16>
    %18 = arith.extf %17 : vector<9x12xbf16> to vector<9x12xf32>
    %cst_10 = arith.constant dense<0.000000e+00> : vector<256x12xf32>
    %19 = tpu.matmul %15, %18, %cst_10 {dimension_numbers = #tpu.dot_dimension_numbers<[1], [0], [0], [1], [0, 0, 1, 1], [], []>} : vector<256x9xf32>, vector<9x12xf32>, vector<256x12xf32> -> vector<256x12xf32>
    %20 = arith.addf %14, %19 : vector<256x12xf32>
    %c0_11 = arith.constant 0 : index
    %c0_12 = arith.constant 0 : index
    %21 = vector.load %arg3[%c0_11, %c0_12] : memref<1x12xf32, #tpu.memory_space<vmem>>, vector<1x12xf32>
    %22 = vector.broadcast %21 : vector<1x12xf32> to vector<256x12xf32>
    %23 = arith.mulf %20, %22 : vector<256x12xf32>
    %c0_13 = arith.constant 0 : index
    %c0_14 = arith.constant 0 : index
    %24 = vector.load %arg4[%c0_13, %c0_14] : memref<1x12xf32, #tpu.memory_space<vmem>>, vector<1x12xf32>
    %25 = vector.broadcast %24 : vector<1x12xf32> to vector<256x12xf32>
    %26 = arith.addf %23, %25 : vector<256x12xf32>
    %c0_15 = arith.constant 0 : index
    %c0_16 = arith.constant 0 : index
    %27 = vector.load %arg5[%c0_15, %c0_16] : memref<256x12xf32, #tpu.memory_space<vmem>>, vector<256x12xf32>
    tpu.vector_store %arg5[%c0_15, %c0_16], %26 {strides = array<i32>} : memref<256x12xf32, #tpu.memory_space<vmem>>, vector<256x12xf32>,
    return
  }
  func.func @transform_0(%arg0: i32) -> (i32, i32) {
    %c0_i32 = arith.constant 0 : i32
    %c0_i32_0 = arith.constant 0 : i32
    return %arg0, %c0_i32 : i32, i32
  }
  func.func @transform_1(%arg0: i32) -> (i32, i32, i32) {
    %c0_i32 = arith.constant 0 : i32
    %c0_i32_0 = arith.constant 0 : i32
    %c0_i32_1 = arith.constant 0 : i32
    %c0_i32_2 = arith.constant 0 : i32
    return %c0_i32, %c0_i32_0, %c0_i32_1 : i32, i32, i32
  }
  func.func @transform_2(%arg0: i32) -> (i32, i32) {
    %c0_i32 = arith.constant 0 : i32
    %c0_i32_0 = arith.constant 0 : i32
    %c0_i32_1 = arith.constant 0 : i32
    return %c0_i32, %c0_i32_0 : i32, i32
  }
  func.func @transform_3(%arg0: i32) -> (i32, i32) {
    %c0_i32 = arith.constant 0 : i32
    %c0_i32_0 = arith.constant 0 : i32
    %c0_i32_1 = arith.constant 0 : i32
    return %c0_i32, %c0_i32_0 : i32, i32
  }
  func.func @transform_4(%arg0: i32) -> (i32, i32) {
    %c0_i32 = arith.constant 0 : i32
    %c0_i32_0 = arith.constant 0 : i32
    return %arg0, %c0_i32 : i32, i32
  }
}

module attributes {stable_mosaic.version = 11 : i64} {
  func.func @_mm_fused_kernel(%arg0: i32, %arg1: memref<256x12xbf16, #tpu.memory_space<vmem>>, %arg2: memref<12x4xbf16, #tpu.memory_space<vmem>>, %arg3: memref<1x4xf32, #tpu.memory_space<vmem>>, %arg4: memref<1x4xf32, #tpu.memory_space<vmem>>, %arg5: memref<256x4xf32, #tpu.memory_space<vmem>>) attributes {dimension_semantics = [#tpu.dimension_semantics<parallel>], iteration_bounds = array<i64: 2>, scalar_prefetch = 0 : i64, scratch_operands = 0 : i64, tpu.core_type = #tpu.core_type<tc>, window_params = [{transform_indices = @transform_0, window_bounds = array<i64: 256, 12>}, {pipeline_mode = #tpu.pipeline_mode<synchronous>, transform_indices = @transform_1, window_bounds = array<i64: 12, 4>}, {pipeline_mode = #tpu.pipeline_mode<synchronous>, transform_indices = @transform_2, window_bounds = array<i64: 1, 4>}, {pipeline_mode = #tpu.pipeline_mode<synchronous>, transform_indices = @transform_3, window_bounds = array<i64: 1, 4>}, {transform_indices = @transform_4, window_bounds = array<i64: 256, 4>}]} {
    %c0 = arith.constant 0 : index
    %c0_0 = arith.constant 0 : index
    %0 = vector.load %arg1[%c0, %c0_0] : memref<256x12xbf16, #tpu.memory_space<vmem>>, vector<256x12xbf16>
    %cst = arith.constant 0.000000e+00 : bf16
    %1 = vector.broadcast %cst : bf16 to vector<256x12xbf16>
    %2 = arith.maximumf %0, %1 : vector<256x12xbf16>
    %c0_1 = arith.constant 0 : index
    %c0_2 = arith.constant 0 : index
    %3 = vector.load %arg2[%c0_1, %c0_2] : memref<12x4xbf16, #tpu.memory_space<vmem>>, vector<12x4xbf16>
    %cst_3 = arith.constant dense<0.000000e+00> : vector<256x4xf32>
    %4 = tpu.matmul %2, %3, %cst_3 {dimension_numbers = #tpu.dot_dimension_numbers<[1], [0], [0], [1], [0, 0, 1, 1], [], []>} : vector<256x12xbf16>, vector<12x4xbf16>, vector<256x4xf32> -> vector<256x4xf32>
    %c0_4 = arith.constant 0 : index
    %c0_5 = arith.constant 0 : index
    %5 = vector.load %arg3[%c0_4, %c0_5] : memref<1x4xf32, #tpu.memory_space<vmem>>, vector<1x4xf32>
    %6 = vector.broadcast %5 : vector<1x4xf32> to vector<256x4xf32>
    %7 = arith.mulf %4, %6 : vector<256x4xf32>
    %c0_6 = arith.constant 0 : index
    %c0_7 = arith.constant 0 : index
    %8 = vector.load %arg4[%c0_6, %c0_7] : memref<1x4xf32, #tpu.memory_space<vmem>>, vector<1x4xf32>
    %9 = vector.broadcast %8 : vector<1x4xf32> to vector<256x4xf32>
    %10 = arith.addf %7, %9 : vector<256x4xf32>
    %c0_8 = arith.constant 0 : index
    %c0_9 = arith.constant 0 : index
    %11 = vector.load %arg5[%c0_8, %c0_9] : memref<256x4xf32, #tpu.memory_space<vmem>>, vector<256x4xf32>
    tpu.vector_store %arg5[%c0_8, %c0_9], %10 {strides = array<i32>} : memref<256x4xf32, #tpu.memory_space<vmem>>, vector<256x4xf32>,
    return
  }
  func.func @transform_0(%arg0: i32) -> (i32, i32) {
    %c0_i32 = arith.constant 0 : i32
    %c0_i32_0 = arith.constant 0 : i32
    return %arg0, %c0_i32 : i32, i32
  }
  func.func @transform_1(%arg0: i32) -> (i32, i32) {
    %c0_i32 = arith.constant 0 : i32
    %c0_i32_0 = arith.constant 0 : i32
    %c0_i32_1 = arith.constant 0 : i32
    return %c0_i32, %c0_i32_0 : i32, i32
  }
  func.func @transform_2(%arg0: i32) -> (i32, i32) {
    %c0_i32 = arith.constant 0 : i32
    %c0_i32_0 = arith.constant 0 : i32
    %c0_i32_1 = arith.constant 0 : i32
    return %c0_i32, %c0_i32_0 : i32, i32
  }
  func.func @transform_3(%arg0: i32) -> (i32, i32) {
    %c0_i32 = arith.constant 0 : i32
    %c0_i32_0 = arith.constant 0 : i32
    %c0_i32_1 = arith.constant 0 : i32
    return %c0_i32, %c0_i32_0 : i32, i32
  }
  func.func @transform_4(%arg0: i32) -> (i32, i32) {
    %c0_i32 = arith.constant 0 : i32
    %c0_i32_0 = arith.constant 0 : i32
    return %arg0, %c0_i32 : i32, i32
  }
}

module attributes {stable_mosaic.version = 11 : i64} {
  func.func @_conv3_tap_kernel(%arg0: i32, %arg1: memref<288x12xbf16, #tpu.memory_space<vmem>>, %arg2: memref<3x12x8xbf16, #tpu.memory_space<vmem>>, %arg3: memref<1x8xf32, #tpu.memory_space<vmem>>, %arg4: memref<1x8xf32, #tpu.memory_space<vmem>>, %arg5: memref<256x8xf32, #tpu.memory_space<vmem>>) attributes {dimension_semantics = [#tpu.dimension_semantics<parallel>], iteration_bounds = array<i64: 2>, scalar_prefetch = 0 : i64, scratch_operands = 0 : i64, tpu.core_type = #tpu.core_type<tc>, window_params = [{transform_indices = @transform_0, window_bounds = array<i64: 288, 12>}, {pipeline_mode = #tpu.pipeline_mode<synchronous>, transform_indices = @transform_1, window_bounds = array<i64: 3, 12, 8>}, {pipeline_mode = #tpu.pipeline_mode<synchronous>, transform_indices = @transform_2, window_bounds = array<i64: 1, 8>}, {pipeline_mode = #tpu.pipeline_mode<synchronous>, transform_indices = @transform_3, window_bounds = array<i64: 1, 8>}, {transform_indices = @transform_4, window_bounds = array<i64: 256, 8>}]} {
    %c0 = arith.constant 0 : index
    %c0_0 = arith.constant 0 : index
    %0 = vector.load %arg1[%c0, %c0_0] : memref<288x12xbf16, #tpu.memory_space<vmem>>, vector<288x12xbf16>
    %1 = arith.extf %0 : vector<288x12xbf16> to vector<288x12xf32>
    %cst = arith.constant 0.000000e+00 : f32
    %2 = vector.broadcast %cst : f32 to vector<288x12xf32>
    %3 = arith.maximumf %1, %2 : vector<288x12xf32>
    %cst_1 = arith.constant 0.000000e+00 : f32
    %4 = vector.broadcast %cst_1 : f32 to vector<256x8xf32>
    %5 = vector.extract_strided_slice %3 {offsets = [0, 0], sizes = [256, 12], strides = [1, 1]} : vector<288x12xf32> to vector<256x12xf32>
    %c0_2 = arith.constant 0 : index
    %c0_3 = arith.constant 0 : index
    %c0_4 = arith.constant 0 : index
    %6 = vector.load %arg2[%c0_2, %c0_3, %c0_4] : memref<3x12x8xbf16, #tpu.memory_space<vmem>>, vector<1x12x8xbf16>
    %7 = vector.shape_cast %6 : vector<1x12x8xbf16> to vector<12x8xbf16>
    %8 = arith.extf %7 : vector<12x8xbf16> to vector<12x8xf32>
    %cst_5 = arith.constant dense<0.000000e+00> : vector<256x8xf32>
    %9 = tpu.matmul %5, %8, %cst_5 {dimension_numbers = #tpu.dot_dimension_numbers<[1], [0], [0], [1], [0, 0, 1, 1], [], []>} : vector<256x12xf32>, vector<12x8xf32>, vector<256x8xf32> -> vector<256x8xf32>
    %10 = arith.addf %4, %9 : vector<256x8xf32>
    %11 = vector.extract_strided_slice %3 {offsets = [16, 0], sizes = [256, 12], strides = [1, 1]} : vector<288x12xf32> to vector<256x12xf32>
    %c1 = arith.constant 1 : index
    %c0_6 = arith.constant 0 : index
    %c0_7 = arith.constant 0 : index
    %12 = vector.load %arg2[%c1, %c0_6, %c0_7] : memref<3x12x8xbf16, #tpu.memory_space<vmem>>, vector<1x12x8xbf16>
    %13 = vector.shape_cast %12 : vector<1x12x8xbf16> to vector<12x8xbf16>
    %14 = arith.extf %13 : vector<12x8xbf16> to vector<12x8xf32>
    %cst_8 = arith.constant dense<0.000000e+00> : vector<256x8xf32>
    %15 = tpu.matmul %11, %14, %cst_8 {dimension_numbers = #tpu.dot_dimension_numbers<[1], [0], [0], [1], [0, 0, 1, 1], [], []>} : vector<256x12xf32>, vector<12x8xf32>, vector<256x8xf32> -> vector<256x8xf32>
    %16 = arith.addf %10, %15 : vector<256x8xf32>
    %17 = vector.extract_strided_slice %3 {offsets = [32, 0], sizes = [256, 12], strides = [1, 1]} : vector<288x12xf32> to vector<256x12xf32>
    %c2 = arith.constant 2 : index
    %c0_9 = arith.constant 0 : index
    %c0_10 = arith.constant 0 : index
    %18 = vector.load %arg2[%c2, %c0_9, %c0_10] : memref<3x12x8xbf16, #tpu.memory_space<vmem>>, vector<1x12x8xbf16>
    %19 = vector.shape_cast %18 : vector<1x12x8xbf16> to vector<12x8xbf16>
    %20 = arith.extf %19 : vector<12x8xbf16> to vector<12x8xf32>
    %cst_11 = arith.constant dense<0.000000e+00> : vector<256x8xf32>
    %21 = tpu.matmul %17, %20, %cst_11 {dimension_numbers = #tpu.dot_dimension_numbers<[1], [0], [0], [1], [0, 0, 1, 1], [], []>} : vector<256x12xf32>, vector<12x8xf32>, vector<256x8xf32> -> vector<256x8xf32>
    %22 = arith.addf %16, %21 : vector<256x8xf32>
    %c0_12 = arith.constant 0 : index
    %c0_13 = arith.constant 0 : index
    %23 = vector.load %arg3[%c0_12, %c0_13] : memref<1x8xf32, #tpu.memory_space<vmem>>, vector<1x8xf32>
    %24 = vector.broadcast %23 : vector<1x8xf32> to vector<256x8xf32>
    %25 = arith.mulf %22, %24 : vector<256x8xf32>
    %c0_14 = arith.constant 0 : index
    %c0_15 = arith.constant 0 : index
    %26 = vector.load %arg4[%c0_14, %c0_15] : memref<1x8xf32, #tpu.memory_space<vmem>>, vector<1x8xf32>
    %27 = vector.broadcast %26 : vector<1x8xf32> to vector<256x8xf32>
    %28 = arith.addf %25, %27 : vector<256x8xf32>
    %c0_16 = arith.constant 0 : index
    %c0_17 = arith.constant 0 : index
    %29 = vector.load %arg5[%c0_16, %c0_17] : memref<256x8xf32, #tpu.memory_space<vmem>>, vector<256x8xf32>
    tpu.vector_store %arg5[%c0_16, %c0_17], %28 {strides = array<i32>} : memref<256x8xf32, #tpu.memory_space<vmem>>, vector<256x8xf32>,
    return
  }
  func.func @transform_0(%arg0: i32) -> (i32, i32) {
    %c0_i32 = arith.constant 0 : i32
    %c0_i32_0 = arith.constant 0 : i32
    return %arg0, %c0_i32 : i32, i32
  }
  func.func @transform_1(%arg0: i32) -> (i32, i32, i32) {
    %c0_i32 = arith.constant 0 : i32
    %c0_i32_0 = arith.constant 0 : i32
    %c0_i32_1 = arith.constant 0 : i32
    %c0_i32_2 = arith.constant 0 : i32
    return %c0_i32, %c0_i32_0, %c0_i32_1 : i32, i32, i32
  }
  func.func @transform_2(%arg0: i32) -> (i32, i32) {
    %c0_i32 = arith.constant 0 : i32
    %c0_i32_0 = arith.constant 0 : i32
    %c0_i32_1 = arith.constant 0 : i32
    return %c0_i32, %c0_i32_0 : i32, i32
  }
  func.func @transform_3(%arg0: i32) -> (i32, i32) {
    %c0_i32 = arith.constant 0 : i32
    %c0_i32_0 = arith.constant 0 : i32
    %c0_i32_1 = arith.constant 0 : i32
    return %c0_i32, %c0_i32_0 : i32, i32
  }
  func.func @transform_4(%arg0: i32) -> (i32, i32) {
    %c0_i32 = arith.constant 0 : i32
    %c0_i32_0 = arith.constant 0 : i32
    return %arg0, %c0_i32 : i32, i32
  }
}

module attributes {stable_mosaic.version = 11 : i64} {
  func.func @_conv3_tap_kernel(%arg0: i32, %arg1: memref<288x12xbf16, #tpu.memory_space<vmem>>, %arg2: memref<3x12x4xbf16, #tpu.memory_space<vmem>>, %arg3: memref<1x4xf32, #tpu.memory_space<vmem>>, %arg4: memref<1x4xf32, #tpu.memory_space<vmem>>, %arg5: memref<256x4xf32, #tpu.memory_space<vmem>>) attributes {dimension_semantics = [#tpu.dimension_semantics<parallel>], iteration_bounds = array<i64: 2>, scalar_prefetch = 0 : i64, scratch_operands = 0 : i64, tpu.core_type = #tpu.core_type<tc>, window_params = [{transform_indices = @transform_0, window_bounds = array<i64: 288, 12>}, {pipeline_mode = #tpu.pipeline_mode<synchronous>, transform_indices = @transform_1, window_bounds = array<i64: 3, 12, 4>}, {pipeline_mode = #tpu.pipeline_mode<synchronous>, transform_indices = @transform_2, window_bounds = array<i64: 1, 4>}, {pipeline_mode = #tpu.pipeline_mode<synchronous>, transform_indices = @transform_3, window_bounds = array<i64: 1, 4>}, {transform_indices = @transform_4, window_bounds = array<i64: 256, 4>}]} {
    %c0 = arith.constant 0 : index
    %c0_0 = arith.constant 0 : index
    %0 = vector.load %arg1[%c0, %c0_0] : memref<288x12xbf16, #tpu.memory_space<vmem>>, vector<288x12xbf16>
    %1 = arith.extf %0 : vector<288x12xbf16> to vector<288x12xf32>
    %cst = arith.constant 0.000000e+00 : f32
    %2 = vector.broadcast %cst : f32 to vector<288x12xf32>
    %3 = arith.maximumf %1, %2 : vector<288x12xf32>
    %cst_1 = arith.constant 0.000000e+00 : f32
    %4 = vector.broadcast %cst_1 : f32 to vector<256x4xf32>
    %5 = vector.extract_strided_slice %3 {offsets = [0, 0], sizes = [256, 12], strides = [1, 1]} : vector<288x12xf32> to vector<256x12xf32>
    %c0_2 = arith.constant 0 : index
    %c0_3 = arith.constant 0 : index
    %c0_4 = arith.constant 0 : index
    %6 = vector.load %arg2[%c0_2, %c0_3, %c0_4] : memref<3x12x4xbf16, #tpu.memory_space<vmem>>, vector<1x12x4xbf16>
    %7 = vector.shape_cast %6 : vector<1x12x4xbf16> to vector<12x4xbf16>
    %8 = arith.extf %7 : vector<12x4xbf16> to vector<12x4xf32>
    %cst_5 = arith.constant dense<0.000000e+00> : vector<256x4xf32>
    %9 = tpu.matmul %5, %8, %cst_5 {dimension_numbers = #tpu.dot_dimension_numbers<[1], [0], [0], [1], [0, 0, 1, 1], [], []>} : vector<256x12xf32>, vector<12x4xf32>, vector<256x4xf32> -> vector<256x4xf32>
    %10 = arith.addf %4, %9 : vector<256x4xf32>
    %11 = vector.extract_strided_slice %3 {offsets = [16, 0], sizes = [256, 12], strides = [1, 1]} : vector<288x12xf32> to vector<256x12xf32>
    %c1 = arith.constant 1 : index
    %c0_6 = arith.constant 0 : index
    %c0_7 = arith.constant 0 : index
    %12 = vector.load %arg2[%c1, %c0_6, %c0_7] : memref<3x12x4xbf16, #tpu.memory_space<vmem>>, vector<1x12x4xbf16>
    %13 = vector.shape_cast %12 : vector<1x12x4xbf16> to vector<12x4xbf16>
    %14 = arith.extf %13 : vector<12x4xbf16> to vector<12x4xf32>
    %cst_8 = arith.constant dense<0.000000e+00> : vector<256x4xf32>
    %15 = tpu.matmul %11, %14, %cst_8 {dimension_numbers = #tpu.dot_dimension_numbers<[1], [0], [0], [1], [0, 0, 1, 1], [], []>} : vector<256x12xf32>, vector<12x4xf32>, vector<256x4xf32> -> vector<256x4xf32>
    %16 = arith.addf %10, %15 : vector<256x4xf32>
    %17 = vector.extract_strided_slice %3 {offsets = [32, 0], sizes = [256, 12], strides = [1, 1]} : vector<288x12xf32> to vector<256x12xf32>
    %c2 = arith.constant 2 : index
    %c0_9 = arith.constant 0 : index
    %c0_10 = arith.constant 0 : index
    %18 = vector.load %arg2[%c2, %c0_9, %c0_10] : memref<3x12x4xbf16, #tpu.memory_space<vmem>>, vector<1x12x4xbf16>
    %19 = vector.shape_cast %18 : vector<1x12x4xbf16> to vector<12x4xbf16>
    %20 = arith.extf %19 : vector<12x4xbf16> to vector<12x4xf32>
    %cst_11 = arith.constant dense<0.000000e+00> : vector<256x4xf32>
    %21 = tpu.matmul %17, %20, %cst_11 {dimension_numbers = #tpu.dot_dimension_numbers<[1], [0], [0], [1], [0, 0, 1, 1], [], []>} : vector<256x12xf32>, vector<12x4xf32>, vector<256x4xf32> -> vector<256x4xf32>
    %22 = arith.addf %16, %21 : vector<256x4xf32>
    %c0_12 = arith.constant 0 : index
    %c0_13 = arith.constant 0 : index
    %23 = vector.load %arg3[%c0_12, %c0_13] : memref<1x4xf32, #tpu.memory_space<vmem>>, vector<1x4xf32>
    %24 = vector.broadcast %23 : vector<1x4xf32> to vector<256x4xf32>
    %25 = arith.mulf %22, %24 : vector<256x4xf32>
    %c0_14 = arith.constant 0 : index
    %c0_15 = arith.constant 0 : index
    %26 = vector.load %arg4[%c0_14, %c0_15] : memref<1x4xf32, #tpu.memory_space<vmem>>, vector<1x4xf32>
    %27 = vector.broadcast %26 : vector<1x4xf32> to vector<256x4xf32>
    %28 = arith.addf %25, %27 : vector<256x4xf32>
    %c0_16 = arith.constant 0 : index
    %c0_17 = arith.constant 0 : index
    %29 = vector.load %arg5[%c0_16, %c0_17] : memref<256x4xf32, #tpu.memory_space<vmem>>, vector<256x4xf32>
    tpu.vector_store %arg5[%c0_16, %c0_17], %28 {strides = array<i32>} : memref<256x4xf32, #tpu.memory_space<vmem>>, vector<256x4xf32>,
    return
  }
  func.func @transform_0(%arg0: i32) -> (i32, i32) {
    %c0_i32 = arith.constant 0 : i32
    %c0_i32_0 = arith.constant 0 : i32
    return %arg0, %c0_i32 : i32, i32
  }
  func.func @transform_1(%arg0: i32) -> (i32, i32, i32) {
    %c0_i32 = arith.constant 0 : i32
    %c0_i32_0 = arith.constant 0 : i32
    %c0_i32_1 = arith.constant 0 : i32
    %c0_i32_2 = arith.constant 0 : i32
    return %c0_i32, %c0_i32_0, %c0_i32_1 : i32, i32, i32
  }
  func.func @transform_2(%arg0: i32) -> (i32, i32) {
    %c0_i32 = arith.constant 0 : i32
    %c0_i32_0 = arith.constant 0 : i32
    %c0_i32_1 = arith.constant 0 : i32
    return %c0_i32, %c0_i32_0 : i32, i32
  }
  func.func @transform_3(%arg0: i32) -> (i32, i32) {
    %c0_i32 = arith.constant 0 : i32
    %c0_i32_0 = arith.constant 0 : i32
    %c0_i32_1 = arith.constant 0 : i32
    return %c0_i32, %c0_i32_0 : i32, i32
  }
  func.func @transform_4(%arg0: i32) -> (i32, i32) {
    %c0_i32 = arith.constant 0 : i32
    %c0_i32_0 = arith.constant 0 : i32
    return %arg0, %c0_i32 : i32, i32
  }
}

module attributes {stable_mosaic.version = 11 : i64} {
  func.func @_mm_fused_kernel(%arg0: i32, %arg1: memref<64x16xbf16, #tpu.memory_space<vmem>>, %arg2: memref<16x16xbf16, #tpu.memory_space<vmem>>, %arg3: memref<1x16xf32, #tpu.memory_space<vmem>>, %arg4: memref<1x16xf32, #tpu.memory_space<vmem>>, %arg5: memref<64x16xf32, #tpu.memory_space<vmem>>) attributes {dimension_semantics = [#tpu.dimension_semantics<parallel>], iteration_bounds = array<i64: 2>, scalar_prefetch = 0 : i64, scratch_operands = 0 : i64, tpu.core_type = #tpu.core_type<tc>, window_params = [{transform_indices = @transform_0, window_bounds = array<i64: 64, 16>}, {pipeline_mode = #tpu.pipeline_mode<synchronous>, transform_indices = @transform_1, window_bounds = array<i64: 16, 16>}, {pipeline_mode = #tpu.pipeline_mode<synchronous>, transform_indices = @transform_2, window_bounds = array<i64: 1, 16>}, {pipeline_mode = #tpu.pipeline_mode<synchronous>, transform_indices = @transform_3, window_bounds = array<i64: 1, 16>}, {transform_indices = @transform_4, window_bounds = array<i64: 64, 16>}]} {
    %c0 = arith.constant 0 : index
    %c0_0 = arith.constant 0 : index
    %0 = vector.load %arg1[%c0, %c0_0] : memref<64x16xbf16, #tpu.memory_space<vmem>>, vector<64x16xbf16>
    %cst = arith.constant 0.000000e+00 : bf16
    %1 = vector.broadcast %cst : bf16 to vector<64x16xbf16>
    %2 = arith.maximumf %0, %1 : vector<64x16xbf16>
    %c0_1 = arith.constant 0 : index
    %c0_2 = arith.constant 0 : index
    %3 = vector.load %arg2[%c0_1, %c0_2] : memref<16x16xbf16, #tpu.memory_space<vmem>>, vector<16x16xbf16>
    %cst_3 = arith.constant dense<0.000000e+00> : vector<64x16xf32>
    %4 = tpu.matmul %2, %3, %cst_3 {dimension_numbers = #tpu.dot_dimension_numbers<[1], [0], [0], [1], [0, 0, 1, 1], [], []>} : vector<64x16xbf16>, vector<16x16xbf16>, vector<64x16xf32> -> vector<64x16xf32>
    %c0_4 = arith.constant 0 : index
    %c0_5 = arith.constant 0 : index
    %5 = vector.load %arg3[%c0_4, %c0_5] : memref<1x16xf32, #tpu.memory_space<vmem>>, vector<1x16xf32>
    %6 = vector.broadcast %5 : vector<1x16xf32> to vector<64x16xf32>
    %7 = arith.mulf %4, %6 : vector<64x16xf32>
    %c0_6 = arith.constant 0 : index
    %c0_7 = arith.constant 0 : index
    %8 = vector.load %arg4[%c0_6, %c0_7] : memref<1x16xf32, #tpu.memory_space<vmem>>, vector<1x16xf32>
    %9 = vector.broadcast %8 : vector<1x16xf32> to vector<64x16xf32>
    %10 = arith.addf %7, %9 : vector<64x16xf32>
    %c0_8 = arith.constant 0 : index
    %c0_9 = arith.constant 0 : index
    %11 = vector.load %arg5[%c0_8, %c0_9] : memref<64x16xf32, #tpu.memory_space<vmem>>, vector<64x16xf32>
    tpu.vector_store %arg5[%c0_8, %c0_9], %10 {strides = array<i32>} : memref<64x16xf32, #tpu.memory_space<vmem>>, vector<64x16xf32>,
    return
  }
  func.func @transform_0(%arg0: i32) -> (i32, i32) {
    %c0_i32 = arith.constant 0 : i32
    %c0_i32_0 = arith.constant 0 : i32
    return %arg0, %c0_i32 : i32, i32
  }
  func.func @transform_1(%arg0: i32) -> (i32, i32) {
    %c0_i32 = arith.constant 0 : i32
    %c0_i32_0 = arith.constant 0 : i32
    %c0_i32_1 = arith.constant 0 : i32
    return %c0_i32, %c0_i32_0 : i32, i32
  }
  func.func @transform_2(%arg0: i32) -> (i32, i32) {
    %c0_i32 = arith.constant 0 : i32
    %c0_i32_0 = arith.constant 0 : i32
    %c0_i32_1 = arith.constant 0 : i32
    return %c0_i32, %c0_i32_0 : i32, i32
  }
  func.func @transform_3(%arg0: i32) -> (i32, i32) {
    %c0_i32 = arith.constant 0 : i32
    %c0_i32_0 = arith.constant 0 : i32
    %c0_i32_1 = arith.constant 0 : i32
    return %c0_i32, %c0_i32_0 : i32, i32
  }
  func.func @transform_4(%arg0: i32) -> (i32, i32) {
    %c0_i32 = arith.constant 0 : i32
    %c0_i32_0 = arith.constant 0 : i32
    return %arg0, %c0_i32 : i32, i32
  }
}

module attributes {stable_mosaic.version = 11 : i64} {
  func.func @_mm_fused_kernel(%arg0: i32, %arg1: memref<32x144xbf16, #tpu.memory_space<vmem>>, %arg2: memref<144x32xbf16, #tpu.memory_space<vmem>>, %arg3: memref<1x32xf32, #tpu.memory_space<vmem>>, %arg4: memref<1x32xf32, #tpu.memory_space<vmem>>, %arg5: memref<32x32xf32, #tpu.memory_space<vmem>>) attributes {dimension_semantics = [#tpu.dimension_semantics<parallel>], iteration_bounds = array<i64: 1>, scalar_prefetch = 0 : i64, scratch_operands = 0 : i64, tpu.core_type = #tpu.core_type<tc>, window_params = [{transform_indices = @transform_0, window_bounds = array<i64: 32, 144>}, {pipeline_mode = #tpu.pipeline_mode<synchronous>, transform_indices = @transform_1, window_bounds = array<i64: 144, 32>}, {pipeline_mode = #tpu.pipeline_mode<synchronous>, transform_indices = @transform_2, window_bounds = array<i64: 1, 32>}, {pipeline_mode = #tpu.pipeline_mode<synchronous>, transform_indices = @transform_3, window_bounds = array<i64: 1, 32>}, {transform_indices = @transform_4, window_bounds = array<i64: 32, 32>}]} {
    %c0 = arith.constant 0 : index
    %c0_0 = arith.constant 0 : index
    %0 = vector.load %arg1[%c0, %c0_0] : memref<32x144xbf16, #tpu.memory_space<vmem>>, vector<32x144xbf16>
    %cst = arith.constant 0.000000e+00 : bf16
    %1 = vector.broadcast %cst : bf16 to vector<32x144xbf16>
    %2 = arith.maximumf %0, %1 : vector<32x144xbf16>
    %c0_1 = arith.constant 0 : index
    %c0_2 = arith.constant 0 : index
    %3 = vector.load %arg2[%c0_1, %c0_2] : memref<144x32xbf16, #tpu.memory_space<vmem>>, vector<144x32xbf16>
    %cst_3 = arith.constant dense<0.000000e+00> : vector<32x32xf32>
    %4 = tpu.matmul %2, %3, %cst_3 {dimension_numbers = #tpu.dot_dimension_numbers<[1], [0], [0], [1], [0, 0, 1, 1], [], []>} : vector<32x144xbf16>, vector<144x32xbf16>, vector<32x32xf32> -> vector<32x32xf32>
    %c0_4 = arith.constant 0 : index
    %c0_5 = arith.constant 0 : index
    %5 = vector.load %arg3[%c0_4, %c0_5] : memref<1x32xf32, #tpu.memory_space<vmem>>, vector<1x32xf32>
    %6 = vector.broadcast %5 : vector<1x32xf32> to vector<32x32xf32>
    %7 = arith.mulf %4, %6 : vector<32x32xf32>
    %c0_6 = arith.constant 0 : index
    %c0_7 = arith.constant 0 : index
    %8 = vector.load %arg4[%c0_6, %c0_7] : memref<1x32xf32, #tpu.memory_space<vmem>>, vector<1x32xf32>
    %9 = vector.broadcast %8 : vector<1x32xf32> to vector<32x32xf32>
    %10 = arith.addf %7, %9 : vector<32x32xf32>
    %c0_8 = arith.constant 0 : index
    %c0_9 = arith.constant 0 : index
    %11 = vector.load %arg5[%c0_8, %c0_9] : memref<32x32xf32, #tpu.memory_space<vmem>>, vector<32x32xf32>
    tpu.vector_store %arg5[%c0_8, %c0_9], %10 {strides = array<i32>} : memref<32x32xf32, #tpu.memory_space<vmem>>, vector<32x32xf32>,
    return
  }
  func.func @transform_0(%arg0: i32) -> (i32, i32) {
    %c0_i32 = arith.constant 0 : i32
    %c0_i32_0 = arith.constant 0 : i32
    return %arg0, %c0_i32 : i32, i32
  }
  func.func @transform_1(%arg0: i32) -> (i32, i32) {
    %c0_i32 = arith.constant 0 : i32
    %c0_i32_0 = arith.constant 0 : i32
    %c0_i32_1 = arith.constant 0 : i32
    return %c0_i32, %c0_i32_0 : i32, i32
  }
  func.func @transform_2(%arg0: i32) -> (i32, i32) {
    %c0_i32 = arith.constant 0 : i32
    %c0_i32_0 = arith.constant 0 : i32
    %c0_i32_1 = arith.constant 0 : i32
    return %c0_i32, %c0_i32_0 : i32, i32
  }
  func.func @transform_3(%arg0: i32) -> (i32, i32) {
    %c0_i32 = arith.constant 0 : i32
    %c0_i32_0 = arith.constant 0 : i32
    %c0_i32_1 = arith.constant 0 : i32
    return %c0_i32, %c0_i32_0 : i32, i32
  }
  func.func @transform_4(%arg0: i32) -> (i32, i32) {
    %c0_i32 = arith.constant 0 : i32
    %c0_i32_0 = arith.constant 0 : i32
    return %arg0, %c0_i32 : i32, i32
  }
}

module attributes {stable_mosaic.version = 11 : i64} {
  func.func @_mm_fused_kernel(%arg0: i32, %arg1: memref<32x32xbf16, #tpu.memory_space<vmem>>, %arg2: memref<32x32xbf16, #tpu.memory_space<vmem>>, %arg3: memref<1x32xf32, #tpu.memory_space<vmem>>, %arg4: memref<1x32xf32, #tpu.memory_space<vmem>>, %arg5: memref<32x32xf32, #tpu.memory_space<vmem>>) attributes {dimension_semantics = [#tpu.dimension_semantics<parallel>], iteration_bounds = array<i64: 1>, scalar_prefetch = 0 : i64, scratch_operands = 0 : i64, tpu.core_type = #tpu.core_type<tc>, window_params = [{transform_indices = @transform_0, window_bounds = array<i64: 32, 32>}, {pipeline_mode = #tpu.pipeline_mode<synchronous>, transform_indices = @transform_1, window_bounds = array<i64: 32, 32>}, {pipeline_mode = #tpu.pipeline_mode<synchronous>, transform_indices = @transform_2, window_bounds = array<i64: 1, 32>}, {pipeline_mode = #tpu.pipeline_mode<synchronous>, transform_indices = @transform_3, window_bounds = array<i64: 1, 32>}, {transform_indices = @transform_4, window_bounds = array<i64: 32, 32>}]} {
    %c0 = arith.constant 0 : index
    %c0_0 = arith.constant 0 : index
    %0 = vector.load %arg1[%c0, %c0_0] : memref<32x32xbf16, #tpu.memory_space<vmem>>, vector<32x32xbf16>
    %cst = arith.constant 0.000000e+00 : bf16
    %1 = vector.broadcast %cst : bf16 to vector<32x32xbf16>
    %2 = arith.maximumf %0, %1 : vector<32x32xbf16>
    %c0_1 = arith.constant 0 : index
    %c0_2 = arith.constant 0 : index
    %3 = vector.load %arg2[%c0_1, %c0_2] : memref<32x32xbf16, #tpu.memory_space<vmem>>, vector<32x32xbf16>
    %cst_3 = arith.constant dense<0.000000e+00> : vector<32x32xf32>
    %4 = tpu.matmul %2, %3, %cst_3 {dimension_numbers = #tpu.dot_dimension_numbers<[1], [0], [0], [1], [0, 0, 1, 1], [], []>} : vector<32x32xbf16>, vector<32x32xbf16>, vector<32x32xf32> -> vector<32x32xf32>
    %c0_4 = arith.constant 0 : index
    %c0_5 = arith.constant 0 : index
    %5 = vector.load %arg3[%c0_4, %c0_5] : memref<1x32xf32, #tpu.memory_space<vmem>>, vector<1x32xf32>
    %6 = vector.broadcast %5 : vector<1x32xf32> to vector<32x32xf32>
    %7 = arith.mulf %4, %6 : vector<32x32xf32>
    %c0_6 = arith.constant 0 : index
    %c0_7 = arith.constant 0 : index
    %8 = vector.load %arg4[%c0_6, %c0_7] : memref<1x32xf32, #tpu.memory_space<vmem>>, vector<1x32xf32>
    %9 = vector.broadcast %8 : vector<1x32xf32> to vector<32x32xf32>
    %10 = arith.addf %7, %9 : vector<32x32xf32>
    %c0_8 = arith.constant 0 : index
    %c0_9 = arith.constant 0 : index
    %11 = vector.load %arg5[%c0_8, %c0_9] : memref<32x32xf32, #tpu.memory_space<vmem>>, vector<32x32xf32>
    tpu.vector_store %arg5[%c0_8, %c0_9], %10 {strides = array<i32>} : memref<32x32xf32, #tpu.memory_space<vmem>>, vector<32x32xf32>,
    return
  }
  func.func @transform_0(%arg0: i32) -> (i32, i32) {
    %c0_i32 = arith.constant 0 : i32
    %c0_i32_0 = arith.constant 0 : i32
    return %arg0, %c0_i32 : i32, i32
  }
  func.func @transform_1(%arg0: i32) -> (i32, i32) {
    %c0_i32 = arith.constant 0 : i32
    %c0_i32_0 = arith.constant 0 : i32
    %c0_i32_1 = arith.constant 0 : i32
    return %c0_i32, %c0_i32_0 : i32, i32
  }
  func.func @transform_2(%arg0: i32) -> (i32, i32) {
    %c0_i32 = arith.constant 0 : i32
    %c0_i32_0 = arith.constant 0 : i32
    %c0_i32_1 = arith.constant 0 : i32
    return %c0_i32, %c0_i32_0 : i32, i32
  }
  func.func @transform_3(%arg0: i32) -> (i32, i32) {
    %c0_i32 = arith.constant 0 : i32
    %c0_i32_0 = arith.constant 0 : i32
    %c0_i32_1 = arith.constant 0 : i32
    return %c0_i32, %c0_i32_0 : i32, i32
  }
  func.func @transform_4(%arg0: i32) -> (i32, i32) {
    %c0_i32 = arith.constant 0 : i32
    %c0_i32_0 = arith.constant 0 : i32
    return %arg0, %c0_i32 : i32, i32
  }
}

module attributes {stable_mosaic.version = 11 : i64} {
  func.func @_mm_fused_kernel(%arg0: i32, %arg1: memref<256x8xbf16, #tpu.memory_space<vmem>>, %arg2: memref<8x8xbf16, #tpu.memory_space<vmem>>, %arg3: memref<1x8xf32, #tpu.memory_space<vmem>>, %arg4: memref<1x8xf32, #tpu.memory_space<vmem>>, %arg5: memref<256x8xf32, #tpu.memory_space<vmem>>) attributes {dimension_semantics = [#tpu.dimension_semantics<parallel>], iteration_bounds = array<i64: 2>, scalar_prefetch = 0 : i64, scratch_operands = 0 : i64, tpu.core_type = #tpu.core_type<tc>, window_params = [{transform_indices = @transform_0, window_bounds = array<i64: 256, 8>}, {pipeline_mode = #tpu.pipeline_mode<synchronous>, transform_indices = @transform_1, window_bounds = array<i64: 8, 8>}, {pipeline_mode = #tpu.pipeline_mode<synchronous>, transform_indices = @transform_2, window_bounds = array<i64: 1, 8>}, {pipeline_mode = #tpu.pipeline_mode<synchronous>, transform_indices = @transform_3, window_bounds = array<i64: 1, 8>}, {transform_indices = @transform_4, window_bounds = array<i64: 256, 8>}]} {
    %c0 = arith.constant 0 : index
    %c0_0 = arith.constant 0 : index
    %0 = vector.load %arg1[%c0, %c0_0] : memref<256x8xbf16, #tpu.memory_space<vmem>>, vector<256x8xbf16>
    %cst = arith.constant 0.000000e+00 : bf16
    %1 = vector.broadcast %cst : bf16 to vector<256x8xbf16>
    %2 = arith.maximumf %0, %1 : vector<256x8xbf16>
    %c0_1 = arith.constant 0 : index
    %c0_2 = arith.constant 0 : index
    %3 = vector.load %arg2[%c0_1, %c0_2] : memref<8x8xbf16, #tpu.memory_space<vmem>>, vector<8x8xbf16>
    %cst_3 = arith.constant dense<0.000000e+00> : vector<256x8xf32>
    %4 = tpu.matmul %2, %3, %cst_3 {dimension_numbers = #tpu.dot_dimension_numbers<[1], [0], [0], [1], [0, 0, 1, 1], [], []>} : vector<256x8xbf16>, vector<8x8xbf16>, vector<256x8xf32> -> vector<256x8xf32>
    %c0_4 = arith.constant 0 : index
    %c0_5 = arith.constant 0 : index
    %5 = vector.load %arg3[%c0_4, %c0_5] : memref<1x8xf32, #tpu.memory_space<vmem>>, vector<1x8xf32>
    %6 = vector.broadcast %5 : vector<1x8xf32> to vector<256x8xf32>
    %7 = arith.mulf %4, %6 : vector<256x8xf32>
    %c0_6 = arith.constant 0 : index
    %c0_7 = arith.constant 0 : index
    %8 = vector.load %arg4[%c0_6, %c0_7] : memref<1x8xf32, #tpu.memory_space<vmem>>, vector<1x8xf32>
    %9 = vector.broadcast %8 : vector<1x8xf32> to vector<256x8xf32>
    %10 = arith.addf %7, %9 : vector<256x8xf32>
    %c0_8 = arith.constant 0 : index
    %c0_9 = arith.constant 0 : index
    %11 = vector.load %arg5[%c0_8, %c0_9] : memref<256x8xf32, #tpu.memory_space<vmem>>, vector<256x8xf32>
    tpu.vector_store %arg5[%c0_8, %c0_9], %10 {strides = array<i32>} : memref<256x8xf32, #tpu.memory_space<vmem>>, vector<256x8xf32>,
    return
  }
  func.func @transform_0(%arg0: i32) -> (i32, i32) {
    %c0_i32 = arith.constant 0 : i32
    %c0_i32_0 = arith.constant 0 : i32
    return %arg0, %c0_i32 : i32, i32
  }
  func.func @transform_1(%arg0: i32) -> (i32, i32) {
    %c0_i32 = arith.constant 0 : i32
    %c0_i32_0 = arith.constant 0 : i32
    %c0_i32_1 = arith.constant 0 : i32
    return %c0_i32, %c0_i32_0 : i32, i32
  }
  func.func @transform_2(%arg0: i32) -> (i32, i32) {
    %c0_i32 = arith.constant 0 : i32
    %c0_i32_0 = arith.constant 0 : i32
    %c0_i32_1 = arith.constant 0 : i32
    return %c0_i32, %c0_i32_0 : i32, i32
  }
  func.func @transform_3(%arg0: i32) -> (i32, i32) {
    %c0_i32 = arith.constant 0 : i32
    %c0_i32_0 = arith.constant 0 : i32
    %c0_i32_1 = arith.constant 0 : i32
    return %c0_i32, %c0_i32_0 : i32, i32
  }
  func.func @transform_4(%arg0: i32) -> (i32, i32) {
    %c0_i32 = arith.constant 0 : i32
    %c0_i32_0 = arith.constant 0 : i32
    return %arg0, %c0_i32 : i32, i32
  }
}

module attributes {stable_mosaic.version = 11 : i64} {
  func.func @_mm_fused_kernel(%arg0: i32, %arg1: memref<64x72xbf16, #tpu.memory_space<vmem>>, %arg2: memref<72x16xbf16, #tpu.memory_space<vmem>>, %arg3: memref<1x16xf32, #tpu.memory_space<vmem>>, %arg4: memref<1x16xf32, #tpu.memory_space<vmem>>, %arg5: memref<64x16xf32, #tpu.memory_space<vmem>>) attributes {dimension_semantics = [#tpu.dimension_semantics<parallel>], iteration_bounds = array<i64: 2>, scalar_prefetch = 0 : i64, scratch_operands = 0 : i64, tpu.core_type = #tpu.core_type<tc>, window_params = [{transform_indices = @transform_0, window_bounds = array<i64: 64, 72>}, {pipeline_mode = #tpu.pipeline_mode<synchronous>, transform_indices = @transform_1, window_bounds = array<i64: 72, 16>}, {pipeline_mode = #tpu.pipeline_mode<synchronous>, transform_indices = @transform_2, window_bounds = array<i64: 1, 16>}, {pipeline_mode = #tpu.pipeline_mode<synchronous>, transform_indices = @transform_3, window_bounds = array<i64: 1, 16>}, {transform_indices = @transform_4, window_bounds = array<i64: 64, 16>}]} {
    %c0 = arith.constant 0 : index
    %c0_0 = arith.constant 0 : index
    %0 = vector.load %arg1[%c0, %c0_0] : memref<64x72xbf16, #tpu.memory_space<vmem>>, vector<64x72xbf16>
    %cst = arith.constant 0.000000e+00 : bf16
    %1 = vector.broadcast %cst : bf16 to vector<64x72xbf16>
    %2 = arith.maximumf %0, %1 : vector<64x72xbf16>
    %c0_1 = arith.constant 0 : index
    %c0_2 = arith.constant 0 : index
    %3 = vector.load %arg2[%c0_1, %c0_2] : memref<72x16xbf16, #tpu.memory_space<vmem>>, vector<72x16xbf16>
    %cst_3 = arith.constant dense<0.000000e+00> : vector<64x16xf32>
    %4 = tpu.matmul %2, %3, %cst_3 {dimension_numbers = #tpu.dot_dimension_numbers<[1], [0], [0], [1], [0, 0, 1, 1], [], []>} : vector<64x72xbf16>, vector<72x16xbf16>, vector<64x16xf32> -> vector<64x16xf32>
    %c0_4 = arith.constant 0 : index
    %c0_5 = arith.constant 0 : index
    %5 = vector.load %arg3[%c0_4, %c0_5] : memref<1x16xf32, #tpu.memory_space<vmem>>, vector<1x16xf32>
    %6 = vector.broadcast %5 : vector<1x16xf32> to vector<64x16xf32>
    %7 = arith.mulf %4, %6 : vector<64x16xf32>
    %c0_6 = arith.constant 0 : index
    %c0_7 = arith.constant 0 : index
    %8 = vector.load %arg4[%c0_6, %c0_7] : memref<1x16xf32, #tpu.memory_space<vmem>>, vector<1x16xf32>
    %9 = vector.broadcast %8 : vector<1x16xf32> to vector<64x16xf32>
    %10 = arith.addf %7, %9 : vector<64x16xf32>
    %c0_8 = arith.constant 0 : index
    %c0_9 = arith.constant 0 : index
    %11 = vector.load %arg5[%c0_8, %c0_9] : memref<64x16xf32, #tpu.memory_space<vmem>>, vector<64x16xf32>
    tpu.vector_store %arg5[%c0_8, %c0_9], %10 {strides = array<i32>} : memref<64x16xf32, #tpu.memory_space<vmem>>, vector<64x16xf32>,
    return
  }
  func.func @transform_0(%arg0: i32) -> (i32, i32) {
    %c0_i32 = arith.constant 0 : i32
    %c0_i32_0 = arith.constant 0 : i32
    return %arg0, %c0_i32 : i32, i32
  }
  func.func @transform_1(%arg0: i32) -> (i32, i32) {
    %c0_i32 = arith.constant 0 : i32
    %c0_i32_0 = arith.constant 0 : i32
    %c0_i32_1 = arith.constant 0 : i32
    return %c0_i32, %c0_i32_0 : i32, i32
  }
  func.func @transform_2(%arg0: i32) -> (i32, i32) {
    %c0_i32 = arith.constant 0 : i32
    %c0_i32_0 = arith.constant 0 : i32
    %c0_i32_1 = arith.constant 0 : i32
    return %c0_i32, %c0_i32_0 : i32, i32
  }
  func.func @transform_3(%arg0: i32) -> (i32, i32) {
    %c0_i32 = arith.constant 0 : i32
    %c0_i32_0 = arith.constant 0 : i32
    %c0_i32_1 = arith.constant 0 : i32
    return %c0_i32, %c0_i32_0 : i32, i32
  }
  func.func @transform_4(%arg0: i32) -> (i32, i32) {
    %c0_i32 = arith.constant 0 : i32
    %c0_i32_0 = arith.constant 0 : i32
    return %arg0, %c0_i32 : i32, i32
  }
}

module attributes {stable_mosaic.version = 11 : i64} {
  func.func @_mm_fused_kernel(%arg0: i32, %arg1: memref<256x12xbf16, #tpu.memory_space<vmem>>, %arg2: memref<12x8xbf16, #tpu.memory_space<vmem>>, %arg3: memref<1x8xf32, #tpu.memory_space<vmem>>, %arg4: memref<1x8xf32, #tpu.memory_space<vmem>>, %arg5: memref<256x8xf32, #tpu.memory_space<vmem>>) attributes {dimension_semantics = [#tpu.dimension_semantics<parallel>], iteration_bounds = array<i64: 2>, scalar_prefetch = 0 : i64, scratch_operands = 0 : i64, tpu.core_type = #tpu.core_type<tc>, window_params = [{transform_indices = @transform_0, window_bounds = array<i64: 256, 12>}, {pipeline_mode = #tpu.pipeline_mode<synchronous>, transform_indices = @transform_1, window_bounds = array<i64: 12, 8>}, {pipeline_mode = #tpu.pipeline_mode<synchronous>, transform_indices = @transform_2, window_bounds = array<i64: 1, 8>}, {pipeline_mode = #tpu.pipeline_mode<synchronous>, transform_indices = @transform_3, window_bounds = array<i64: 1, 8>}, {transform_indices = @transform_4, window_bounds = array<i64: 256, 8>}]} {
    %c0 = arith.constant 0 : index
    %c0_0 = arith.constant 0 : index
    %0 = vector.load %arg1[%c0, %c0_0] : memref<256x12xbf16, #tpu.memory_space<vmem>>, vector<256x12xbf16>
    %cst = arith.constant 0.000000e+00 : bf16
    %1 = vector.broadcast %cst : bf16 to vector<256x12xbf16>
    %2 = arith.maximumf %0, %1 : vector<256x12xbf16>
    %c0_1 = arith.constant 0 : index
    %c0_2 = arith.constant 0 : index
    %3 = vector.load %arg2[%c0_1, %c0_2] : memref<12x8xbf16, #tpu.memory_space<vmem>>, vector<12x8xbf16>
    %cst_3 = arith.constant dense<0.000000e+00> : vector<256x8xf32>
    %4 = tpu.matmul %2, %3, %cst_3 {dimension_numbers = #tpu.dot_dimension_numbers<[1], [0], [0], [1], [0, 0, 1, 1], [], []>} : vector<256x12xbf16>, vector<12x8xbf16>, vector<256x8xf32> -> vector<256x8xf32>
    %c0_4 = arith.constant 0 : index
    %c0_5 = arith.constant 0 : index
    %5 = vector.load %arg3[%c0_4, %c0_5] : memref<1x8xf32, #tpu.memory_space<vmem>>, vector<1x8xf32>
    %6 = vector.broadcast %5 : vector<1x8xf32> to vector<256x8xf32>
    %7 = arith.mulf %4, %6 : vector<256x8xf32>
    %c0_6 = arith.constant 0 : index
    %c0_7 = arith.constant 0 : index
    %8 = vector.load %arg4[%c0_6, %c0_7] : memref<1x8xf32, #tpu.memory_space<vmem>>, vector<1x8xf32>
    %9 = vector.broadcast %8 : vector<1x8xf32> to vector<256x8xf32>
    %10 = arith.addf %7, %9 : vector<256x8xf32>
    %c0_8 = arith.constant 0 : index
    %c0_9 = arith.constant 0 : index
    %11 = vector.load %arg5[%c0_8, %c0_9] : memref<256x8xf32, #tpu.memory_space<vmem>>, vector<256x8xf32>
    tpu.vector_store %arg5[%c0_8, %c0_9], %10 {strides = array<i32>} : memref<256x8xf32, #tpu.memory_space<vmem>>, vector<256x8xf32>,
    return
  }
  func.func @transform_0(%arg0: i32) -> (i32, i32) {
    %c0_i32 = arith.constant 0 : i32
    %c0_i32_0 = arith.constant 0 : i32
    return %arg0, %c0_i32 : i32, i32
  }
  func.func @transform_1(%arg0: i32) -> (i32, i32) {
    %c0_i32 = arith.constant 0 : i32
    %c0_i32_0 = arith.constant 0 : i32
    %c0_i32_1 = arith.constant 0 : i32
    return %c0_i32, %c0_i32_0 : i32, i32
  }
  func.func @transform_2(%arg0: i32) -> (i32, i32) {
    %c0_i32 = arith.constant 0 : i32
    %c0_i32_0 = arith.constant 0 : i32
    %c0_i32_1 = arith.constant 0 : i32
    return %c0_i32, %c0_i32_0 : i32, i32
  }
  func.func @transform_3(%arg0: i32) -> (i32, i32) {
    %c0_i32 = arith.constant 0 : i32
    %c0_i32_0 = arith.constant 0 : i32
    %c0_i32_1 = arith.constant 0 : i32
    return %c0_i32, %c0_i32_0 : i32, i32
  }
  func.func @transform_4(%arg0: i32) -> (i32, i32) {
    %c0_i32 = arith.constant 0 : i32
    %c0_i32_0 = arith.constant 0 : i32
    return %arg0, %c0_i32 : i32, i32
  }
}

module attributes {stable_mosaic.version = 11 : i64} {
  func.func @_conv3_tap_kernel(%arg0: i32, %arg1: memref<80x24xbf16, #tpu.memory_space<vmem>>, %arg2: memref<3x24x8xbf16, #tpu.memory_space<vmem>>, %arg3: memref<1x8xf32, #tpu.memory_space<vmem>>, %arg4: memref<1x8xf32, #tpu.memory_space<vmem>>, %arg5: memref<64x8xf32, #tpu.memory_space<vmem>>) attributes {dimension_semantics = [#tpu.dimension_semantics<parallel>], iteration_bounds = array<i64: 2>, scalar_prefetch = 0 : i64, scratch_operands = 0 : i64, tpu.core_type = #tpu.core_type<tc>, window_params = [{transform_indices = @transform_0, window_bounds = array<i64: 80, 24>}, {pipeline_mode = #tpu.pipeline_mode<synchronous>, transform_indices = @transform_1, window_bounds = array<i64: 3, 24, 8>}, {pipeline_mode = #tpu.pipeline_mode<synchronous>, transform_indices = @transform_2, window_bounds = array<i64: 1, 8>}, {pipeline_mode = #tpu.pipeline_mode<synchronous>, transform_indices = @transform_3, window_bounds = array<i64: 1, 8>}, {transform_indices = @transform_4, window_bounds = array<i64: 64, 8>}]} {
    %c0 = arith.constant 0 : index
    %c0_0 = arith.constant 0 : index
    %0 = vector.load %arg1[%c0, %c0_0] : memref<80x24xbf16, #tpu.memory_space<vmem>>, vector<80x24xbf16>
    %1 = arith.extf %0 : vector<80x24xbf16> to vector<80x24xf32>
    %cst = arith.constant 0.000000e+00 : f32
    %2 = vector.broadcast %cst : f32 to vector<80x24xf32>
    %3 = arith.maximumf %1, %2 : vector<80x24xf32>
    %cst_1 = arith.constant 0.000000e+00 : f32
    %4 = vector.broadcast %cst_1 : f32 to vector<64x8xf32>
    %5 = vector.extract_strided_slice %3 {offsets = [0, 0], sizes = [64, 24], strides = [1, 1]} : vector<80x24xf32> to vector<64x24xf32>
    %c0_2 = arith.constant 0 : index
    %c0_3 = arith.constant 0 : index
    %c0_4 = arith.constant 0 : index
    %6 = vector.load %arg2[%c0_2, %c0_3, %c0_4] : memref<3x24x8xbf16, #tpu.memory_space<vmem>>, vector<1x24x8xbf16>
    %7 = vector.shape_cast %6 : vector<1x24x8xbf16> to vector<24x8xbf16>
    %8 = arith.extf %7 : vector<24x8xbf16> to vector<24x8xf32>
    %cst_5 = arith.constant dense<0.000000e+00> : vector<64x8xf32>
    %9 = tpu.matmul %5, %8, %cst_5 {dimension_numbers = #tpu.dot_dimension_numbers<[1], [0], [0], [1], [0, 0, 1, 1], [], []>} : vector<64x24xf32>, vector<24x8xf32>, vector<64x8xf32> -> vector<64x8xf32>
    %10 = arith.addf %4, %9 : vector<64x8xf32>
    %11 = vector.extract_strided_slice %3 {offsets = [8, 0], sizes = [64, 24], strides = [1, 1]} : vector<80x24xf32> to vector<64x24xf32>
    %c1 = arith.constant 1 : index
    %c0_6 = arith.constant 0 : index
    %c0_7 = arith.constant 0 : index
    %12 = vector.load %arg2[%c1, %c0_6, %c0_7] : memref<3x24x8xbf16, #tpu.memory_space<vmem>>, vector<1x24x8xbf16>
    %13 = vector.shape_cast %12 : vector<1x24x8xbf16> to vector<24x8xbf16>
    %14 = arith.extf %13 : vector<24x8xbf16> to vector<24x8xf32>
    %cst_8 = arith.constant dense<0.000000e+00> : vector<64x8xf32>
    %15 = tpu.matmul %11, %14, %cst_8 {dimension_numbers = #tpu.dot_dimension_numbers<[1], [0], [0], [1], [0, 0, 1, 1], [], []>} : vector<64x24xf32>, vector<24x8xf32>, vector<64x8xf32> -> vector<64x8xf32>
    %16 = arith.addf %10, %15 : vector<64x8xf32>
    %17 = vector.extract_strided_slice %3 {offsets = [16, 0], sizes = [64, 24], strides = [1, 1]} : vector<80x24xf32> to vector<64x24xf32>
    %c2 = arith.constant 2 : index
    %c0_9 = arith.constant 0 : index
    %c0_10 = arith.constant 0 : index
    %18 = vector.load %arg2[%c2, %c0_9, %c0_10] : memref<3x24x8xbf16, #tpu.memory_space<vmem>>, vector<1x24x8xbf16>
    %19 = vector.shape_cast %18 : vector<1x24x8xbf16> to vector<24x8xbf16>
    %20 = arith.extf %19 : vector<24x8xbf16> to vector<24x8xf32>
    %cst_11 = arith.constant dense<0.000000e+00> : vector<64x8xf32>
    %21 = tpu.matmul %17, %20, %cst_11 {dimension_numbers = #tpu.dot_dimension_numbers<[1], [0], [0], [1], [0, 0, 1, 1], [], []>} : vector<64x24xf32>, vector<24x8xf32>, vector<64x8xf32> -> vector<64x8xf32>
    %22 = arith.addf %16, %21 : vector<64x8xf32>
    %c0_12 = arith.constant 0 : index
    %c0_13 = arith.constant 0 : index
    %23 = vector.load %arg3[%c0_12, %c0_13] : memref<1x8xf32, #tpu.memory_space<vmem>>, vector<1x8xf32>
    %24 = vector.broadcast %23 : vector<1x8xf32> to vector<64x8xf32>
    %25 = arith.mulf %22, %24 : vector<64x8xf32>
    %c0_14 = arith.constant 0 : index
    %c0_15 = arith.constant 0 : index
    %26 = vector.load %arg4[%c0_14, %c0_15] : memref<1x8xf32, #tpu.memory_space<vmem>>, vector<1x8xf32>
    %27 = vector.broadcast %26 : vector<1x8xf32> to vector<64x8xf32>
    %28 = arith.addf %25, %27 : vector<64x8xf32>
    %c0_16 = arith.constant 0 : index
    %c0_17 = arith.constant 0 : index
    %29 = vector.load %arg5[%c0_16, %c0_17] : memref<64x8xf32, #tpu.memory_space<vmem>>, vector<64x8xf32>
    tpu.vector_store %arg5[%c0_16, %c0_17], %28 {strides = array<i32>} : memref<64x8xf32, #tpu.memory_space<vmem>>, vector<64x8xf32>,
    return
  }
  func.func @transform_0(%arg0: i32) -> (i32, i32) {
    %c0_i32 = arith.constant 0 : i32
    %c0_i32_0 = arith.constant 0 : i32
    return %arg0, %c0_i32 : i32, i32
  }
  func.func @transform_1(%arg0: i32) -> (i32, i32, i32) {
    %c0_i32 = arith.constant 0 : i32
    %c0_i32_0 = arith.constant 0 : i32
    %c0_i32_1 = arith.constant 0 : i32
    %c0_i32_2 = arith.constant 0 : i32
    return %c0_i32, %c0_i32_0, %c0_i32_1 : i32, i32, i32
  }
  func.func @transform_2(%arg0: i32) -> (i32, i32) {
    %c0_i32 = arith.constant 0 : i32
    %c0_i32_0 = arith.constant 0 : i32
    %c0_i32_1 = arith.constant 0 : i32
    return %c0_i32, %c0_i32_0 : i32, i32
  }
  func.func @transform_3(%arg0: i32) -> (i32, i32) {
    %c0_i32 = arith.constant 0 : i32
    %c0_i32_0 = arith.constant 0 : i32
    %c0_i32_1 = arith.constant 0 : i32
    return %c0_i32, %c0_i32_0 : i32, i32
  }
  func.func @transform_4(%arg0: i32) -> (i32, i32) {
    %c0_i32 = arith.constant 0 : i32
    %c0_i32_0 = arith.constant 0 : i32
    return %arg0, %c0_i32 : i32, i32
  }
}

module attributes {stable_mosaic.version = 11 : i64} {
  func.func @_mm_fused_kernel(%arg0: i32, %arg1: memref<32x144xbf16, #tpu.memory_space<vmem>>, %arg2: memref<144x16xbf16, #tpu.memory_space<vmem>>, %arg3: memref<1x16xf32, #tpu.memory_space<vmem>>, %arg4: memref<1x16xf32, #tpu.memory_space<vmem>>, %arg5: memref<32x16xf32, #tpu.memory_space<vmem>>) attributes {dimension_semantics = [#tpu.dimension_semantics<parallel>], iteration_bounds = array<i64: 1>, scalar_prefetch = 0 : i64, scratch_operands = 0 : i64, tpu.core_type = #tpu.core_type<tc>, window_params = [{transform_indices = @transform_0, window_bounds = array<i64: 32, 144>}, {pipeline_mode = #tpu.pipeline_mode<synchronous>, transform_indices = @transform_1, window_bounds = array<i64: 144, 16>}, {pipeline_mode = #tpu.pipeline_mode<synchronous>, transform_indices = @transform_2, window_bounds = array<i64: 1, 16>}, {pipeline_mode = #tpu.pipeline_mode<synchronous>, transform_indices = @transform_3, window_bounds = array<i64: 1, 16>}, {transform_indices = @transform_4, window_bounds = array<i64: 32, 16>}]} {
    %c0 = arith.constant 0 : index
    %c0_0 = arith.constant 0 : index
    %0 = vector.load %arg1[%c0, %c0_0] : memref<32x144xbf16, #tpu.memory_space<vmem>>, vector<32x144xbf16>
    %cst = arith.constant 0.000000e+00 : bf16
    %1 = vector.broadcast %cst : bf16 to vector<32x144xbf16>
    %2 = arith.maximumf %0, %1 : vector<32x144xbf16>
    %c0_1 = arith.constant 0 : index
    %c0_2 = arith.constant 0 : index
    %3 = vector.load %arg2[%c0_1, %c0_2] : memref<144x16xbf16, #tpu.memory_space<vmem>>, vector<144x16xbf16>
    %cst_3 = arith.constant dense<0.000000e+00> : vector<32x16xf32>
    %4 = tpu.matmul %2, %3, %cst_3 {dimension_numbers = #tpu.dot_dimension_numbers<[1], [0], [0], [1], [0, 0, 1, 1], [], []>} : vector<32x144xbf16>, vector<144x16xbf16>, vector<32x16xf32> -> vector<32x16xf32>
    %c0_4 = arith.constant 0 : index
    %c0_5 = arith.constant 0 : index
    %5 = vector.load %arg3[%c0_4, %c0_5] : memref<1x16xf32, #tpu.memory_space<vmem>>, vector<1x16xf32>
    %6 = vector.broadcast %5 : vector<1x16xf32> to vector<32x16xf32>
    %7 = arith.mulf %4, %6 : vector<32x16xf32>
    %c0_6 = arith.constant 0 : index
    %c0_7 = arith.constant 0 : index
    %8 = vector.load %arg4[%c0_6, %c0_7] : memref<1x16xf32, #tpu.memory_space<vmem>>, vector<1x16xf32>
    %9 = vector.broadcast %8 : vector<1x16xf32> to vector<32x16xf32>
    %10 = arith.addf %7, %9 : vector<32x16xf32>
    %c0_8 = arith.constant 0 : index
    %c0_9 = arith.constant 0 : index
    %11 = vector.load %arg5[%c0_8, %c0_9] : memref<32x16xf32, #tpu.memory_space<vmem>>, vector<32x16xf32>
    tpu.vector_store %arg5[%c0_8, %c0_9], %10 {strides = array<i32>} : memref<32x16xf32, #tpu.memory_space<vmem>>, vector<32x16xf32>,
    return
  }
  func.func @transform_0(%arg0: i32) -> (i32, i32) {
    %c0_i32 = arith.constant 0 : i32
    %c0_i32_0 = arith.constant 0 : i32
    return %arg0, %c0_i32 : i32, i32
  }
  func.func @transform_1(%arg0: i32) -> (i32, i32) {
    %c0_i32 = arith.constant 0 : i32
    %c0_i32_0 = arith.constant 0 : i32
    %c0_i32_1 = arith.constant 0 : i32
    return %c0_i32, %c0_i32_0 : i32, i32
  }
  func.func @transform_2(%arg0: i32) -> (i32, i32) {
    %c0_i32 = arith.constant 0 : i32
    %c0_i32_0 = arith.constant 0 : i32
    %c0_i32_1 = arith.constant 0 : i32
    return %c0_i32, %c0_i32_0 : i32, i32
  }
  func.func @transform_3(%arg0: i32) -> (i32, i32) {
    %c0_i32 = arith.constant 0 : i32
    %c0_i32_0 = arith.constant 0 : i32
    %c0_i32_1 = arith.constant 0 : i32
    return %c0_i32, %c0_i32_0 : i32, i32
  }
  func.func @transform_4(%arg0: i32) -> (i32, i32) {
    %c0_i32 = arith.constant 0 : i32
    %c0_i32_0 = arith.constant 0 : i32
    return %arg0, %c0_i32 : i32, i32
  }
}

module attributes {stable_mosaic.version = 11 : i64} {
  func.func @_head_kernel(%arg0: i32, %arg1: memref<2x16x32xf32, #tpu.memory_space<vmem>>, %arg2: memref<1x1x32xf32, #tpu.memory_space<vmem>>, %arg3: memref<1x1x32xf32, #tpu.memory_space<vmem>>, %arg4: memref<32x10xf32, #tpu.memory_space<vmem>>, %arg5: memref<1x10xf32, #tpu.memory_space<vmem>>, %arg6: memref<2x32xf32, #tpu.memory_space<vmem>>, %arg7: memref<2x10xf32, #tpu.memory_space<vmem>>) attributes {dimension_semantics = [#tpu.dimension_semantics<arbitrary>], iteration_bounds = array<i64: 1>, scalar_prefetch = 0 : i64, scratch_operands = 0 : i64, tpu.core_type = #tpu.core_type<tc>, window_params = [{pipeline_mode = #tpu.pipeline_mode<synchronous>, transform_indices = @transform_0, window_bounds = array<i64: 2, 16, 32>}, {pipeline_mode = #tpu.pipeline_mode<synchronous>, transform_indices = @transform_1, window_bounds = array<i64: 1, 1, 32>}, {pipeline_mode = #tpu.pipeline_mode<synchronous>, transform_indices = @transform_2, window_bounds = array<i64: 1, 1, 32>}, {pipeline_mode = #tpu.pipeline_mode<synchronous>, transform_indices = @transform_3, window_bounds = array<i64: 32, 10>}, {pipeline_mode = #tpu.pipeline_mode<synchronous>, transform_indices = @transform_4, window_bounds = array<i64: 1, 10>}, {pipeline_mode = #tpu.pipeline_mode<synchronous>, transform_indices = @transform_5, window_bounds = array<i64: 2, 32>}, {pipeline_mode = #tpu.pipeline_mode<synchronous>, transform_indices = @transform_6, window_bounds = array<i64: 2, 10>}]} {
    %c0 = arith.constant 0 : index
    %c0_0 = arith.constant 0 : index
    %c0_1 = arith.constant 0 : index
    %0 = vector.load %arg1[%c0, %c0_0, %c0_1] : memref<2x16x32xf32, #tpu.memory_space<vmem>>, vector<2x16x32xf32>
    %c0_2 = arith.constant 0 : index
    %c0_3 = arith.constant 0 : index
    %c0_4 = arith.constant 0 : index
    %1 = vector.load %arg2[%c0_2, %c0_3, %c0_4] : memref<1x1x32xf32, #tpu.memory_space<vmem>>, vector<1x1x32xf32>
    %2 = vector.broadcast %1 : vector<1x1x32xf32> to vector<2x16x32xf32>
    %3 = arith.mulf %0, %2 : vector<2x16x32xf32>
    %c0_5 = arith.constant 0 : index
    %c0_6 = arith.constant 0 : index
    %c0_7 = arith.constant 0 : index
    %4 = vector.load %arg3[%c0_5, %c0_6, %c0_7] : memref<1x1x32xf32, #tpu.memory_space<vmem>>, vector<1x1x32xf32>
    %5 = vector.broadcast %4 : vector<1x1x32xf32> to vector<2x16x32xf32>
    %6 = arith.addf %3, %5 : vector<2x16x32xf32>
    %cst = arith.constant 0.000000e+00 : f32
    %7 = vector.broadcast %cst : f32 to vector<2x16x32xf32>
    %8 = arith.maximumf %6, %7 : vector<2x16x32xf32>
    %cst_8 = arith.constant dense<0.000000e+00> : vector<2x32xf32>
    %9 = vector.multi_reduction <add>, %8, %cst_8 [1] : vector<2x16x32xf32> to vector<2x32xf32>
    %cst_9 = arith.constant 1.600000e+01 : f32
    %10 = vector.broadcast %cst_9 : f32 to vector<2x32xf32>
    %11 = arith.divf %9, %10 : vector<2x32xf32>
    %c0_10 = arith.constant 0 : index
    %c0_11 = arith.constant 0 : index
    %12 = vector.load %arg6[%c0_10, %c0_11] : memref<2x32xf32, #tpu.memory_space<vmem>>, vector<2x32xf32>
    tpu.vector_store %arg6[%c0_10, %c0_11], %11 {strides = array<i32>} : memref<2x32xf32, #tpu.memory_space<vmem>>, vector<2x32xf32>,
    %c0_12 = arith.constant 0 : index
    %c0_13 = arith.constant 0 : index
    %13 = vector.load %arg4[%c0_12, %c0_13] : memref<32x10xf32, #tpu.memory_space<vmem>>, vector<32x10xf32>
    %cst_14 = arith.constant dense<0.000000e+00> : vector<2x10xf32>
    %14 = tpu.matmul %11, %13, %cst_14 {dimension_numbers = #tpu.dot_dimension_numbers<[1], [0], [0], [1], [0, 0, 1, 1], [], []>} : vector<2x32xf32>, vector<32x10xf32>, vector<2x10xf32> -> vector<2x10xf32>
    %c0_15 = arith.constant 0 : index
    %c0_16 = arith.constant 0 : index
    %15 = vector.load %arg5[%c0_15, %c0_16] : memref<1x10xf32, #tpu.memory_space<vmem>>, vector<1x10xf32>
    %16 = vector.broadcast %15 : vector<1x10xf32> to vector<2x10xf32>
    %17 = arith.addf %14, %16 : vector<2x10xf32>
    %c0_17 = arith.constant 0 : index
    %c0_18 = arith.constant 0 : index
    %18 = vector.load %arg7[%c0_17, %c0_18] : memref<2x10xf32, #tpu.memory_space<vmem>>, vector<2x10xf32>
    tpu.vector_store %arg7[%c0_17, %c0_18], %17 {strides = array<i32>} : memref<2x10xf32, #tpu.memory_space<vmem>>, vector<2x10xf32>,
    return
  }
  func.func @transform_0(%arg0: i32) -> (i32, i32, i32) {
    %c0_i32 = arith.constant 0 : i32
    %c0_i32_0 = arith.constant 0 : i32
    %c0_i32_1 = arith.constant 0 : i32
    %c0_i32_2 = arith.constant 0 : i32
    return %c0_i32, %c0_i32_0, %c0_i32_1 : i32, i32, i32
  }
  func.func @transform_1(%arg0: i32) -> (i32, i32, i32) {
    %c0_i32 = arith.constant 0 : i32
    %c0_i32_0 = arith.constant 0 : i32
    %c0_i32_1 = arith.constant 0 : i32
    %c0_i32_2 = arith.constant 0 : i32
    return %c0_i32, %c0_i32_0, %c0_i32_1 : i32, i32, i32
  }
  func.func @transform_2(%arg0: i32) -> (i32, i32, i32) {
    %c0_i32 = arith.constant 0 : i32
    %c0_i32_0 = arith.constant 0 : i32
    %c0_i32_1 = arith.constant 0 : i32
    %c0_i32_2 = arith.constant 0 : i32
    return %c0_i32, %c0_i32_0, %c0_i32_1 : i32, i32, i32
  }
  func.func @transform_3(%arg0: i32) -> (i32, i32) {
    %c0_i32 = arith.constant 0 : i32
    %c0_i32_0 = arith.constant 0 : i32
    %c0_i32_1 = arith.constant 0 : i32
    return %c0_i32, %c0_i32_0 : i32, i32
  }
  func.func @transform_4(%arg0: i32) -> (i32, i32) {
    %c0_i32 = arith.constant 0 : i32
    %c0_i32_0 = arith.constant 0 : i32
    %c0_i32_1 = arith.constant 0 : i32
    return %c0_i32, %c0_i32_0 : i32, i32
  }
  func.func @transform_5(%arg0: i32) -> (i32, i32) {
    %c0_i32 = arith.constant 0 : i32
    %c0_i32_0 = arith.constant 0 : i32
    %c0_i32_1 = arith.constant 0 : i32
    return %c0_i32, %c0_i32_0 : i32, i32
  }
  func.func @transform_6(%arg0: i32) -> (i32, i32) {
    %c0_i32 = arith.constant 0 : i32
    %c0_i32_0 = arith.constant 0 : i32
    %c0_i32_1 = arith.constant 0 : i32
    return %c0_i32, %c0_i32_0 : i32, i32
  }
}

</mosaic_0001>

<bundles_post_ra>
// kernel: forward.22
= control target key start
LH: loop header
LB: loop body
LE: loop exit
PB: predicated region body
PF: predicated region fallthrough
CT: control target
= control target key end

     0   :  { %s879_s15 = smov 0   ;;  %s1125_s0 = inlined_call_operand.vmem [shape: bf16[512,12], index: 0, kind: input, shape index: {}]   ;;  %s1126_s1 = inlined_call_operand.vmem [shape: bf16[12,4], index: 1, kind: input, shape index: {}]   ;;  %s1127_s2 = inlined_call_operand.vmem [shape: f32[1,4], index: 2, kind: input, shape index: {}]   ;;  %s1128_s3 = inlined_call_operand.vmem [shape: f32[1,4], index: 3, kind: input, shape index: {}]   ;;  %s1129_s4 = inlined_call_operand.vmem [shape: f32[512,4], index: 4, kind: output, shape index: {}]  }
   0x1 LB: > { %s734_s16 = sadd.s32 4294967295, %s851_s15   ;;  %p738_p0 = scmp.ge.s32.totalorder %s851_s15, 1  ;;  %s851_s15 = sphi %s879_s15, %s14_s15  }
   0x2   : > { %p163_p1 = scmp.lt.s32.totalorder %s851_s15, 3 }
   0x4   : > { %p164_p2 = pnand %p738_p0, %p163_p1 }
   0x5   : > { %v844_v0 = vld [vmem:[%s1126_s1] sm:$0x3f] (!%p164_p2)   ;;  %vm402_vm0 = vcmask (!%p164_p2), 1045504   ;;  %s739_s19 = sshll.u32 (!%p164_p2), %s734_s16, 5  ;;  %vm353_vm1 = vcmask (!%p164_p2), 97280   ;;  %v853_v5 = vmov (!%p164_p2), 0  }
   0x6   : > { %167 = sbr.rel (%p164_p2) target bundleno = 267 (0x10b), region = 36  ;;  %833 = vmatprep.subr.msk.bf16.mxu0 (!%p164_p2), %vm402_vm0, %v844_v0  ;;  %834 = vmatprep.subr.msk.bf16.mxu1 (!%p164_p2), %vm402_vm0, %v844_v0  ;;  %v404_v1 = vsel (!%p164_p2), %vm402_vm0, %v844_v0, 0  ;;  %p190_p3 = scmp.lt.s32.totalorder (!%p164_p2), %s739_s19, 63  ;;  %vm645_vm2 = vcmask (!%p164_p2), 31744  }
   0x7   : > { %798 = vmatpush3.bf16.msra.mxu0 (!%p164_p2), %v404_v1  ;;  %832 = vmatpush3.bf16.msra.mxu1 (!%p164_p2), %v404_v1 }
   0xd   : > { %s1131_s19 = smov (!%p190_p3, %s739_s19), 63 }
   0xe   : > { %s740_s20 = sshll.u32 %s1131_s19, 2  ;;  %s742_s26 = sshll.u32 %s1131_s19, 3 }
   0xf   : > { %s896_s23 = scalar_lea.vmem %s1125_s0, %s740_s20  ;;  %s993_s5 = scalar_lea.vmem %s1129_s4, %s742_s26 }
  0x10   : > { %v202_v2 = vld [vmem:[%s896_s23] sm:$0xf]  ;;  %v203_v3 = vld [vmem:[%s896_s23 + $0x4] sm:$0xf]  ;;  %v204_v10 = vld [vmem:[%s896_s23 + $0x8] sm:$0xf] }
  0x11   : > { %v218_v4 = vld [vmem:[%s896_s23 + $0x40] sm:$0xf]  ;;  %v234_v6 = vmax.bf16 %v853_v5, %v202_v2  ;;  %v235_v7 = vmax.bf16 %v853_v5, %v203_v3  ;;  %v219_v8 = vld [vmem:[%s896_s23 + $0x44] sm:$0xf]  ;;  %v205_v11 = vld [vmem:[%s896_s23 + $0xc] sm:$0xf]  ;;  %v236_v13 = vmax.bf16 %v853_v5, %v204_v10 }
  0x12   : > { %v250_v9 = vmax.bf16 %v853_v5, %v218_v4  ;;  %v251_v12 = vmax.bf16 %v853_v5, %v219_v8  ;;  %v237_v14 = vmax.bf16 %v853_v5, %v205_v11  ;;  %v220_v15 = vld [vmem:[%s896_s23 + $0x48] sm:$0xf]  ;;  %v221_v16 = vld [vmem:[%s896_s23 + $0x4c] sm:$0xf]  ;;  %v206_v17 = vld [vmem:[%s896_s23 + $0x10] sm:$0xf] }
  0x13   : > { %v743_v18 = vcombine.low %v234_v6, %v235_v7  ;;  %v252_v19 = vmax.bf16 %v853_v5, %v220_v15  ;;  %v253_v20 = vmax.bf16 %v853_v5, %v221_v16  ;;  %v207_v21 = vld [vmem:[%s896_s23 + $0x14] sm:$0xf]  ;;  %v238_v22 = vmax.bf16 %v853_v5, %v206_v17  ;;  %v222_v23 = vld [vmem:[%s896_s23 + $0x50] sm:$0xf]  ;;  %v208_v29 = vld [vmem:[%s896_s23 + $0x18] sm:$0xf] }
  0x14   : > { %v223_v24 = vld [vmem:[%s896_s23 + $0x54] sm:$0xf]  ;;  %v751_v25 = vcombine.low %v250_v9, %v251_v12  ;;  %v744_v26 = vcombine.low %v236_v13, %v237_v14  ;;  %v239_v27 = vmax.bf16 %v853_v5, %v207_v21  ;;  %v254_v28 = vmax.bf16 %v853_v5, %v222_v23  ;;  %v209_v30 = vld [vmem:[%s896_s23 + $0x1c] sm:$0xf]  ;;  %v224_v31 = vld [vmem:[%s896_s23 + $0x58] sm:$0xf] }
  0x15   : > { %799 = vmatprep.mubr.msk.bf16.mxu0 %vm353_vm1, %v743_v18  ;;  %v752_v32 = vcombine.low %v252_v19, %v253_v20  ;;  %v255_v33 = vmax.bf16 %v853_v5, %v223_v24  ;;  %v240_v34 = vmax.bf16 %v853_v5, %v208_v29  ;;  %v225_v35 = vld [vmem:[%s896_s23 + $0x5c] sm:$0xf]  ;;  %v210_v36 = vld [vmem:[%s896_s23 + $0x20] sm:$0xf]  ;;  %v211_v37 = vld [vmem:[%s896_s23 + $0x24] sm:$0xf]  ;;  %v241_v39 = vmax.bf16 %v853_v5, %v209_v30 }
  0x16   : > { %815 = vmatprep.mubr.msk.bf16.mxu1 %vm353_vm1, %v751_v25  ;;  %800 = vmatmul.mubr.msk.bf16.vlgmr.msra.gmra.mrb[0].mxu0 %vm353_vm1, %v744_v26  ;;  %v745_v38 = vcombine.low %v238_v22, %v239_v27  ;;  %v256_v40 = vmax.bf16 %v853_v5, %v224_v31  ;;  %v226_v41 = vld [vmem:[%s896_s23 + $0x60] sm:$0xf]  ;;  %v227_v42 = vld [vmem:[%s896_s23 + $0x64] sm:$0xf]  ;;  %v257_v44 = vmax.bf16 %v853_v5, %v225_v35  ;;  %v212_v52 = vld [vmem:[%s896_s23 + $0x28] sm:$0xf] }
  0x17   : > { %816 = vmatmul.mubr.msk.bf16.vlgmr.msra.gmra.mrb[0].mxu1 %vm353_vm1, %v752_v32  ;;  %v753_v43 = vcombine.low %v254_v28, %v255_v33  ;;  %v242_v45 = vmax.bf16 %v853_v5, %v210_v36  ;;  %v243_v46 = vmax.bf16 %v853_v5, %v211_v37  ;;  %v258_v47 = vmax.bf16 %v853_v5, %v226_v41  ;;  %v213_v53 = vld [vmem:[%s896_s23 + $0x2c] sm:$0xf]  ;;  %v228_v54 = vld [vmem:[%s896_s23 + $0x68] sm:$0xf]  ;;  %v214_v57 = vld [vmem:[%s896_s23 + $0x30] sm:$0xf] }
  0x18   : > { %803 = vmatprep.mubr.msk.bf16.mxu0 %vm353_vm1, %v745_v38  ;;  %v259_v48 = vmax.bf16 %v853_v5, %v227_v42  ;;  %v746_v49 = vcombine.low %v240_v34, %v241_v39  ;;  %v754_v50 = vcombine.low %v256_v40, %v257_v44  ;;  %v229_v56 = vld [vmem:[%s896_s23 + $0x6c] sm:$0xf]  ;;  %v215_v58 = vld [vmem:[%s896_s23 + $0x34] sm:$0xf]  ;;  %v230_v59 = vld [vmem:[%s896_s23 + $0x70] sm:$0xf]  ;;  %v244_v61 = vmax.bf16 %v853_v5, %v212_v52 }
  0x19   : > { %819 = vmatprep.mubr.msk.bf16.mxu1 %vm353_vm1, %v753_v43  ;;  %v747_v51 = vcombine.low %v242_v45, %v243_v46  ;;  %v231_v60 = vld [vmem:[%s896_s23 + $0x74] sm:$0xf]  ;;  %v245_v62 = vmax.bf16 %v853_v5, %v213_v53  ;;  %v260_v63 = vmax.bf16 %v853_v5, %v228_v54  ;;  %v261_v0 = vmax.bf16 %v853_v5, %v229_v56  ;;  %v216_v9 = vld [vmem:[%s896_s23 + $0x38] sm:$0xf]  ;;  %v217_v10 = vld [vmem:[%s896_s23 + $0x3c] sm:$0xf] }
  0x1a   : > { %v755_v55 = vcombine.low %v258_v47, %v259_v48  ;;  %v246_v1 = vmax.bf16 %v853_v5, %v214_v57  ;;  %v247_v2 = vmax.bf16 %v853_v5, %v215_v58  ;;  %v262_v3 = vmax.bf16 %v853_v5, %v230_v59  ;;  %v232_v12 = vld [vmem:[%s896_s23 + $0x78] sm:$0xf]  ;;  %v233_v13 = vld [vmem:[%s896_s23 + $0x7c] sm:$0xf]  ;;  %v981_v20 = vld [vmem:[%s1127_s2] ss:$0 sm:$0xff] }
  0x1b   : > { %v263_v4 = vmax.bf16 %v853_v5, %v231_v60  ;;  %v748_v6 = vcombine.low %v244_v61, %v245_v62  ;;  %v756_v7 = vcombine.low %v260_v63, %v261_v0  ;;  %v248_v14 = vmax.bf16 %v853_v5, %v216_v9  ;;  %v987_v22 = vld [vmem:[%s1128_s3] ss:$0 sm:$0xff] }
  0x1c   : > { %v749_v8 = vcombine.low %v246_v1, %v247_v2  ;;  %v249_v15 = vmax.bf16 %v853_v5, %v217_v10  ;;  %v264_v16 = vmax.bf16 %v853_v5, %v232_v12  ;;  %v265_v17 = vmax.bf16 %v853_v5, %v233_v13 }
  0x1d   : > { %v757_v11 = vcombine.low %v262_v3, %v263_v4 }
  0x1e   : > { %804 = vmatmul.mubr.msk.bf16.gmra.mrb[4].mxu0 %vm353_vm1, %v746_v49  ;;  %v750_v18 = vcombine.low %v248_v14, %v249_v15  ;;  %v758_v19 = vcombine.low %v264_v16, %v265_v17 }
  0x1f   : > { %820 = vmatmul.mubr.msk.bf16.gmra.mrb[4].mxu1 %vm353_vm1, %v754_v50  ;;  %807 = vmatprep.mubr.msk.bf16.mxu0 %vm353_vm1, %v747_v51 }
  0x20   : > { %823 = vmatprep.mubr.msk.bf16.mxu1 %vm353_vm1, %v755_v55 }
  0x26   : > { %808 = vmatmul.mubr.msk.bf16.gmra.mrb[8].mxu0 %vm353_vm1, %v748_v6 }
  0x27   : > { %824 = vmatmul.mubr.msk.bf16.gmra.mrb[8].mxu1 %vm353_vm1, %v756_v7  ;;  %811 = vmatprep.mubr.msk.bf16.mxu0 %vm353_vm1, %v749_v8 }
  0x28   : > { %827 = vmatprep.mubr.msk.bf16.mxu1 %vm353_vm1, %v757_v11 }
  0x2e   : > { %812 = vmatmul.mubr.msk.bf16.gmra.mrb[12].mxu0 %vm353_vm1, %v750_v18 }
  0x2f   : > { %828 = vmatmul.mubr.msk.bf16.gmra.mrb[12].mxu1 %vm353_vm1, %v758_v19 }
  0xe9   : > { %v801_v21 = vpop.f32.mrb[0].mxu0 }
  0xea   : > { %v576_v5 = vmul.f32 %v801_v21, %v981_v20  ;;  %v817_v23 = vpop.f32.mrb[0].mxu1  ;;  %v440_v24 = vpop.f32.mrb[1].mxu0 }
  0xeb   : > { %v592_v25 = vmul.f32 %v817_v23, %v981_v20  ;;  %v574_v26 = vmul.f32 %v981_v20, %v440_v24  ;;  %v504_v27 = vpop.f32.mrb[1].mxu1  ;;  %v802_v28 = vpop.f32.mrb[2].mxu0 }
  0xec   : > { %v615_v29 = vadd.f32 %v987_v22, %v576_v5  ;;  %v590_v30 = vmul.f32 %v981_v20, %v504_v27  ;;  %v577_v31 = vmul.f32 %v802_v28, %v981_v20  ;;  %v818_v32 = vpop.f32.mrb[2].mxu1  ;;  %v443_v33 = vpop.f32.mrb[3].mxu0 }
  0xed   : > { %v631_v34 = vadd.f32 %v987_v22, %v592_v25  ;;  %v613_v35 = vadd.f32 %v987_v22, %v574_v26  ;;  %v593_v36 = vmul.f32 %v818_v32, %v981_v20  ;;  %v575_v37 = vmul.f32 %v981_v20, %v443_v33  ;;  %v507_v38 = vpop.f32.mrb[3].mxu1 }
  0xee   : > { %648 = vst.msk [vmem:[%s993_s5 + $0x10] sm:$0xff] %vm645_vm2, %v615_v29  ;;  %v629_v39 = vadd.f32 %v987_v22, %v590_v30  ;;  %v616_v40 = vadd.f32 %v987_v22, %v577_v31  ;;  %v591_v41 = vmul.f32 %v981_v20, %v507_v38 }
  0xef   : > { %664 = vst.msk [vmem:[%s993_s5 + $0x90] sm:$0xff] %vm645_vm2, %v631_v34  ;;  %646 = vst.msk [vmem:[%s993_s5] sm:$0xff] %vm645_vm2, %v613_v35  ;;  %v632_v42 = vadd.f32 %v987_v22, %v593_v36  ;;  %v614_v43 = vadd.f32 %v987_v22, %v575_v37 }
  0xf0   : > { %662 = vst.msk [vmem:[%s993_s5 + $0x80] sm:$0xff] %vm645_vm2, %v629_v39  ;;  %649 = vst.msk [vmem:[%s993_s5 + $0x18] sm:$0xff] %vm645_vm2, %v616_v40  ;;  %v630_v44 = vadd.f32 %v987_v22, %v591_v41 }
  0xf1   : > { %665 = vst.msk [vmem:[%s993_s5 + $0x98] sm:$0xff] %vm645_vm2, %v632_v42  ;;  %647 = vst.msk [vmem:[%s993_s5 + $0x8] sm:$0xff] %vm645_vm2, %v614_v43  ;;  %v805_v45 = vpop.f32.mrb[4].mxu0 }
  0xf2   : > { %663 = vst.msk [vmem:[%s993_s5 + $0x88] sm:$0xff] %vm645_vm2, %v630_v44  ;;  %v580_v46 = vmul.f32 %v805_v45, %v981_v20  ;;  %v821_v47 = vpop.f32.mrb[4].mxu1  ;;  %v456_v48 = vpop.f32.mrb[5].mxu0 }
  0xf3   : > { %v596_v49 = vmul.f32 %v821_v47, %v981_v20  ;;  %v578_v50 = vmul.f32 %v981_v20, %v456_v48  ;;  %v520_v51 = vpop.f32.mrb[5].mxu1  ;;  %v806_v52 = vpop.f32.mrb[6].mxu0 }
  0xf4   : > { %v619_v53 = vadd.f32 %v987_v22, %v580_v46  ;;  %v594_v54 = vmul.f32 %v981_v20, %v520_v51  ;;  %v581_v55 = vmul.f32 %v806_v52, %v981_v20  ;;  %v822_v56 = vpop.f32.mrb[6].mxu1  ;;  %v459_v57 = vpop.f32.mrb[7].mxu0 }
  0xf5   : > { %v635_v58 = vadd.f32 %v987_v22, %v596_v49  ;;  %v617_v59 = vadd.f32 %v987_v22, %v578_v50  ;;  %v597_v60 = vmul.f32 %v822_v56, %v981_v20  ;;  %v579_v61 = vmul.f32 %v981_v20, %v459_v57  ;;  %v523_v62 = vpop.f32.mrb[7].mxu1 }
  0xf6   : > { %652 = vst.msk [vmem:[%s993_s5 + $0x30] sm:$0xff] %vm645_vm2, %v619_v53  ;;  %v633_v63 = vadd.f32 %v987_v22, %v594_v54  ;;  %v620_v0 = vadd.f32 %v987_v22, %v581_v55  ;;  %v595_v1 = vmul.f32 %v981_v20, %v523_v62 }
  0xf7   : > { %668 = vst.msk [vmem:[%s993_s5 + $0xb0] sm:$0xff] %vm645_vm2, %v635_v58  ;;  %650 = vst.msk [vmem:[%s993_s5 + $0x20] sm:$0xff] %vm645_vm2, %v617_v59  ;;  %v636_v2 = vadd.f32 %v987_v22, %v597_v60  ;;  %v618_v3 = vadd.f32 %v987_v22, %v579_v61 }
  0xf8   : > { %666 = vst.msk [vmem:[%s993_s5 + $0xa0] sm:$0xff] %vm645_vm2, %v633_v63  ;;  %653 = vst.msk [vmem:[%s993_s5 + $0x38] sm:$0xff] %vm645_vm2, %v620_v0  ;;  %v634_v4 = vadd.f32 %v987_v22, %v595_v1 }
  0xf9   : > { %669 = vst.msk [vmem:[%s993_s5 + $0xb8] sm:$0xff] %vm645_vm2, %v636_v2  ;;  %651 = vst.msk [vmem:[%s993_s5 + $0x28] sm:$0xff] %vm645_vm2, %v618_v3  ;;  %v809_v6 = vpop.f32.mrb[8].mxu0 }
  0xfa   : > { %667 = vst.msk [vmem:[%s993_s5 + $0xa8] sm:$0xff] %vm645_vm2, %v634_v4  ;;  %v584_v7 = vmul.f32 %v809_v6, %v981_v20  ;;  %v825_v8 = vpop.f32.mrb[8].mxu1  ;;  %v472_v9 = vpop.f32.mrb[9].mxu0 }
  0xfb   : > { %v600_v10 = vmul.f32 %v825_v8, %v981_v20  ;;  %v582_v11 = vmul.f32 %v981_v20, %v472_v9  ;;  %v536_v12 = vpop.f32.mrb[9].mxu1  ;;  %v810_v13 = vpop.f32.mrb[10].mxu0 }
  0xfc   : > { %v623_v14 = vadd.f32 %v987_v22, %v584_v7  ;;  %v598_v15 = vmul.f32 %v981_v20, %v536_v12  ;;  %v585_v16 = vmul.f32 %v810_v13, %v981_v20  ;;  %v826_v17 = vpop.f32.mrb[10].mxu1  ;;  %v475_v18 = vpop.f32.mrb[11].mxu0 }
  0xfd   : > { %v639_v19 = vadd.f32 %v987_v22, %v600_v10  ;;  %v621_v21 = vadd.f32 %v987_v22, %v582_v11  ;;  %v601_v5 = vmul.f32 %v826_v17, %v981_v20  ;;  %v583_v23 = vmul.f32 %v981_v20, %v475_v18  ;;  %v539_v24 = vpop.f32.mrb[11].mxu1 }
  0xfe   : > { %656 = vst.msk [vmem:[%s993_s5 + $0x50] sm:$0xff] %vm645_vm2, %v623_v14  ;;  %v637_v25 = vadd.f32 %v987_v22, %v598_v15  ;;  %v624_v26 = vadd.f32 %v987_v22, %v585_v16  ;;  %v599_v27 = vmul.f32 %v981_v20, %v539_v24 }
  0xff   : > { %672 = vst.msk [vmem:[%s993_s5 + $0xd0] sm:$0xff] %vm645_vm2, %v639_v19  ;;  %654 = vst.msk [vmem:[%s993_s5 + $0x40] sm:$0xff] %vm645_vm2, %v621_v21  ;;  %v640_v28 = vadd.f32 %v987_v22, %v601_v5  ;;  %v622_v29 = vadd.f32 %v987_v22, %v583_v23 }
 0x100   : > { %670 = vst.msk [vmem:[%s993_s5 + $0xc0] sm:$0xff] %vm645_vm2, %v637_v25  ;;  %657 = vst.msk [vmem:[%s993_s5 + $0x58] sm:$0xff] %vm645_vm2, %v624_v26  ;;  %v638_v30 = vadd.f32 %v987_v22, %v599_v27 }
 0x101   : > { %673 = vst.msk [vmem:[%s993_s5 + $0xd8] sm:$0xff] %vm645_vm2, %v640_v28  ;;  %655 = vst.msk [vmem:[%s993_s5 + $0x48] sm:$0xff] %vm645_vm2, %v622_v29  ;;  %v813_v31 = vpop.f32.mrb[12].mxu0 }
 0x102   : > { %671 = vst.msk [vmem:[%s993_s5 + $0xc8] sm:$0xff] %vm645_vm2, %v638_v30  ;;  %v588_v32 = vmul.f32 %v813_v31, %v981_v20  ;;  %v829_v33 = vpop.f32.mrb[12].mxu1  ;;  %v488_v34 = vpop.f32.mrb[13].mxu0 }
 0x103   : > { %v604_v35 = vmul.f32 %v829_v33, %v981_v20  ;;  %v586_v36 = vmul.f32 %v981_v20, %v488_v34  ;;  %v552_v37 = vpop.f32.mrb[13].mxu1  ;;  %v814_v38 = vpop.f32.mrb[14].mxu0 }
 0x104   : > { %v627_v39 = vadd.f32 %v987_v22, %v588_v32  ;;  %v602_v40 = vmul.f32 %v981_v20, %v552_v37  ;;  %v589_v41 = vmul.f32 %v814_v38, %v981_v20  ;;  %v830_v42 = vpop.f32.mrb[14].mxu1  ;;  %v491_v43 = vpop.f32.mrb[15].mxu0 }
 0x105   : > { %v643_v44 = vadd.f32 %v987_v22, %v604_v35  ;;  %v625_v45 = vadd.f32 %v987_v22, %v586_v36  ;;  %v605_v46 = vmul.f32 %v830_v42, %v981_v20  ;;  %v587_v47 = vmul.f32 %v981_v20, %v491_v43  ;;  %v555_v48 = vpop.f32.mrb[15].mxu1 }
 0x106   : > { %660 = vst.msk [vmem:[%s993_s5 + $0x70] sm:$0xff] %vm645_vm2, %v627_v39  ;;  %v641_v49 = vadd.f32 %v987_v22, %v602_v40  ;;  %v628_v50 = vadd.f32 %v987_v22, %v589_v41  ;;  %v603_v51 = vmul.f32 %v981_v20, %v555_v48 }
 0x107   : > { %676 = vst.msk [vmem:[%s993_s5 + $0xf0] sm:$0xff] %vm645_vm2, %v643_v44  ;;  %658 = vst.msk [vmem:[%s993_s5 + $0x60] sm:$0xff] %vm645_vm2, %v625_v45  ;;  %v644_v52 = vadd.f32 %v987_v22, %v605_v46  ;;  %v626_v53 = vadd.f32 %v987_v22, %v587_v47 }
 0x108   : > { %674 = vst.msk [vmem:[%s993_s5 + $0xe0] sm:$0xff] %vm645_vm2, %v641_v49  ;;  %661 = vst.msk [vmem:[%s993_s5 + $0x78] sm:$0xff] %vm645_vm2, %v628_v50  ;;  %v642_v54 = vadd.f32 %v987_v22, %v603_v51 }
 0x109   : > { %677 = vst.msk [vmem:[%s993_s5 + $0xf8] sm:$0xff] %vm645_vm2, %v644_v52  ;;  %659 = vst.msk [vmem:[%s993_s5 + $0x68] sm:$0xff] %vm645_vm2, %v626_v53 }
 0x10a   : > { %675 = vst.msk [vmem:[%s993_s5 + $0xe8] sm:$0xff] %vm645_vm2, %v642_v54 }
 0x10b PF: > { %s14_s15 = sadd.s32 1, %s851_s15  }
 0x10c   : > { %p11_p4 = scmp.ge.s32.totalorder %s14_s15, 4  }
 0x10e   :  { %13 = sbr.rel (!%p11_p4) target bundleno = 1 (0x1), region = 66 }

// kernel: forward.21
= control target key start
LH: loop header
LB: loop body
LE: loop exit
PB: predicated region body
PF: predicated region fallthrough
CT: control target
= control target key end

     0   :  { %s1878_s15 = smov 0   ;;  %s2204_s0 = inlined_call_operand.vmem [shape: bf16[576,9], index: 0, kind: input, shape index: {}]   ;;  %s2205_s1 = inlined_call_operand.vmem [shape: bf16[3,9,12], index: 1, kind: input, shape index: {}]   ;;  %s2206_s2 = inlined_call_operand.vmem [shape: f32[1,12], index: 2, kind: input, shape index: {}]   ;;  %s2207_s3 = inlined_call_operand.vmem [shape: f32[1,12], index: 3, kind: input, shape index: {}]   ;;  %s2208_s4 = inlined_call_operand.vmem [shape: f32[512,12], index: 4, kind: output, shape index: {}]  }
   0x1 LB: > { %s1280_s16 = sadd.s32 4294967295, %s1850_s15   ;;  %p1284_p0 = scmp.ge.s32.totalorder %s1850_s15, 1  ;;  %s1850_s15 = sphi %s1878_s15, %s14_s15  }
   0x2   : > { %p163_p1 = scmp.lt.s32.totalorder %s1850_s15, 3 }
   0x4   : > { %p164_p2 = pnand %p1284_p0, %p163_p1 }
   0x5   : > { %vm379_vm0 = vcmask (!%p164_p2), 1040384   ;;  %v1841_v0 = vld [vmem:[%s2205_s1 + $0x8] sm:$0x1f] (!%p164_p2)   ;;  %vm1852_vm1 = vmmov (!%p164_p2), 1   ;;  %s189_s19 = smul.u32 (!%p164_p2), 36, %s1280_s16  ;;  %vm282_vm3 = vcmask (!%p164_p2), 72704  }
   0x6   : > { %167 = sbr.rel (%p164_p2) target bundleno = 332 (0x14c), region = 36  ;;  %vm1889_vm2 = vmpackc.low (!%p164_p2), %vm379_vm0, %vm1852_vm1  ;;  %v1842_v2 = vld [vmem:[%s2205_s1] sm:$0x1f] (!%p164_p2)   ;;  %v1843_v3 = vld [vmem:[%s2205_s1 + $0x10] sm:$0x1f] (!%p164_p2)   ;;  %s1286_s28 = sshll.u32 (!%p164_p2), %s1280_s16, 5 }
   0x7   : > { %1744 = vmatprep.subr.msk.bf16.mxu1 (!%p164_p2), %vm1889_vm2, %v1841_v0  ;;  %p190_p3 = scmp.lt.s32.totalorder (!%p164_p2), %s189_s19, 71  ;;  %1750 = vmatprep.subr.msk.bf16.mxu0 (!%p164_p2), %vm1889_vm2, %v1842_v2  ;;  %p196_p4 = scmp.lt.s32.totalorder (!%p164_p2), %s1286_s28, 63  ;;  %vm1191_vm4 = vcmask (!%p164_p2), 97280  }
   0x8   : > { %1747 = vmatpush3.bf16.msk.msra.mxu1 (!%p164_p2), %vm1889_vm2, %v1841_v0  ;;  %1753 = vmatpush3.bf16.msk.msra.mxu0 (!%p164_p2), %vm1889_vm2, %v1842_v2 }
   0x9   : > { %1760 = vmatprep.subr.msk.bf16.mxu1 (!%p164_p2), %vm1889_vm2, %v1842_v2  ;;  %1756 = vmatprep.subr.msk.bf16.mxu0 (!%p164_p2), %vm1889_vm2, %v1843_v3 }
   0xd   : > { %s2212_s19 = smov (!%p190_p3, %s189_s19), 71  ;;  %s2214_s28 = smov (!%p196_p4, %s1286_s28), 63 }
   0xe   : > { %s1285_s24 = sshll.u32 %s2212_s19, 2  ;;  %s1287_s5 = sshll.u32 %s2214_s28, 3 }
   0xf   : > { %s1916_s27 = scalar_lea.vmem %s2204_s0, %s1285_s24  ;;  %s2067_s10 = scalar_lea.vmem %s2208_s4, %s1287_s5 }
  0x10   : > { %v1467_v4 = vld [vmem:[%s1916_s27 + $0x8] sm:$0xff]   ;;  %v1396_v5 = vld [vmem:[%s1916_s27] sm:$0xff]   ;;  %v1468_v6 = vld [vmem:[%s1916_s27 + $0x10] sm:$0xff]  }
  0x11   : > { %v1401_v7 = vunpack.c.l.bf16 %v1467_v4  ;;  %v1402_v8 = vunpack.c.h.bf16 %v1467_v4  ;;  %v1397_v9 = vunpack.c.l.bf16 %v1396_v5  ;;  %v1398_v10 = vunpack.c.h.bf16 %v1396_v5  ;;  %v1469_v12 = vld [vmem:[%s1916_s27 + $0x18] sm:$0xff]   ;;  %v1470_v15 = vld [vmem:[%s1916_s27 + $0x20] sm:$0xff]   ;;  %v1471_v18 = vld [vmem:[%s1916_s27 + $0x28] sm:$0xff]  }
  0x12   : > { %v1405_v11 = vunpack.c.l.bf16 %v1468_v6  ;;  %v1406_v13 = vunpack.c.h.bf16 %v1468_v6  ;;  %v1409_v14 = vunpack.c.l.bf16 %v1469_v12  ;;  %v1410_v16 = vunpack.c.h.bf16 %v1469_v12  ;;  %v1472_v21 = vld [vmem:[%s1916_s27 + $0x30] sm:$0xff]   ;;  %v1473_v24 = vld [vmem:[%s1916_s27 + $0x38] sm:$0xff]   ;;  %v1474_v27 = vld [vmem:[%s1916_s27 + $0x40] sm:$0xff]  }
  0x13   : > { %1590 = vmatprep.mubr.msk.f32.mxu1 %vm282_vm3, %v1401_v7  ;;  %1642 = vmatprep.mubr.msk.f32.mxu0 %vm282_vm3, %v1397_v9  ;;  %v1413_v17 = vunpack.c.l.bf16 %v1470_v15  ;;  %v1414_v19 = vunpack.c.h.bf16 %v1470_v15  ;;  %v1417_v20 = vunpack.c.l.bf16 %v1471_v18  ;;  %v1418_v22 = vunpack.c.h.bf16 %v1471_v18  ;;  %v1475_v30 = vld [vmem:[%s1916_s27 + $0x48] sm:$0xff]   ;;  %v1476_v33 = vld [vmem:[%s1916_s27 + $0x50] sm:$0xff]   ;;  %v1477_v36 = vld [vmem:[%s1916_s27 + $0x58] sm:$0xff]  }
  0x14   : > { %1591 = vmatmul.mubr.msk.f32.vlgmr.msra.gmra.mrb[0].mxu1 %vm282_vm3, %v1402_v8  ;;  %1643 = vmatmul.mubr.msk.f32.vlgmr.msra.gmra.mrb[0].mxu0 %vm282_vm3, %v1398_v10  ;;  %v1421_v23 = vunpack.c.l.bf16 %v1472_v21  ;;  %v1422_v25 = vunpack.c.h.bf16 %v1472_v21  ;;  %v1425_v26 = vunpack.c.l.bf16 %v1473_v24  ;;  %v1426_v28 = vunpack.c.h.bf16 %v1473_v24  ;;  %v1478_v39 = vld [vmem:[%s1916_s27 + $0x60] sm:$0xff]   ;;  %v1479_v42 = vld [vmem:[%s1916_s27 + $0x68] sm:$0xff]   ;;  %v1480_v45 = vld [vmem:[%s1916_s27 + $0x70] sm:$0xff]  }
  0x15   : > { %1761 = vmatpush3.bf16.msk.msra.mxu1 %vm1889_vm2, %v1842_v2  ;;  %1759 = vmatpush3.bf16.msk.msra.mxu0 %vm1889_vm2, %v1843_v3  ;;  %v1957_v29 = vunpack.c.l.bf16 %v1474_v27  ;;  %v1430_v31 = vunpack.c.h.bf16 %v1474_v27  ;;  %v1433_v32 = vunpack.c.l.bf16 %v1475_v30  ;;  %v1434_v34 = vunpack.c.h.bf16 %v1475_v30  ;;  %v1481_v48 = vld [vmem:[%s1916_s27 + $0x78] sm:$0xff]   ;;  %v1482_v51 = vld [vmem:[%s1916_s27 + $0x80] sm:$0xff]   ;;  %v1483_v55 = vld [vmem:[%s1916_s27 + $0x88] sm:$0xff]  }
  0x16   : > { %1593 = vmatprep.mubr.msk.f32.mxu1 %vm282_vm3, %v1405_v11  ;;  %1645 = vmatprep.mubr.msk.f32.mxu0 %vm282_vm3, %v1401_v7  ;;  %v1437_v35 = vunpack.c.l.bf16 %v1476_v33  ;;  %v1438_v37 = vunpack.c.h.bf16 %v1476_v33  ;;  %v1441_v38 = vunpack.c.l.bf16 %v1477_v36  ;;  %v1442_v40 = vunpack.c.h.bf16 %v1477_v36 }
  0x17   : > { %v1445_v41 = vunpack.c.l.bf16 %v1478_v39  ;;  %v1446_v43 = vunpack.c.h.bf16 %v1478_v39  ;;  %v1449_v44 = vunpack.c.l.bf16 %v1479_v42  ;;  %v1450_v46 = vunpack.c.h.bf16 %v1479_v42 }
  0x18   : > { %1594 = vmatmul.mubr.msk.f32.gmra.mrb[2].mxu1 %vm282_vm3, %v1406_v13  ;;  %1646 = vmatmul.mubr.msk.f32.gmra.mrb[2].mxu0 %vm282_vm3, %v1402_v8  ;;  %v1453_v47 = vunpack.c.l.bf16 %v1480_v45  ;;  %v1454_v49 = vunpack.c.h.bf16 %v1480_v45  ;;  %v1457_v50 = vunpack.c.l.bf16 %v1481_v48  ;;  %v1458_v52 = vunpack.c.h.bf16 %v1481_v48 }
  0x19   : > { %1596 = vmatprep.mubr.msk.f32.mxu1 %vm282_vm3, %v1409_v14  ;;  %1648 = vmatprep.mubr.msk.f32.mxu0 %vm282_vm3, %v1405_v11  ;;  %v1461_v53 = vunpack.c.l.bf16 %v1482_v51  ;;  %v1462_v54 = vunpack.c.h.bf16 %v1482_v51  ;;  %v1465_v56 = vunpack.c.l.bf16 %v1483_v55  ;;  %v1466_v57 = vunpack.c.h.bf16 %v1483_v55 }
  0x1c   : > { %1597 = vmatmul.mubr.msk.f32.gmra.mrb[4].mxu1 %vm282_vm3, %v1410_v16  ;;  %1649 = vmatmul.mubr.msk.f32.gmra.mrb[4].mxu0 %vm282_vm3, %v1406_v13 }
  0x1d   : > { %1599 = vmatprep.mubr.msk.f32.mxu1 %vm282_vm3, %v1413_v17  ;;  %1651 = vmatprep.mubr.msk.f32.mxu0 %vm282_vm3, %v1409_v14 }
  0x20   : > { %1600 = vmatmul.mubr.msk.f32.gmra.mrb[6].mxu1 %vm282_vm3, %v1414_v19  ;;  %1652 = vmatmul.mubr.msk.f32.gmra.mrb[6].mxu0 %vm282_vm3, %v1410_v16 }
  0x21   : > { %1602 = vmatprep.mubr.msk.f32.mxu1 %vm282_vm3, %v1417_v20  ;;  %1654 = vmatprep.mubr.msk.f32.mxu0 %vm282_vm3, %v1413_v17 }
  0x24   : > { %1603 = vmatmul.mubr.msk.f32.gmra.mrb[8].mxu1 %vm282_vm3, %v1418_v22  ;;  %1655 = vmatmul.mubr.msk.f32.gmra.mrb[8].mxu0 %vm282_vm3, %v1414_v19 }
  0x25   : > { %1605 = vmatprep.mubr.msk.f32.mxu1 %vm282_vm3, %v1421_v23  ;;  %1657 = vmatprep.mubr.msk.f32.mxu0 %vm282_vm3, %v1417_v20 }
  0x28   : > { %1606 = vmatmul.mubr.msk.f32.gmra.mrb[10].mxu1 %vm282_vm3, %v1422_v25  ;;  %1658 = vmatmul.mubr.msk.f32.gmra.mrb[10].mxu0 %vm282_vm3, %v1418_v22 }
  0x29   : > { %1608 = vmatprep.mubr.msk.f32.mxu1 %vm282_vm3, %v1425_v26  ;;  %1660 = vmatprep.mubr.msk.f32.mxu0 %vm282_vm3, %v1421_v23 }
  0x2c   : > { %1609 = vmatmul.mubr.msk.f32.gmra.mrb[12].mxu1 %vm282_vm3, %v1426_v28  ;;  %1661 = vmatmul.mubr.msk.f32.gmra.mrb[12].mxu0 %vm282_vm3, %v1422_v25 }
  0x2d   : > { %1611 = vmatprep.mubr.msk.f32.mxu1 %vm282_vm3, %v1957_v29  ;;  %1663 = vmatprep.mubr.msk.f32.mxu0 %vm282_vm3, %v1425_v26 }
  0x30   : > { %1612 = vmatmul.mubr.msk.f32.gmra.mrb[14].mxu1 %vm282_vm3, %v1430_v31  ;;  %1664 = vmatmul.mubr.msk.f32.gmra.mrb[14].mxu0 %vm282_vm3, %v1426_v28 }
  0x31   : > { %1614 = vmatprep.mubr.msk.f32.mxu1 %vm282_vm3, %v1433_v32  ;;  %1694 = vmatprep.mubr.msk.f32.mxu0 %vm282_vm3, %v1405_v11  ;;  %v2056_v11 = vld [vmem:[%s2206_s2] ss:$0 sm:$0xff] }
  0x34   : > { %1615 = vmatmul.mubr.msk.f32.gmra.mrb[16].mxu1 %vm282_vm3, %v1434_v34  ;;  %1695 = vmatmul.mubr.msk.f32.vlgmr.msra.gmra.mrb[0].mxu0 %vm282_vm3, %v1406_v13 }
  0x35   : > { %1617 = vmatprep.mubr.msk.f32.mxu1 %vm282_vm3, %v1437_v35  ;;  %1697 = vmatprep.mubr.msk.f32.mxu0 %vm282_vm3, %v1409_v14  ;;  %v2061_v14 = vld [vmem:[%s2207_s3] ss:$0 sm:$0xff] }
  0x38   : > { %1618 = vmatmul.mubr.msk.f32.gmra.mrb[18].mxu1 %vm282_vm3, %v1438_v37  ;;  %1698 = vmatmul.mubr.msk.f32.gmra.mrb[2].mxu0 %vm282_vm3, %v1410_v16 }
  0x39   : > { %1620 = vmatprep.mubr.msk.f32.mxu1 %vm282_vm3, %v1441_v38  ;;  %1700 = vmatprep.mubr.msk.f32.mxu0 %vm282_vm3, %v1413_v17 }
  0x3c   : > { %1621 = vmatmul.mubr.msk.f32.gmra.mrb[20].mxu1 %vm282_vm3, %v1442_v40  ;;  %1701 = vmatmul.mubr.msk.f32.gmra.mrb[4].mxu0 %vm282_vm3, %v1414_v19 }
  0x3d   : > { %1623 = vmatprep.mubr.msk.f32.mxu1 %vm282_vm3, %v1445_v41  ;;  %1703 = vmatprep.mubr.msk.f32.mxu0 %vm282_vm3, %v1417_v20 }
  0x40   : > { %1624 = vmatmul.mubr.msk.f32.gmra.mrb[22].mxu1 %vm282_vm3, %v1446_v43  ;;  %1704 = vmatmul.mubr.msk.f32.gmra.mrb[6].mxu0 %vm282_vm3, %v1418_v22 }
  0x41   : > { %1626 = vmatprep.mubr.msk.f32.mxu1 %vm282_vm3, %v1449_v44  ;;  %1706 = vmatprep.mubr.msk.f32.mxu0 %vm282_vm3, %v1421_v23 }
  0x44   : > { %1627 = vmatmul.mubr.msk.f32.gmra.mrb[24].mxu1 %vm282_vm3, %v1450_v46  ;;  %1707 = vmatmul.mubr.msk.f32.gmra.mrb[8].mxu0 %vm282_vm3, %v1422_v25 }
  0x45   : > { %1629 = vmatprep.mubr.msk.f32.mxu1 %vm282_vm3, %v1453_v47  ;;  %1709 = vmatprep.mubr.msk.f32.mxu0 %vm282_vm3, %v1425_v26 }
  0x48   : > { %1630 = vmatmul.mubr.msk.f32.gmra.mrb[26].mxu1 %vm282_vm3, %v1454_v49  ;;  %1710 = vmatmul.mubr.msk.f32.gmra.mrb[10].mxu0 %vm282_vm3, %v1426_v28 }
  0x49   : > { %1632 = vmatprep.mubr.msk.f32.mxu1 %vm282_vm3, %v1457_v50  ;;  %1712 = vmatprep.mubr.msk.f32.mxu0 %vm282_vm3, %v1957_v29 }
  0x4c   : > { %1633 = vmatmul.mubr.msk.f32.gmra.mrb[28].mxu1 %vm282_vm3, %v1458_v52  ;;  %1713 = vmatmul.mubr.msk.f32.gmra.mrb[12].mxu0 %vm282_vm3, %v1430_v31 }
  0x4d   : > { %1635 = vmatprep.mubr.msk.f32.mxu1 %vm282_vm3, %v1461_v53  ;;  %1715 = vmatprep.mubr.msk.f32.mxu0 %vm282_vm3, %v1433_v32 }
  0x50   : > { %1636 = vmatmul.mubr.msk.f32.gmra.mrb[30].mxu1 %vm282_vm3, %v1462_v54  ;;  %1716 = vmatmul.mubr.msk.f32.gmra.mrb[14].mxu0 %vm282_vm3, %v1434_v34 }
  0x51   : > { %1666 = vmatprep.mubr.msk.f32.mxu1 %vm282_vm3, %v1957_v29  ;;  %1718 = vmatprep.mubr.msk.f32.mxu0 %vm282_vm3, %v1437_v35 }
  0x54   : > { %1667 = vmatmul.mubr.msk.f32.vlgmr.msra.gmra.mrb[16].mxu1 %vm282_vm3, %v1430_v31  ;;  %1719 = vmatmul.mubr.msk.f32.gmra.mrb[16].mxu0 %vm282_vm3, %v1438_v37 }
  0x55   : > { %1669 = vmatprep.mubr.msk.f32.mxu1 %vm282_vm3, %v1433_v32  ;;  %1721 = vmatprep.mubr.msk.f32.mxu0 %vm282_vm3, %v1441_v38 }
  0x58   : > { %1670 = vmatmul.mubr.msk.f32.gmra.mrb[18].mxu1 %vm282_vm3, %v1434_v34  ;;  %1722 = vmatmul.mubr.msk.f32.gmra.mrb[18].mxu0 %vm282_vm3, %v1442_v40 }
  0x59   : > { %1672 = vmatprep.mubr.msk.f32.mxu1 %vm282_vm3, %v1437_v35  ;;  %1724 = vmatprep.mubr.msk.f32.mxu0 %vm282_vm3, %v1445_v41 }
  0x5c   : > { %1673 = vmatmul.mubr.msk.f32.gmra.mrb[20].mxu1 %vm282_vm3, %v1438_v37  ;;  %1725 = vmatmul.mubr.msk.f32.gmra.mrb[20].mxu0 %vm282_vm3, %v1446_v43 }
  0x5d   : > { %1675 = vmatprep.mubr.msk.f32.mxu1 %vm282_vm3, %v1441_v38  ;;  %1727 = vmatprep.mubr.msk.f32.mxu0 %vm282_vm3, %v1449_v44 }
  0x60   : > { %1676 = vmatmul.mubr.msk.f32.gmra.mrb[22].mxu1 %vm282_vm3, %v1442_v40  ;;  %1728 = vmatmul.mubr.msk.f32.gmra.mrb[22].mxu0 %vm282_vm3, %v1450_v46 }
  0x61   : > { %1678 = vmatprep.mubr.msk.f32.mxu1 %vm282_vm3, %v1445_v41  ;;  %1730 = vmatprep.mubr.msk.f32.mxu0 %vm282_vm3, %v1453_v47 }
  0x64   : > { %1679 = vmatmul.mubr.msk.f32.gmra.mrb[24].mxu1 %vm282_vm3, %v1446_v43  ;;  %1731 = vmatmul.mubr.msk.f32.gmra.mrb[24].mxu0 %vm282_vm3, %v1454_v49 }
  0x65   : > { %1681 = vmatprep.mubr.msk.f32.mxu1 %vm282_vm3, %v1449_v44  ;;  %1733 = vmatprep.mubr.msk.f32.mxu0 %vm282_vm3, %v1457_v50 }
  0x68   : > { %1682 = vmatmul.mubr.msk.f32.gmra.mrb[26].mxu1 %vm282_vm3, %v1450_v46  ;;  %1734 = vmatmul.mubr.msk.f32.gmra.mrb[26].mxu0 %vm282_vm3, %v1458_v52 }
  0x69   : > { %1684 = vmatprep.mubr.msk.f32.mxu1 %vm282_vm3, %v1453_v47  ;;  %1736 = vmatprep.mubr.msk.f32.mxu0 %vm282_vm3, %v1461_v53 }
  0x6c   : > { %1685 = vmatmul.mubr.msk.f32.gmra.mrb[28].mxu1 %vm282_vm3, %v1454_v49  ;;  %1737 = vmatmul.mubr.msk.f32.gmra.mrb[28].mxu0 %vm282_vm3, %v1462_v54 }
  0x6d   : > { %1687 = vmatprep.mubr.msk.f32.mxu1 %vm282_vm3, %v1457_v50  ;;  %1739 = vmatprep.mubr.msk.f32.mxu0 %vm282_vm3, %v1465_v56 }
  0x70   : > { %1688 = vmatmul.mubr.msk.f32.gmra.mrb[30].mxu1 %vm282_vm3, %v1458_v52  ;;  %1740 = vmatmul.mubr.msk.f32.gmra.mrb[30].mxu0 %vm282_vm3, %v1466_v57 }
  0xe7   : > { %v1592_v58 = vpop.f32.mrb[0].mxu1 }
  0xe8   : > { %v449_v59 = vpop.f32.mrb[1].mxu1 }
  0xeb   : > { %v1595_v60 = vpop.f32.mrb[2].mxu1 }
  0xec   : > { %v459_v61 = vpop.f32.mrb[3].mxu1 }
  0xef   : > { %v1598_v62 = vpop.f32.mrb[4].mxu1 }
  0xf0   : > { %v469_v63 = vpop.f32.mrb[5].mxu1 }
  0xf3   : > { %v1601_v0 = vpop.f32.mrb[6].mxu1 }
  0xf4   : > { %v479_v1 = vpop.f32.mrb[7].mxu1 }
  0xf7   : > { %v1604_v2 = vpop.f32.mrb[8].mxu1 }
  0xf8   : > { %v489_v3 = vpop.f32.mrb[9].mxu1 }
  0xfb   : > { %v1607_v4 = vpop.f32.mrb[10].mxu1 }
  0xfc   : > { %v2041_v5 = vpop.f32.mrb[11].mxu1 }
  0xff   : > { %v2045_v6 = vpop.f32.mrb[12].mxu1 }
 0x100   : > { %v2047_v7 = vpop.f32.mrb[13].mxu1 }
 0x103   : > { %v2049_v8 = vpop.f32.mrb[14].mxu1 }
 0x104   : > { %v2051_v9 = vpop.f32.mrb[15].mxu1 }
 0x107   : > { %v1696_v10 = vpop.f32.mrb[0].mxu0 }
 0x108   : > { %v1762_v12 = vadd.f32 %v1696_v10, %v1592_v58  ;;  %v922_v13 = vpop.f32.mrb[1].mxu0 }
 0x109   : > { %v1763_v15 = vadd.f32 %v922_v13, %v449_v59 }
 0x10a   : > { %v1121_v16 = vmul.f32 %v1762_v12, %v2056_v11 }
 0x10b   : > { %v1120_v17 = vmul.f32 %v1763_v15, %v2056_v11  ;;  %v1699_v18 = vpop.f32.mrb[2].mxu0 }
 0x10c   : > { %v1160_v19 = vadd.f32 %v2061_v14, %v1121_v16  ;;  %v1764_v20 = vadd.f32 %v1699_v18, %v1595_v60  ;;  %v932_v21 = vpop.f32.mrb[3].mxu0 }
 0x10d   : > { %v1159_v22 = vadd.f32 %v2061_v14, %v1120_v17  ;;  %v1765_v23 = vadd.f32 %v932_v21, %v459_v61 }
 0x10e   : > { %1193 = vst.msk [vmem:[%s2067_s10 + $0x8] sm:$0xff] %vm1191_vm4, %v1160_v19  ;;  %v1123_v24 = vmul.f32 %v1764_v20, %v2056_v11 }
 0x10f   : > { %1192 = vst.msk [vmem:[%s2067_s10] sm:$0xff] %vm1191_vm4, %v1159_v22  ;;  %v1122_v25 = vmul.f32 %v1765_v23, %v2056_v11  ;;  %v1702_v26 = vpop.f32.mrb[4].mxu0 }
 0x110   : > { %v1162_v27 = vadd.f32 %v2061_v14, %v1123_v24  ;;  %v1766_v28 = vadd.f32 %v1702_v26, %v1598_v62  ;;  %v942_v29 = vpop.f32.mrb[5].mxu0 }
 0x111   : > { %v1161_v30 = vadd.f32 %v2061_v14, %v1122_v25  ;;  %v1767_v31 = vadd.f32 %v942_v29, %v469_v63 }
 0x112   : > { %1195 = vst.msk [vmem:[%s2067_s10 + $0x18] sm:$0xff] %vm1191_vm4, %v1162_v27  ;;  %v1125_v32 = vmul.f32 %v1766_v28, %v2056_v11 }
 0x113   : > { %1194 = vst.msk [vmem:[%s2067_s10 + $0x10] sm:$0xff] %vm1191_vm4, %v1161_v30  ;;  %v1124_v33 = vmul.f32 %v1767_v31, %v2056_v11  ;;  %v1705_v34 = vpop.f32.mrb[6].mxu0 }
 0x114   : > { %v1164_v35 = vadd.f32 %v2061_v14, %v1125_v32  ;;  %v1768_v36 = vadd.f32 %v1705_v34, %v1601_v0  ;;  %v952_v37 = vpop.f32.mrb[7].mxu0 }
 0x115   : > { %v1163_v38 = vadd.f32 %v2061_v14, %v1124_v33  ;;  %v1769_v39 = vadd.f32 %v952_v37, %v479_v1 }
 0x116   : > { %1197 = vst.msk [vmem:[%s2067_s10 + $0x28] sm:$0xff] %vm1191_vm4, %v1164_v35  ;;  %v1127_v40 = vmul.f32 %v1768_v36, %v2056_v11 }
 0x117   : > { %1196 = vst.msk [vmem:[%s2067_s10 + $0x20] sm:$0xff] %vm1191_vm4, %v1163_v38  ;;  %v1126_v41 = vmul.f32 %v1769_v39, %v2056_v11  ;;  %v1708_v42 = vpop.f32.mrb[8].mxu0 }
 0x118   : > { %v1166_v43 = vadd.f32 %v2061_v14, %v1127_v40  ;;  %v1770_v44 = vadd.f32 %v1708_v42, %v1604_v2  ;;  %v962_v45 = vpop.f32.mrb[9].mxu0 }
 0x119   : > { %v1165_v46 = vadd.f32 %v2061_v14, %v1126_v41  ;;  %v1771_v47 = vadd.f32 %v962_v45, %v489_v3 }
 0x11a   : > { %1199 = vst.msk [vmem:[%s2067_s10 + $0x38] sm:$0xff] %vm1191_vm4, %v1166_v43  ;;  %v1129_v48 = vmul.f32 %v1770_v44, %v2056_v11 }
 0x11b   : > { %1198 = vst.msk [vmem:[%s2067_s10 + $0x30] sm:$0xff] %vm1191_vm4, %v1165_v46  ;;  %v1128_v49 = vmul.f32 %v1771_v47, %v2056_v11  ;;  %v1711_v50 = vpop.f32.mrb[10].mxu0 }
 0x11c   : > { %v1168_v51 = vadd.f32 %v2061_v14, %v1129_v48  ;;  %v1772_v52 = vadd.f32 %v1711_v50, %v1607_v4  ;;  %v972_v53 = vpop.f32.mrb[11].mxu0 }
 0x11d   : > { %v1167_v54 = vadd.f32 %v2061_v14, %v1128_v49  ;;  %v1773_v55 = vadd.f32 %v972_v53, %v2041_v5 }
 0x11e   : > { %1201 = vst.msk [vmem:[%s2067_s10 + $0x48] sm:$0xff] %vm1191_vm4, %v1168_v51  ;;  %v1131_v56 = vmul.f32 %v1772_v52, %v2056_v11 }
 0x11f   : > { %1200 = vst.msk [vmem:[%s2067_s10 + $0x40] sm:$0xff] %vm1191_vm4, %v1167_v54  ;;  %v1130_v57 = vmul.f32 %v1773_v55, %v2056_v11  ;;  %v1714_v58 = vpop.f32.mrb[12].mxu0 }
 0x120   : > { %v1170_v59 = vadd.f32 %v2061_v14, %v1131_v56  ;;  %v1774_v60 = vadd.f32 %v1714_v58, %v2045_v6  ;;  %v982_v61 = vpop.f32.mrb[13].mxu0 }
 0x121   : > { %v1169_v62 = vadd.f32 %v2061_v14, %v1130_v57  ;;  %v1775_v63 = vadd.f32 %v982_v61, %v2047_v7 }
 0x122   : > { %1203 = vst.msk [vmem:[%s2067_s10 + $0x58] sm:$0xff] %vm1191_vm4, %v1170_v59  ;;  %v1133_v0 = vmul.f32 %v1774_v60, %v2056_v11 }
 0x123   : > { %1202 = vst.msk [vmem:[%s2067_s10 + $0x50] sm:$0xff] %vm1191_vm4, %v1169_v62  ;;  %v1132_v1 = vmul.f32 %v1775_v63, %v2056_v11  ;;  %v1717_v2 = vpop.f32.mrb[14].mxu0 }
 0x124   : > { %v1172_v3 = vadd.f32 %v2061_v14, %v1133_v0  ;;  %v1776_v4 = vadd.f32 %v1717_v2, %v2049_v8  ;;  %v992_v5 = vpop.f32.mrb[15].mxu0 }
 0x125   : > { %v1171_v6 = vadd.f32 %v2061_v14, %v1132_v1  ;;  %v1777_v7 = vadd.f32 %v992_v5, %v2051_v9 }
 0x126   : > { %1205 = vst.msk [vmem:[%s2067_s10 + $0x68] sm:$0xff] %vm1191_vm4, %v1172_v3  ;;  %v1135_v10 = vmul.f32 %v1776_v4, %v2056_v11 }
 0x127   : > { %1204 = vst.msk [vmem:[%s2067_s10 + $0x60] sm:$0xff] %vm1191_vm4, %v1171_v6  ;;  %v1134_v12 = vmul.f32 %v1777_v7, %v2056_v11  ;;  %v1668_v13 = vpop.f32.mrb[16].mxu1  ;;  %v1720_v15 = vpop.f32.mrb[16].mxu0 }
 0x128   : > { %v1174_v16 = vadd.f32 %v2061_v14, %v1135_v10  ;;  %v1778_v8 = vadd.f32 %v1720_v15, %v1668_v13  ;;  %v763_v17 = vpop.f32.mrb[17].mxu1  ;;  %v1002_v18 = vpop.f32.mrb[17].mxu0 }
 0x129   : > { %v1173_v19 = vadd.f32 %v2061_v14, %v1134_v12  ;;  %v1779_v9 = vadd.f32 %v1002_v18, %v763_v17 }
 0x12a   : > { %1207 = vst.msk [vmem:[%s2067_s10 + $0x78] sm:$0xff] %vm1191_vm4, %v1174_v16  ;;  %v1137_v20 = vmul.f32 %v1778_v8, %v2056_v11 }
 0x12b   : > { %1206 = vst.msk [vmem:[%s2067_s10 + $0x70] sm:$0xff] %vm1191_vm4, %v1173_v19  ;;  %v1136_v21 = vmul.f32 %v1779_v9, %v2056_v11  ;;  %v1671_v22 = vpop.f32.mrb[18].mxu1  ;;  %v1723_v23 = vpop.f32.mrb[18].mxu0 }
 0x12c   : > { %v1176_v24 = vadd.f32 %v2061_v14, %v1137_v20  ;;  %v1780_v25 = vadd.f32 %v1723_v23, %v1671_v22  ;;  %v773_v26 = vpop.f32.mrb[19].mxu1  ;;  %v1012_v27 = vpop.f32.mrb[19].mxu0 }
 0x12d   : > { %v1175_v28 = vadd.f32 %v2061_v14, %v1136_v21  ;;  %v1781_v29 = vadd.f32 %v1012_v27, %v773_v26 }
 0x12e   : > { %1209 = vst.msk [vmem:[%s2067_s10 + $0x88] sm:$0xff] %vm1191_vm4, %v1176_v24  ;;  %v1139_v30 = vmul.f32 %v1780_v25, %v2056_v11 }
 0x12f   : > { %1208 = vst.msk [vmem:[%s2067_s10 + $0x80] sm:$0xff] %vm1191_vm4, %v1175_v28  ;;  %v1138_v31 = vmul.f32 %v1781_v29, %v2056_v11  ;;  %v1674_v32 = vpop.f32.mrb[20].mxu1  ;;  %v1726_v33 = vpop.f32.mrb[20].mxu0 }
 0x130   : > { %v1178_v34 = vadd.f32 %v2061_v14, %v1139_v30  ;;  %v1782_v35 = vadd.f32 %v1726_v33, %v1674_v32  ;;  %v783_v36 = vpop.f32.mrb[21].mxu1  ;;  %v1022_v37 = vpop.f32.mrb[21].mxu0 }
 0x131   : > { %v1177_v38 = vadd.f32 %v2061_v14, %v1138_v31  ;;  %v1783_v39 = vadd.f32 %v1022_v37, %v783_v36 }
 0x132   : > { %1211 = vst.msk [vmem:[%s2067_s10 + $0x98] sm:$0xff] %vm1191_vm4, %v1178_v34  ;;  %v1141_v40 = vmul.f32 %v1782_v35, %v2056_v11 }
 0x133   : > { %1210 = vst.msk [vmem:[%s2067_s10 + $0x90] sm:$0xff] %vm1191_vm4, %v1177_v38  ;;  %v1140_v41 = vmul.f32 %v1783_v39, %v2056_v11  ;;  %v1677_v42 = vpop.f32.mrb[22].mxu1  ;;  %v1729_v43 = vpop.f32.mrb[22].mxu0 }
 0x134   : > { %v1180_v44 = vadd.f32 %v2061_v14, %v1141_v40  ;;  %v1784_v45 = vadd.f32 %v1729_v43, %v1677_v42  ;;  %v793_v46 = vpop.f32.mrb[23].mxu1  ;;  %v1032_v47 = vpop.f32.mrb[23].mxu0 }
 0x135   : > { %v1179_v48 = vadd.f32 %v2061_v14, %v1140_v41  ;;  %v1785_v49 = vadd.f32 %v1032_v47, %v793_v46 }
 0x136   : > { %1213 = vst.msk [vmem:[%s2067_s10 + $0xa8] sm:$0xff] %vm1191_vm4, %v1180_v44  ;;  %v1143_v50 = vmul.f32 %v1784_v45, %v2056_v11 }
 0x137   : > { %1212 = vst.msk [vmem:[%s2067_s10 + $0xa0] sm:$0xff] %vm1191_vm4, %v1179_v48  ;;  %v1142_v51 = vmul.f32 %v1785_v49, %v2056_v11  ;;  %v1680_v52 = vpop.f32.mrb[24].mxu1  ;;  %v1732_v53 = vpop.f32.mrb[24].mxu0 }
 0x138   : > { %v1182_v54 = vadd.f32 %v2061_v14, %v1143_v50  ;;  %v1786_v55 = vadd.f32 %v1732_v53, %v1680_v52  ;;  %v803_v56 = vpop.f32.mrb[25].mxu1  ;;  %v1042_v57 = vpop.f32.mrb[25].mxu0 }
 0x139   : > { %v1181_v58 = vadd.f32 %v2061_v14, %v1142_v51  ;;  %v1787_v59 = vadd.f32 %v1042_v57, %v803_v56 }
 0x13a   : > { %1215 = vst.msk [vmem:[%s2067_s10 + $0xb8] sm:$0xff] %vm1191_vm4, %v1182_v54  ;;  %v1145_v60 = vmul.f32 %v1786_v55, %v2056_v11 }
 0x13b   : > { %1214 = vst.msk [vmem:[%s2067_s10 + $0xb0] sm:$0xff] %vm1191_vm4, %v1181_v58  ;;  %v1144_v61 = vmul.f32 %v1787_v59, %v2056_v11  ;;  %v1683_v62 = vpop.f32.mrb[26].mxu1  ;;  %v1735_v63 = vpop.f32.mrb[26].mxu0 }
 0x13c   : > { %v1184_v0 = vadd.f32 %v2061_v14, %v1145_v60  ;;  %v1788_v1 = vadd.f32 %v1735_v63, %v1683_v62  ;;  %v813_v2 = vpop.f32.mrb[27].mxu1  ;;  %v1052_v3 = vpop.f32.mrb[27].mxu0 }
 0x13d   : > { %v1183_v4 = vadd.f32 %v2061_v14, %v1144_v61  ;;  %v1789_v5 = vadd.f32 %v1052_v3, %v813_v2 }
 0x13e   : > { %1217 = vst.msk [vmem:[%s2067_s10 + $0xc8] sm:$0xff] %vm1191_vm4, %v1184_v0  ;;  %v1147_v6 = vmul.f32 %v1788_v1, %v2056_v11 }
 0x13f   : > { %1216 = vst.msk [vmem:[%s2067_s10 + $0xc0] sm:$0xff] %vm1191_vm4, %v1183_v4  ;;  %v1146_v7 = vmul.f32 %v1789_v5, %v2056_v11  ;;  %v1686_v10 = vpop.f32.mrb[28].mxu1  ;;  %v1738_v12 = vpop.f32.mrb[28].mxu0 }
 0x140   : > { %v1186_v13 = vadd.f32 %v2061_v14, %v1147_v6  ;;  %v1790_v15 = vadd.f32 %v1738_v12, %v1686_v10  ;;  %v823_v16 = vpop.f32.mrb[29].mxu1  ;;  %v1062_v8 = vpop.f32.mrb[29].mxu0 }
 0x141   : > { %v1185_v17 = vadd.f32 %v2061_v14, %v1146_v7  ;;  %v1791_v18 = vadd.f32 %v1062_v8, %v823_v16 }
 0x142   : > { %1219 = vst.msk [vmem:[%s2067_s10 + $0xd8] sm:$0xff] %vm1191_vm4, %v1186_v13  ;;  %v1149_v19 = vmul.f32 %v1790_v15, %v2056_v11 }
 0x143   : > { %1218 = vst.msk [vmem:[%s2067_s10 + $0xd0] sm:$0xff] %vm1191_vm4, %v1185_v17  ;;  %v1148_v9 = vmul.f32 %v1791_v18, %v2056_v11  ;;  %v1689_v20 = vpop.f32.mrb[30].mxu1  ;;  %v1741_v21 = vpop.f32.mrb[30].mxu0 }
 0x144   : > { %v1188_v22 = vadd.f32 %v2061_v14, %v1149_v19  ;;  %v1792_v23 = vadd.f32 %v1741_v21, %v1689_v20  ;;  %v833_v24 = vpop.f32.mrb[31].mxu1  ;;  %v1072_v25 = vpop.f32.mrb[31].mxu0 }
 0x145   : > { %v1187_v26 = vadd.f32 %v2061_v14, %v1148_v9  ;;  %v1793_v27 = vadd.f32 %v1072_v25, %v833_v24 }
 0x146   : > { %1221 = vst.msk [vmem:[%s2067_s10 + $0xe8] sm:$0xff] %vm1191_vm4, %v1188_v22  ;;  %v1151_v28 = vmul.f32 %v1792_v23, %v2056_v11 }
 0x147   : > { %1220 = vst.msk [vmem:[%s2067_s10 + $0xe0] sm:$0xff] %vm1191_vm4, %v1187_v26  ;;  %v1150_v29 = vmul.f32 %v1793_v27, %v2056_v11 }
 0x148   : > { %v1190_v30 = vadd.f32 %v2061_v14, %v1151_v28 }
 0x149   : > { %v1189_v31 = vadd.f32 %v2061_v14, %v1150_v29 }
 0x14a   : > { %1223 = vst.msk [vmem:[%s2067_s10 + $0xf8] sm:$0xff] %vm1191_vm4, %v1190_v30 }
 0x14b   : > { %1222 = vst.msk [vmem:[%s2067_s10 + $0xf0] sm:$0xff] %vm1191_vm4, %v1189_v31 }
 0x14c PF: > { %s14_s15 = sadd.s32 1, %s1850_s15  }
 0x14d   : > { %p11_p5 = scmp.ge.s32.totalorder %s14_s15, 4  }
 0x14f   :  { %13 = sbr.rel (!%p11_p5) target bundleno = 1 (0x1), region = 68 }

// kernel: forward.24
= control target key start
LH: loop header
LB: loop body
LE: loop exit
PB: predicated region body
PF: predicated region fallthrough
CT: control target
= control target key end

     0   :  { %s1914_s15 = smov 0   ;;  %s2330_s0 = inlined_call_operand.vmem [shape: bf16[576,12], index: 0, kind: input, shape index: {}]   ;;  %s2331_s1 = inlined_call_operand.vmem [shape: bf16[3,12,8], index: 1, kind: input, shape index: {}]   ;;  %s2332_s2 = inlined_call_operand.vmem [shape: f32[1,8], index: 2, kind: input, shape index: {}]   ;;  %s2333_s3 = inlined_call_operand.vmem [shape: f32[1,8], index: 3, kind: input, shape index: {}]   ;;  %s2334_s4 = inlined_call_operand.vmem [shape: f32[512,8], index: 4, kind: output, shape index: {}]  }
   0x1 LB: > { %s1316_s16 = sadd.s32 4294967295, %s1886_s15   ;;  %p1320_p0 = scmp.ge.s32.totalorder %s1886_s15, 1  ;;  %s1886_s15 = sphi %s1914_s15, %s14_s15  }
   0x2   : > { %p163_p1 = scmp.lt.s32.totalorder %s1886_s15, 3 }
   0x4   : > { %p164_p2 = pnand %p1320_p0, %p163_p1 }
   0x5   : > { %vm415_vm0 = vcmask (!%p164_p2), 1043456   ;;  %v1877_v0 = vld [vmem:[%s2331_s1 + $0x8] sm:$0x3f] (!%p164_p2)   ;;  %vm1888_vm1 = vmmov (!%p164_p2), 1   ;;  %s189_s19 = smul.u32 (!%p164_p2), 36, %s1316_s16  ;;  %vm318_vm3 = vcmask (!%p164_p2), 97280  }
   0x6   : > { %167 = sbr.rel (%p164_p2) target bundleno = 334 (0x14e), region = 36  ;;  %vm1925_vm2 = vmpackc.low (!%p164_p2), %vm415_vm0, %vm1888_vm1  ;;  %v1878_v2 = vld [vmem:[%s2331_s1] sm:$0x3f] (!%p164_p2)   ;;  %v1879_v3 = vld [vmem:[%s2331_s1 + $0x10] sm:$0x3f] (!%p164_p2)   ;;  %s1322_s28 = sshll.u32 (!%p164_p2), %s1316_s16, 5 }
   0x7   : > { %1780 = vmatprep.subr.msk.bf16.mxu1 (!%p164_p2), %vm1925_vm2, %v1877_v0  ;;  %p190_p3 = scmp.lt.s32.totalorder (!%p164_p2), %s189_s19, 71  ;;  %1786 = vmatprep.subr.msk.bf16.mxu0 (!%p164_p2), %vm1925_vm2, %v1878_v2  ;;  %p196_p4 = scmp.lt.s32.totalorder (!%p164_p2), %s1322_s28, 63  ;;  %vm1227_vm4 = vcmask (!%p164_p2), 64512  }
   0x8   : > { %1783 = vmatpush3.bf16.msk.msra.mxu1 (!%p164_p2), %vm1925_vm2, %v1877_v0  ;;  %1789 = vmatpush3.bf16.msk.msra.mxu0 (!%p164_p2), %vm1925_vm2, %v1878_v2 }
   0x9   : > { %1796 = vmatprep.subr.msk.bf16.mxu1 (!%p164_p2), %vm1925_vm2, %v1878_v2  ;;  %1792 = vmatprep.subr.msk.bf16.mxu0 (!%p164_p2), %vm1925_vm2, %v1879_v3 }
   0xd   : > { %s2338_s19 = smov (!%p190_p3, %s189_s19), 71  ;;  %s2340_s28 = smov (!%p196_p4, %s1322_s28), 63 }
   0xe   : > { %s1321_s24 = sshll.u32 %s2338_s19, 2  ;;  %s1323_s5 = sshll.u32 %s2340_s28, 3 }
   0xf   : > { %s1952_s27 = scalar_lea.vmem %s2330_s0, %s1321_s24  ;;  %s2193_s10 = scalar_lea.vmem %s2334_s4, %s1323_s5 }
  0x10   : > { %v1503_v4 = vld [vmem:[%s1952_s27 + $0x8] sm:$0xff]   ;;  %v1432_v5 = vld [vmem:[%s1952_s27] sm:$0xff]   ;;  %v1504_v6 = vld [vmem:[%s1952_s27 + $0x10] sm:$0xff]  }
  0x11   : > { %v1437_v7 = vunpack.c.l.bf16 %v1503_v4  ;;  %v1438_v8 = vunpack.c.h.bf16 %v1503_v4  ;;  %v1433_v9 = vunpack.c.l.bf16 %v1432_v5  ;;  %v1434_v10 = vunpack.c.h.bf16 %v1432_v5  ;;  %v1505_v11 = vld [vmem:[%s1952_s27 + $0x18] sm:$0xff]   ;;  %v1506_v20 = vld [vmem:[%s1952_s27 + $0x20] sm:$0xff]   ;;  %v1507_v25 = vld [vmem:[%s1952_s27 + $0x28] sm:$0xff]  }
  0x12   : > { %v1441_v12 = vunpack.c.l.bf16 %v1504_v6  ;;  %v1442_v13 = vunpack.c.h.bf16 %v1504_v6  ;;  %v1445_v14 = vunpack.c.l.bf16 %v1505_v11  ;;  %v1446_v22 = vunpack.c.h.bf16 %v1505_v11  ;;  %v1508_v30 = vld [vmem:[%s1952_s27 + $0x30] sm:$0xff]   ;;  %v1509_v35 = vld [vmem:[%s1952_s27 + $0x38] sm:$0xff]   ;;  %v1510_v40 = vld [vmem:[%s1952_s27 + $0x40] sm:$0xff]  }
  0x13   : > { %v275_v15 = vmax.f32 %v1437_v7, 0.0  ;;  %v276_v16 = vmax.f32 %v1438_v8, 0.0  ;;  %v273_v17 = vmax.f32 %v1433_v9, 0.0  ;;  %v274_v18 = vmax.f32 %v1434_v10, 0.0  ;;  %v1511_v45 = vld [vmem:[%s1952_s27 + $0x48] sm:$0xff]   ;;  %v1512_v50 = vld [vmem:[%s1952_s27 + $0x50] sm:$0xff]  }
  0x14   : > { %v1958_v19 = vmax.f32 %v1441_v12, 0.0  ;;  %v1965_v21 = vmax.f32 %v1442_v13, 0.0  ;;  %v1971_v23 = vmax.f32 %v1445_v14, 0.0  ;;  %v1449_v24 = vunpack.c.l.bf16 %v1506_v20  ;;  %v1513_v55 = vld [vmem:[%s1952_s27 + $0x58] sm:$0xff]   ;;  %v1514_v60 = vld [vmem:[%s1952_s27 + $0x60] sm:$0xff]   ;;  %v1515_v1 = vld [vmem:[%s1952_s27 + $0x68] sm:$0xff]  }
  0x15   : > { %1626 = vmatprep.mubr.msk.f32.mxu1 %vm318_vm3, %v275_v15  ;;  %1678 = vmatprep.mubr.msk.f32.mxu0 %vm318_vm3, %v273_v17  ;;  %v1980_v26 = vmax.f32 %v1446_v22, 0.0  ;;  %v1450_v27 = vunpack.c.h.bf16 %v1506_v20  ;;  %v1453_v29 = vunpack.c.l.bf16 %v1507_v25  ;;  %v1454_v32 = vunpack.c.h.bf16 %v1507_v25  ;;  %v1516_v6 = vld [vmem:[%s1952_s27 + $0x70] sm:$0xff]   ;;  %v1517_v11 = vld [vmem:[%s1952_s27 + $0x78] sm:$0xff]   ;;  %v1519_v25 = vld [vmem:[%s1952_s27 + $0x88] sm:$0xff]  }
  0x16   : > { %1627 = vmatmul.mubr.msk.f32.vlgmr.msra.gmra.mrb[0].mxu1 %vm318_vm3, %v276_v16  ;;  %1679 = vmatmul.mubr.msk.f32.vlgmr.msra.gmra.mrb[0].mxu0 %vm318_vm3, %v274_v18  ;;  %v1986_v28 = vmax.f32 %v1449_v24, 0.0  ;;  %v1457_v34 = vunpack.c.l.bf16 %v1508_v30  ;;  %v1458_v37 = vunpack.c.h.bf16 %v1508_v30  ;;  %v1461_v39 = vunpack.c.l.bf16 %v1509_v35 }
  0x17   : > { %1797 = vmatpush3.bf16.msk.msra.mxu1 %vm1925_vm2, %v1878_v2  ;;  %1795 = vmatpush3.bf16.msk.msra.mxu0 %vm1925_vm2, %v1879_v3  ;;  %v1993_v31 = vmax.f32 %v1450_v27, 0.0  ;;  %v1999_v33 = vmax.f32 %v1453_v29, 0.0  ;;  %v2006_v36 = vmax.f32 %v1454_v32, 0.0  ;;  %v1462_v42 = vunpack.c.h.bf16 %v1509_v35 }
  0x18   : > { %1629 = vmatprep.mubr.msk.f32.mxu1 %vm318_vm3, %v1958_v19  ;;  %1681 = vmatprep.mubr.msk.f32.mxu0 %vm318_vm3, %v275_v15  ;;  %v2012_v38 = vmax.f32 %v1457_v34, 0.0  ;;  %v2019_v41 = vmax.f32 %v1458_v37, 0.0  ;;  %v2025_v43 = vmax.f32 %v1461_v39, 0.0  ;;  %v1465_v44 = vunpack.c.l.bf16 %v1510_v40 }
  0x19   : > { %v2032_v46 = vmax.f32 %v1462_v42, 0.0  ;;  %v1466_v47 = vunpack.c.h.bf16 %v1510_v40  ;;  %v1469_v49 = vunpack.c.l.bf16 %v1511_v45  ;;  %v1470_v52 = vunpack.c.h.bf16 %v1511_v45 }
  0x1a   : > { %1630 = vmatmul.mubr.msk.f32.gmra.mrb[2].mxu1 %vm318_vm3, %v1965_v21  ;;  %1682 = vmatmul.mubr.msk.f32.gmra.mrb[2].mxu0 %vm318_vm3, %v276_v16  ;;  %v2038_v48 = vmax.f32 %v1465_v44, 0.0  ;;  %v1473_v54 = vunpack.c.l.bf16 %v1512_v50  ;;  %v1474_v57 = vunpack.c.h.bf16 %v1512_v50  ;;  %v1477_v59 = vunpack.c.l.bf16 %v1513_v55  ;;  %v1518_v16 = vld [vmem:[%s1952_s27 + $0x80] sm:$0xff]  }
  0x1b   : > { %1632 = vmatprep.mubr.msk.f32.mxu1 %vm318_vm3, %v1971_v23  ;;  %1684 = vmatprep.mubr.msk.f32.mxu0 %vm318_vm3, %v1958_v19  ;;  %v2045_v51 = vmax.f32 %v1466_v47, 0.0  ;;  %v2051_v53 = vmax.f32 %v1469_v49, 0.0  ;;  %v2058_v56 = vmax.f32 %v1470_v52, 0.0  ;;  %v1478_v62 = vunpack.c.h.bf16 %v1513_v55  ;;  %v2182_v47 = vld [vmem:[%s2332_s2] ss:$0 sm:$0xff] }
  0x1c   : > { %v2064_v58 = vmax.f32 %v1473_v54, 0.0  ;;  %v2071_v61 = vmax.f32 %v1474_v57, 0.0  ;;  %v2077_v63 = vmax.f32 %v1477_v59, 0.0  ;;  %v1481_v0 = vunpack.c.l.bf16 %v1514_v60  ;;  %v2187_v50 = vld [vmem:[%s2333_s3] ss:$0 sm:$0xff] }
  0x1d   : > { %v296_v2 = vmax.f32 %v1478_v62, 0.0  ;;  %v1482_v3 = vunpack.c.h.bf16 %v1514_v60  ;;  %v1485_v5 = vunpack.c.l.bf16 %v1515_v1  ;;  %v1486_v8 = vunpack.c.h.bf16 %v1515_v1 }
  0x1e   : > { %1633 = vmatmul.mubr.msk.f32.gmra.mrb[4].mxu1 %vm318_vm3, %v1980_v26  ;;  %1685 = vmatmul.mubr.msk.f32.gmra.mrb[4].mxu0 %vm318_vm3, %v1965_v21  ;;  %v297_v4 = vmax.f32 %v1481_v0, 0.0  ;;  %v1489_v10 = vunpack.c.l.bf16 %v1516_v6  ;;  %v1490_v13 = vunpack.c.h.bf16 %v1516_v6  ;;  %v1493_v15 = vunpack.c.l.bf16 %v1517_v11 }
  0x1f   : > { %1635 = vmatprep.mubr.msk.f32.mxu1 %vm318_vm3, %v1986_v28  ;;  %1687 = vmatprep.mubr.msk.f32.mxu0 %vm318_vm3, %v1971_v23  ;;  %v298_v7 = vmax.f32 %v1482_v3, 0.0  ;;  %v299_v9 = vmax.f32 %v1485_v5, 0.0  ;;  %v300_v12 = vmax.f32 %v1486_v8, 0.0  ;;  %v1494_v18 = vunpack.c.h.bf16 %v1517_v11 }
  0x20   : > { %v301_v14 = vmax.f32 %v1489_v10, 0.0  ;;  %v302_v17 = vmax.f32 %v1490_v13, 0.0  ;;  %v1497_v20 = vunpack.c.l.bf16 %v1518_v16  ;;  %v1498_v22 = vunpack.c.h.bf16 %v1518_v16 }
  0x21   : > { %v1502_v27 = vunpack.c.h.bf16 %v1519_v25 }
  0x22   : > { %1636 = vmatmul.mubr.msk.f32.gmra.mrb[6].mxu1 %vm318_vm3, %v1993_v31  ;;  %1688 = vmatmul.mubr.msk.f32.gmra.mrb[6].mxu0 %vm318_vm3, %v1980_v26  ;;  %v306_v24 = vmax.f32 %v1498_v22, 0.0 }
  0x23   : > { %1638 = vmatprep.mubr.msk.f32.mxu1 %vm318_vm3, %v1999_v33  ;;  %1690 = vmatprep.mubr.msk.f32.mxu0 %vm318_vm3, %v1986_v28  ;;  %v308_v29 = vmax.f32 %v1502_v27, 0.0 }
  0x26   : > { %1639 = vmatmul.mubr.msk.f32.gmra.mrb[8].mxu1 %vm318_vm3, %v2006_v36  ;;  %1691 = vmatmul.mubr.msk.f32.gmra.mrb[8].mxu0 %vm318_vm3, %v1993_v31 }
  0x27   : > { %1641 = vmatprep.mubr.msk.f32.mxu1 %vm318_vm3, %v2012_v38  ;;  %1693 = vmatprep.mubr.msk.f32.mxu0 %vm318_vm3, %v1999_v33 }
  0x2a   : > { %1642 = vmatmul.mubr.msk.f32.gmra.mrb[10].mxu1 %vm318_vm3, %v2019_v41  ;;  %1694 = vmatmul.mubr.msk.f32.gmra.mrb[10].mxu0 %vm318_vm3, %v2006_v36 }
  0x2b   : > { %1644 = vmatprep.mubr.msk.f32.mxu1 %vm318_vm3, %v2025_v43  ;;  %1696 = vmatprep.mubr.msk.f32.mxu0 %vm318_vm3, %v2012_v38 }
  0x2e   : > { %1645 = vmatmul.mubr.msk.f32.gmra.mrb[12].mxu1 %vm318_vm3, %v2032_v46  ;;  %1697 = vmatmul.mubr.msk.f32.gmra.mrb[12].mxu0 %vm318_vm3, %v2019_v41 }
  0x2f   : > { %1647 = vmatprep.mubr.msk.f32.mxu1 %vm318_vm3, %v2038_v48  ;;  %1699 = vmatprep.mubr.msk.f32.mxu0 %vm318_vm3, %v2025_v43 }
  0x32   : > { %1648 = vmatmul.mubr.msk.f32.gmra.mrb[14].mxu1 %vm318_vm3, %v2045_v51  ;;  %1700 = vmatmul.mubr.msk.f32.gmra.mrb[14].mxu0 %vm318_vm3, %v2032_v46 }
  0x33   : > { %1650 = vmatprep.mubr.msk.f32.mxu1 %vm318_vm3, %v2051_v53  ;;  %1730 = vmatprep.mubr.msk.f32.mxu0 %vm318_vm3, %v1958_v19  ;;  %v303_v19 = vmax.f32 %v1493_v15, 0.0 }
  0x36   : > { %1651 = vmatmul.mubr.msk.f32.gmra.mrb[16].mxu1 %vm318_vm3, %v2058_v56  ;;  %1731 = vmatmul.mubr.msk.f32.vlgmr.msra.gmra.mrb[0].mxu0 %vm318_vm3, %v1965_v21  ;;  %v304_v21 = vmax.f32 %v1494_v18, 0.0 }
  0x37   : > { %1653 = vmatprep.mubr.msk.f32.mxu1 %vm318_vm3, %v2064_v58  ;;  %1733 = vmatprep.mubr.msk.f32.mxu0 %vm318_vm3, %v1971_v23  ;;  %v305_v23 = vmax.f32 %v1497_v20, 0.0 }
  0x3a   : > { %1654 = vmatmul.mubr.msk.f32.gmra.mrb[18].mxu1 %vm318_vm3, %v2071_v61  ;;  %1734 = vmatmul.mubr.msk.f32.gmra.mrb[2].mxu0 %vm318_vm3, %v1980_v26  ;;  %v1501_v26 = vunpack.c.l.bf16 %v1519_v25 }
  0x3b   : > { %1656 = vmatprep.mubr.msk.f32.mxu1 %vm318_vm3, %v2077_v63  ;;  %1736 = vmatprep.mubr.msk.f32.mxu0 %vm318_vm3, %v1986_v28 }
  0x3c   : > { %v307_v28 = vmax.f32 %v1501_v26, 0.0 }
  0x3e   : > { %1657 = vmatmul.mubr.msk.f32.gmra.mrb[20].mxu1 %vm318_vm3, %v296_v2  ;;  %1737 = vmatmul.mubr.msk.f32.gmra.mrb[4].mxu0 %vm318_vm3, %v1993_v31 }
  0x3f   : > { %1659 = vmatprep.mubr.msk.f32.mxu1 %vm318_vm3, %v297_v4  ;;  %1739 = vmatprep.mubr.msk.f32.mxu0 %vm318_vm3, %v1999_v33 }
  0x42   : > { %1660 = vmatmul.mubr.msk.f32.gmra.mrb[22].mxu1 %vm318_vm3, %v298_v7  ;;  %1740 = vmatmul.mubr.msk.f32.gmra.mrb[6].mxu0 %vm318_vm3, %v2006_v36 }
  0x43   : > { %1662 = vmatprep.mubr.msk.f32.mxu1 %vm318_vm3, %v299_v9  ;;  %1742 = vmatprep.mubr.msk.f32.mxu0 %vm318_vm3, %v2012_v38 }
  0x46   : > { %1663 = vmatmul.mubr.msk.f32.gmra.mrb[24].mxu1 %vm318_vm3, %v300_v12  ;;  %1743 = vmatmul.mubr.msk.f32.gmra.mrb[8].mxu0 %vm318_vm3, %v2019_v41 }
  0x47   : > { %1665 = vmatprep.mubr.msk.f32.mxu1 %vm318_vm3, %v301_v14  ;;  %1745 = vmatprep.mubr.msk.f32.mxu0 %vm318_vm3, %v2025_v43 }
  0x4a   : > { %1666 = vmatmul.mubr.msk.f32.gmra.mrb[26].mxu1 %vm318_vm3, %v302_v17  ;;  %1746 = vmatmul.mubr.msk.f32.gmra.mrb[10].mxu0 %vm318_vm3, %v2032_v46 }
  0x4b   : > { %1668 = vmatprep.mubr.msk.f32.mxu1 %vm318_vm3, %v303_v19  ;;  %1748 = vmatprep.mubr.msk.f32.mxu0 %vm318_vm3, %v2038_v48 }
  0x4e   : > { %1669 = vmatmul.mubr.msk.f32.gmra.mrb[28].mxu1 %vm318_vm3, %v304_v21  ;;  %1749 = vmatmul.mubr.msk.f32.gmra.mrb[12].mxu0 %vm318_vm3, %v2045_v51 }
  0x4f   : > { %1671 = vmatprep.mubr.msk.f32.mxu1 %vm318_vm3, %v305_v23  ;;  %1751 = vmatprep.mubr.msk.f32.mxu0 %vm318_vm3, %v2051_v53 }
  0x52   : > { %1672 = vmatmul.mubr.msk.f32.gmra.mrb[30].mxu1 %vm318_vm3, %v306_v24  ;;  %1752 = vmatmul.mubr.msk.f32.gmra.mrb[14].mxu0 %vm318_vm3, %v2058_v56 }
  0x53   : > { %1702 = vmatprep.mubr.msk.f32.mxu1 %vm318_vm3, %v2038_v48  ;;  %1754 = vmatprep.mubr.msk.f32.mxu0 %vm318_vm3, %v2064_v58 }
  0x56   : > { %1703 = vmatmul.mubr.msk.f32.vlgmr.msra.gmra.mrb[16].mxu1 %vm318_vm3, %v2045_v51  ;;  %1755 = vmatmul.mubr.msk.f32.gmra.mrb[16].mxu0 %vm318_vm3, %v2071_v61 }
  0x57   : > { %1705 = vmatprep.mubr.msk.f32.mxu1 %vm318_vm3, %v2051_v53  ;;  %1757 = vmatprep.mubr.msk.f32.mxu0 %vm318_vm3, %v2077_v63 }
  0x5a   : > { %1706 = vmatmul.mubr.msk.f32.gmra.mrb[18].mxu1 %vm318_vm3, %v2058_v56  ;;  %1758 = vmatmul.mubr.msk.f32.gmra.mrb[18].mxu0 %vm318_vm3, %v296_v2 }
  0x5b   : > { %1708 = vmatprep.mubr.msk.f32.mxu1 %vm318_vm3, %v2064_v58  ;;  %1760 = vmatprep.mubr.msk.f32.mxu0 %vm318_vm3, %v297_v4 }
  0x5e   : > { %1709 = vmatmul.mubr.msk.f32.gmra.mrb[20].mxu1 %vm318_vm3, %v2071_v61  ;;  %1761 = vmatmul.mubr.msk.f32.gmra.mrb[20].mxu0 %vm318_vm3, %v298_v7 }
  0x5f   : > { %1711 = vmatprep.mubr.msk.f32.mxu1 %vm318_vm3, %v2077_v63  ;;  %1763 = vmatprep.mubr.msk.f32.mxu0 %vm318_vm3, %v299_v9 }
  0x62   : > { %1712 = vmatmul.mubr.msk.f32.gmra.mrb[22].mxu1 %vm318_vm3, %v296_v2  ;;  %1764 = vmatmul.mubr.msk.f32.gmra.mrb[22].mxu0 %vm318_vm3, %v300_v12 }
  0x63   : > { %1714 = vmatprep.mubr.msk.f32.mxu1 %vm318_vm3, %v297_v4  ;;  %1766 = vmatprep.mubr.msk.f32.mxu0 %vm318_vm3, %v301_v14 }
  0x66   : > { %1715 = vmatmul.mubr.msk.f32.gmra.mrb[24].mxu1 %vm318_vm3, %v298_v7  ;;  %1767 = vmatmul.mubr.msk.f32.gmra.mrb[24].mxu0 %vm318_vm3, %v302_v17 }
  0x67   : > { %1717 = vmatprep.mubr.msk.f32.mxu1 %vm318_vm3, %v299_v9  ;;  %1769 = vmatprep.mubr.msk.f32.mxu0 %vm318_vm3, %v303_v19 }
  0x6a   : > { %1718 = vmatmul.mubr.msk.f32.gmra.mrb[26].mxu1 %vm318_vm3, %v300_v12  ;;  %1770 = vmatmul.mubr.msk.f32.gmra.mrb[26].mxu0 %vm318_vm3, %v304_v21 }
  0x6b   : > { %1720 = vmatprep.mubr.msk.f32.mxu1 %vm318_vm3, %v301_v14  ;;  %1772 = vmatprep.mubr.msk.f32.mxu0 %vm318_vm3, %v305_v23 }
  0x6e   : > { %1721 = vmatmul.mubr.msk.f32.gmra.mrb[28].mxu1 %vm318_vm3, %v302_v17  ;;  %1773 = vmatmul.mubr.msk.f32.gmra.mrb[28].mxu0 %vm318_vm3, %v306_v24 }
  0x6f   : > { %1723 = vmatprep.mubr.msk.f32.mxu1 %vm318_vm3, %v303_v19  ;;  %1775 = vmatprep.mubr.msk.f32.mxu0 %vm318_vm3, %v307_v28 }
  0x72   : > { %1724 = vmatmul.mubr.msk.f32.gmra.mrb[30].mxu1 %vm318_vm3, %v304_v21  ;;  %1776 = vmatmul.mubr.msk.f32.gmra.mrb[30].mxu0 %vm318_vm3, %v308_v29 }
  0xe9   : > { %v1628_v30 = vpop.f32.mrb[0].mxu1 }
  0xea   : > { %v485_v31 = vpop.f32.mrb[1].mxu1 }
  0xed   : > { %v1631_v32 = vpop.f32.mrb[2].mxu1 }
  0xee   : > { %v495_v33 = vpop.f32.mrb[3].mxu1 }
  0xf1   : > { %v1634_v34 = vpop.f32.mrb[4].mxu1 }
  0xf2   : > { %v505_v35 = vpop.f32.mrb[5].mxu1 }
  0xf5   : > { %v1637_v36 = vpop.f32.mrb[6].mxu1 }
  0xf6   : > { %v515_v37 = vpop.f32.mrb[7].mxu1 }
  0xf9   : > { %v1640_v38 = vpop.f32.mrb[8].mxu1 }
  0xfa   : > { %v525_v39 = vpop.f32.mrb[9].mxu1 }
  0xfd   : > { %v1643_v40 = vpop.f32.mrb[10].mxu1 }
  0xfe   : > { %v2167_v41 = vpop.f32.mrb[11].mxu1 }
 0x101   : > { %v2171_v42 = vpop.f32.mrb[12].mxu1 }
 0x102   : > { %v2173_v43 = vpop.f32.mrb[13].mxu1 }
 0x105   : > { %v2175_v44 = vpop.f32.mrb[14].mxu1 }
 0x106   : > { %v2177_v45 = vpop.f32.mrb[15].mxu1 }
 0x109   : > { %v1732_v46 = vpop.f32.mrb[0].mxu0 }
 0x10a   : > { %v1798_v48 = vadd.f32 %v1732_v46, %v1628_v30  ;;  %v958_v49 = vpop.f32.mrb[1].mxu0 }
 0x10b   : > { %v1799_v51 = vadd.f32 %v958_v49, %v485_v31 }
 0x10c   : > { %v1157_v52 = vmul.f32 %v1798_v48, %v2182_v47 }
 0x10d   : > { %v1156_v53 = vmul.f32 %v1799_v51, %v2182_v47  ;;  %v1735_v54 = vpop.f32.mrb[2].mxu0 }
 0x10e   : > { %v1196_v55 = vadd.f32 %v2187_v50, %v1157_v52  ;;  %v1800_v56 = vadd.f32 %v1735_v54, %v1631_v32  ;;  %v968_v57 = vpop.f32.mrb[3].mxu0 }
 0x10f   : > { %v1195_v58 = vadd.f32 %v2187_v50, %v1156_v53  ;;  %v1801_v59 = vadd.f32 %v968_v57, %v495_v33 }
 0x110   : > { %1229 = vst.msk [vmem:[%s2193_s10 + $0x8] sm:$0xff] %vm1227_vm4, %v1196_v55  ;;  %v1159_v60 = vmul.f32 %v1800_v56, %v2182_v47 }
 0x111   : > { %1228 = vst.msk [vmem:[%s2193_s10] sm:$0xff] %vm1227_vm4, %v1195_v58  ;;  %v1158_v61 = vmul.f32 %v1801_v59, %v2182_v47  ;;  %v1738_v62 = vpop.f32.mrb[4].mxu0 }
 0x112   : > { %v1198_v63 = vadd.f32 %v2187_v50, %v1159_v60  ;;  %v1802_v0 = vadd.f32 %v1738_v62, %v1634_v34  ;;  %v978_v1 = vpop.f32.mrb[5].mxu0 }
 0x113   : > { %v1197_v2 = vadd.f32 %v2187_v50, %v1158_v61  ;;  %v1803_v3 = vadd.f32 %v978_v1, %v505_v35 }
 0x114   : > { %1231 = vst.msk [vmem:[%s2193_s10 + $0x18] sm:$0xff] %vm1227_vm4, %v1198_v63  ;;  %v1161_v4 = vmul.f32 %v1802_v0, %v2182_v47 }
 0x115   : > { %1230 = vst.msk [vmem:[%s2193_s10 + $0x10] sm:$0xff] %vm1227_vm4, %v1197_v2  ;;  %v1160_v5 = vmul.f32 %v1803_v3, %v2182_v47  ;;  %v1741_v6 = vpop.f32.mrb[6].mxu0 }
 0x116   : > { %v1200_v7 = vadd.f32 %v2187_v50, %v1161_v4  ;;  %v1804_v8 = vadd.f32 %v1741_v6, %v1637_v36  ;;  %v988_v9 = vpop.f32.mrb[7].mxu0 }
 0x117   : > { %v1199_v10 = vadd.f32 %v2187_v50, %v1160_v5  ;;  %v1805_v11 = vadd.f32 %v988_v9, %v515_v37 }
 0x118   : > { %1233 = vst.msk [vmem:[%s2193_s10 + $0x28] sm:$0xff] %vm1227_vm4, %v1200_v7  ;;  %v1163_v12 = vmul.f32 %v1804_v8, %v2182_v47 }
 0x119   : > { %1232 = vst.msk [vmem:[%s2193_s10 + $0x20] sm:$0xff] %vm1227_vm4, %v1199_v10  ;;  %v1162_v13 = vmul.f32 %v1805_v11, %v2182_v47  ;;  %v1744_v14 = vpop.f32.mrb[8].mxu0 }
 0x11a   : > { %v1202_v15 = vadd.f32 %v2187_v50, %v1163_v12  ;;  %v1806_v16 = vadd.f32 %v1744_v14, %v1640_v38  ;;  %v998_v17 = vpop.f32.mrb[9].mxu0 }
 0x11b   : > { %v1201_v18 = vadd.f32 %v2187_v50, %v1162_v13  ;;  %v1807_v19 = vadd.f32 %v998_v17, %v525_v39 }
 0x11c   : > { %1235 = vst.msk [vmem:[%s2193_s10 + $0x38] sm:$0xff] %vm1227_vm4, %v1202_v15  ;;  %v1165_v20 = vmul.f32 %v1806_v16, %v2182_v47 }
 0x11d   : > { %1234 = vst.msk [vmem:[%s2193_s10 + $0x30] sm:$0xff] %vm1227_vm4, %v1201_v18  ;;  %v1164_v21 = vmul.f32 %v1807_v19, %v2182_v47  ;;  %v1747_v22 = vpop.f32.mrb[10].mxu0 }
 0x11e   : > { %v1204_v23 = vadd.f32 %v2187_v50, %v1165_v20  ;;  %v1808_v24 = vadd.f32 %v1747_v22, %v1643_v40  ;;  %v1008_v25 = vpop.f32.mrb[11].mxu0 }
 0x11f   : > { %v1203_v26 = vadd.f32 %v2187_v50, %v1164_v21  ;;  %v1809_v27 = vadd.f32 %v1008_v25, %v2167_v41 }
 0x120   : > { %1237 = vst.msk [vmem:[%s2193_s10 + $0x48] sm:$0xff] %vm1227_vm4, %v1204_v23  ;;  %v1167_v28 = vmul.f32 %v1808_v24, %v2182_v47 }
 0x121   : > { %1236 = vst.msk [vmem:[%s2193_s10 + $0x40] sm:$0xff] %vm1227_vm4, %v1203_v26  ;;  %v1166_v29 = vmul.f32 %v1809_v27, %v2182_v47  ;;  %v1750_v30 = vpop.f32.mrb[12].mxu0 }
 0x122   : > { %v1206_v31 = vadd.f32 %v2187_v50, %v1167_v28  ;;  %v1810_v32 = vadd.f32 %v1750_v30, %v2171_v42  ;;  %v1018_v33 = vpop.f32.mrb[13].mxu0 }
 0x123   : > { %v1205_v34 = vadd.f32 %v2187_v50, %v1166_v29  ;;  %v1811_v35 = vadd.f32 %v1018_v33, %v2173_v43 }
 0x124   : > { %1239 = vst.msk [vmem:[%s2193_s10 + $0x58] sm:$0xff] %vm1227_vm4, %v1206_v31  ;;  %v1169_v36 = vmul.f32 %v1810_v32, %v2182_v47 }
 0x125   : > { %1238 = vst.msk [vmem:[%s2193_s10 + $0x50] sm:$0xff] %vm1227_vm4, %v1205_v34  ;;  %v1168_v37 = vmul.f32 %v1811_v35, %v2182_v47  ;;  %v1753_v38 = vpop.f32.mrb[14].mxu0 }
 0x126   : > { %v1208_v39 = vadd.f32 %v2187_v50, %v1169_v36  ;;  %v1812_v40 = vadd.f32 %v1753_v38, %v2175_v44  ;;  %v1028_v41 = vpop.f32.mrb[15].mxu0 }
 0x127   : > { %v1207_v42 = vadd.f32 %v2187_v50, %v1168_v37  ;;  %v1813_v43 = vadd.f32 %v1028_v41, %v2177_v45 }
 0x128   : > { %1241 = vst.msk [vmem:[%s2193_s10 + $0x68] sm:$0xff] %vm1227_vm4, %v1208_v39  ;;  %v1171_v46 = vmul.f32 %v1812_v40, %v2182_v47 }
 0x129   : > { %1240 = vst.msk [vmem:[%s2193_s10 + $0x60] sm:$0xff] %vm1227_vm4, %v1207_v42  ;;  %v1170_v48 = vmul.f32 %v1813_v43, %v2182_v47  ;;  %v1704_v49 = vpop.f32.mrb[16].mxu1  ;;  %v1756_v51 = vpop.f32.mrb[16].mxu0 }
 0x12a   : > { %v1210_v52 = vadd.f32 %v2187_v50, %v1171_v46  ;;  %v1814_v44 = vadd.f32 %v1756_v51, %v1704_v49  ;;  %v799_v53 = vpop.f32.mrb[17].mxu1  ;;  %v1038_v54 = vpop.f32.mrb[17].mxu0 }
 0x12b   : > { %v1209_v55 = vadd.f32 %v2187_v50, %v1170_v48  ;;  %v1815_v45 = vadd.f32 %v1038_v54, %v799_v53 }
 0x12c   : > { %1243 = vst.msk [vmem:[%s2193_s10 + $0x78] sm:$0xff] %vm1227_vm4, %v1210_v52  ;;  %v1173_v56 = vmul.f32 %v1814_v44, %v2182_v47 }
 0x12d   : > { %1242 = vst.msk [vmem:[%s2193_s10 + $0x70] sm:$0xff] %vm1227_vm4, %v1209_v55  ;;  %v1172_v57 = vmul.f32 %v1815_v45, %v2182_v47  ;;  %v1707_v58 = vpop.f32.mrb[18].mxu1  ;;  %v1759_v59 = vpop.f32.mrb[18].mxu0 }
 0x12e   : > { %v1212_v60 = vadd.f32 %v2187_v50, %v1173_v56  ;;  %v1816_v61 = vadd.f32 %v1759_v59, %v1707_v58  ;;  %v809_v62 = vpop.f32.mrb[19].mxu1  ;;  %v1048_v63 = vpop.f32.mrb[19].mxu0 }
 0x12f   : > { %v1211_v0 = vadd.f32 %v2187_v50, %v1172_v57  ;;  %v1817_v1 = vadd.f32 %v1048_v63, %v809_v62 }
 0x130   : > { %1245 = vst.msk [vmem:[%s2193_s10 + $0x88] sm:$0xff] %vm1227_vm4, %v1212_v60  ;;  %v1175_v2 = vmul.f32 %v1816_v61, %v2182_v47 }
 0x131   : > { %1244 = vst.msk [vmem:[%s2193_s10 + $0x80] sm:$0xff] %vm1227_vm4, %v1211_v0  ;;  %v1174_v3 = vmul.f32 %v1817_v1, %v2182_v47  ;;  %v1710_v4 = vpop.f32.mrb[20].mxu1  ;;  %v1762_v5 = vpop.f32.mrb[20].mxu0 }
 0x132   : > { %v1214_v6 = vadd.f32 %v2187_v50, %v1175_v2  ;;  %v1818_v7 = vadd.f32 %v1762_v5, %v1710_v4  ;;  %v819_v8 = vpop.f32.mrb[21].mxu1  ;;  %v1058_v9 = vpop.f32.mrb[21].mxu0 }
 0x133   : > { %v1213_v10 = vadd.f32 %v2187_v50, %v1174_v3  ;;  %v1819_v11 = vadd.f32 %v1058_v9, %v819_v8 }
 0x134   : > { %1247 = vst.msk [vmem:[%s2193_s10 + $0x98] sm:$0xff] %vm1227_vm4, %v1214_v6  ;;  %v1177_v12 = vmul.f32 %v1818_v7, %v2182_v47 }
 0x135   : > { %1246 = vst.msk [vmem:[%s2193_s10 + $0x90] sm:$0xff] %vm1227_vm4, %v1213_v10  ;;  %v1176_v13 = vmul.f32 %v1819_v11, %v2182_v47  ;;  %v1713_v14 = vpop.f32.mrb[22].mxu1  ;;  %v1765_v15 = vpop.f32.mrb[22].mxu0 }
 0x136   : > { %v1216_v16 = vadd.f32 %v2187_v50, %v1177_v12  ;;  %v1820_v17 = vadd.f32 %v1765_v15, %v1713_v14  ;;  %v829_v18 = vpop.f32.mrb[23].mxu1  ;;  %v1068_v19 = vpop.f32.mrb[23].mxu0 }
 0x137   : > { %v1215_v20 = vadd.f32 %v2187_v50, %v1176_v13  ;;  %v1821_v21 = vadd.f32 %v1068_v19, %v829_v18 }
 0x138   : > { %1249 = vst.msk [vmem:[%s2193_s10 + $0xa8] sm:$0xff] %vm1227_vm4, %v1216_v16  ;;  %v1179_v22 = vmul.f32 %v1820_v17, %v2182_v47 }
 0x139   : > { %1248 = vst.msk [vmem:[%s2193_s10 + $0xa0] sm:$0xff] %vm1227_vm4, %v1215_v20  ;;  %v1178_v23 = vmul.f32 %v1821_v21, %v2182_v47  ;;  %v1716_v24 = vpop.f32.mrb[24].mxu1  ;;  %v1768_v25 = vpop.f32.mrb[24].mxu0 }
 0x13a   : > { %v1218_v26 = vadd.f32 %v2187_v50, %v1179_v22  ;;  %v1822_v27 = vadd.f32 %v1768_v25, %v1716_v24  ;;  %v839_v28 = vpop.f32.mrb[25].mxu1  ;;  %v1078_v29 = vpop.f32.mrb[25].mxu0 }
 0x13b   : > { %v1217_v30 = vadd.f32 %v2187_v50, %v1178_v23  ;;  %v1823_v31 = vadd.f32 %v1078_v29, %v839_v28 }
 0x13c   : > { %1251 = vst.msk [vmem:[%s2193_s10 + $0xb8] sm:$0xff] %vm1227_vm4, %v1218_v26  ;;  %v1181_v32 = vmul.f32 %v1822_v27, %v2182_v47 }
 0x13d   : > { %1250 = vst.msk [vmem:[%s2193_s10 + $0xb0] sm:$0xff] %vm1227_vm4, %v1217_v30  ;;  %v1180_v33 = vmul.f32 %v1823_v31, %v2182_v47  ;;  %v1719_v34 = vpop.f32.mrb[26].mxu1  ;;  %v1771_v35 = vpop.f32.mrb[26].mxu0 }
 0x13e   : > { %v1220_v36 = vadd.f32 %v2187_v50, %v1181_v32  ;;  %v1824_v37 = vadd.f32 %v1771_v35, %v1719_v34  ;;  %v849_v38 = vpop.f32.mrb[27].mxu1  ;;  %v1088_v39 = vpop.f32.mrb[27].mxu0 }
 0x13f   : > { %v1219_v40 = vadd.f32 %v2187_v50, %v1180_v33  ;;  %v1825_v41 = vadd.f32 %v1088_v39, %v849_v38 }
 0x140   : > { %1253 = vst.msk [vmem:[%s2193_s10 + $0xc8] sm:$0xff] %vm1227_vm4, %v1220_v36  ;;  %v1183_v42 = vmul.f32 %v1824_v37, %v2182_v47 }
 0x141   : > { %1252 = vst.msk [vmem:[%s2193_s10 + $0xc0] sm:$0xff] %vm1227_vm4, %v1219_v40  ;;  %v1182_v43 = vmul.f32 %v1825_v41, %v2182_v47  ;;  %v1722_v46 = vpop.f32.mrb[28].mxu1  ;;  %v1774_v48 = vpop.f32.mrb[28].mxu0 }
 0x142   : > { %v1222_v49 = vadd.f32 %v2187_v50, %v1183_v42  ;;  %v1826_v51 = vadd.f32 %v1774_v48, %v1722_v46  ;;  %v859_v52 = vpop.f32.mrb[29].mxu1  ;;  %v1098_v44 = vpop.f32.mrb[29].mxu0 }
 0x143   : > { %v1221_v53 = vadd.f32 %v2187_v50, %v1182_v43  ;;  %v1827_v54 = vadd.f32 %v1098_v44, %v859_v52 }
 0x144   : > { %1255 = vst.msk [vmem:[%s2193_s10 + $0xd8] sm:$0xff] %vm1227_vm4, %v1222_v49  ;;  %v1185_v55 = vmul.f32 %v1826_v51, %v2182_v47 }
 0x145   : > { %1254 = vst.msk [vmem:[%s2193_s10 + $0xd0] sm:$0xff] %vm1227_vm4, %v1221_v53  ;;  %v1184_v45 = vmul.f32 %v1827_v54, %v2182_v47  ;;  %v1725_v56 = vpop.f32.mrb[30].mxu1  ;;  %v1777_v57 = vpop.f32.mrb[30].mxu0 }
 0x146   : > { %v1224_v58 = vadd.f32 %v2187_v50, %v1185_v55  ;;  %v1828_v59 = vadd.f32 %v1777_v57, %v1725_v56  ;;  %v869_v60 = vpop.f32.mrb[31].mxu1  ;;  %v1108_v61 = vpop.f32.mrb[31].mxu0 }
 0x147   : > { %v1223_v62 = vadd.f32 %v2187_v50, %v1184_v45  ;;  %v1829_v63 = vadd.f32 %v1108_v61, %v869_v60 }
 0x148   : > { %1257 = vst.msk [vmem:[%s2193_s10 + $0xe8] sm:$0xff] %vm1227_vm4, %v1224_v58  ;;  %v1187_v0 = vmul.f32 %v1828_v59, %v2182_v47 }
 0x149   : > { %1256 = vst.msk [vmem:[%s2193_s10 + $0xe0] sm:$0xff] %vm1227_vm4, %v1223_v62  ;;  %v1186_v1 = vmul.f32 %v1829_v63, %v2182_v47 }
 0x14a   : > { %v1226_v2 = vadd.f32 %v2187_v50, %v1187_v0 }
 0x14b   : > { %v1225_v3 = vadd.f32 %v2187_v50, %v1186_v1 }
 0x14c   : > { %1259 = vst.msk [vmem:[%s2193_s10 + $0xf8] sm:$0xff] %vm1227_vm4, %v1226_v2 }
 0x14d   : > { %1258 = vst.msk [vmem:[%s2193_s10 + $0xf0] sm:$0xff] %vm1227_vm4, %v1225_v3 }
 0x14e PF: > { %s14_s15 = sadd.s32 1, %s1886_s15  }
 0x14f   : > { %p11_p5 = scmp.ge.s32.totalorder %s14_s15, 4  }
 0x151   :  { %13 = sbr.rel (!%p11_p5) target bundleno = 1 (0x1), region = 68 }

// kernel: forward.26
= control target key start
LH: loop header
LB: loop body
LE: loop exit
PB: predicated region body
PF: predicated region fallthrough
CT: control target
= control target key end

     0   :  { %s1914_s15 = smov 0   ;;  %s2330_s0 = inlined_call_operand.vmem [shape: bf16[576,12], index: 0, kind: input, shape index: {}]   ;;  %s2331_s1 = inlined_call_operand.vmem [shape: bf16[3,12,4], index: 1, kind: input, shape index: {}]   ;;  %s2332_s2 = inlined_call_operand.vmem [shape: f32[1,4], index: 2, kind: input, shape index: {}]   ;;  %s2333_s3 = inlined_call_operand.vmem [shape: f32[1,4], index: 3, kind: input, shape index: {}]   ;;  %s2334_s4 = inlined_call_operand.vmem [shape: f32[512,4], index: 4, kind: output, shape index: {}]  }
   0x1 LB: > { %s1316_s16 = sadd.s32 4294967295, %s1886_s15   ;;  %p1320_p0 = scmp.ge.s32.totalorder %s1886_s15, 1  ;;  %s1886_s15 = sphi %s1914_s15, %s14_s15  }
   0x2   : > { %p163_p1 = scmp.lt.s32.totalorder %s1886_s15, 3 }
   0x4   : > { %p164_p2 = pnand %p1320_p0, %p163_p1 }
   0x5   : > { %vm415_vm0 = vcmask (!%p164_p2), 1043456   ;;  %v1877_v0 = vld [vmem:[%s2331_s1 + $0x8] sm:$0x3f] (!%p164_p2)   ;;  %vm1888_vm1 = vmmov (!%p164_p2), 1   ;;  %s189_s19 = smul.u32 (!%p164_p2), 36, %s1316_s16  ;;  %vm318_vm3 = vcmask (!%p164_p2), 97280  }
   0x6   : > { %167 = sbr.rel (%p164_p2) target bundleno = 334 (0x14e), region = 36  ;;  %vm1925_vm2 = vmpackc.low (!%p164_p2), %vm415_vm0, %vm1888_vm1  ;;  %v1878_v2 = vld [vmem:[%s2331_s1] sm:$0x3f] (!%p164_p2)   ;;  %v1879_v3 = vld [vmem:[%s2331_s1 + $0x10] sm:$0x3f] (!%p164_p2)   ;;  %s1322_s28 = sshll.u32 (!%p164_p2), %s1316_s16, 5 }
   0x7   : > { %1780 = vmatprep.subr.msk.bf16.mxu1 (!%p164_p2), %vm1925_vm2, %v1877_v0  ;;  %p190_p3 = scmp.lt.s32.totalorder (!%p164_p2), %s189_s19, 71  ;;  %1786 = vmatprep.subr.msk.bf16.mxu0 (!%p164_p2), %vm1925_vm2, %v1878_v2  ;;  %p196_p4 = scmp.lt.s32.totalorder (!%p164_p2), %s1322_s28, 63  ;;  %vm1227_vm4 = vcmask (!%p164_p2), 31744  }
   0x8   : > { %1783 = vmatpush3.bf16.msk.msra.mxu1 (!%p164_p2), %vm1925_vm2, %v1877_v0  ;;  %1789 = vmatpush3.bf16.msk.msra.mxu0 (!%p164_p2), %vm1925_vm2, %v1878_v2 }
   0x9   : > { %1796 = vmatprep.subr.msk.bf16.mxu1 (!%p164_p2), %vm1925_vm2, %v1878_v2  ;;  %1792 = vmatprep.subr.msk.bf16.mxu0 (!%p164_p2), %vm1925_vm2, %v1879_v3 }
   0xd   : > { %s2338_s19 = smov (!%p190_p3, %s189_s19), 71  ;;  %s2340_s28 = smov (!%p196_p4, %s1322_s28), 63 }
   0xe   : > { %s1321_s24 = sshll.u32 %s2338_s19, 2  ;;  %s1323_s5 = sshll.u32 %s2340_s28, 3 }
   0xf   : > { %s1952_s27 = scalar_lea.vmem %s2330_s0, %s1321_s24  ;;  %s2193_s10 = scalar_lea.vmem %s2334_s4, %s1323_s5 }
  0x10   : > { %v1503_v4 = vld [vmem:[%s1952_s27 + $0x8] sm:$0xff]   ;;  %v1432_v5 = vld [vmem:[%s1952_s27] sm:$0xff]   ;;  %v1504_v6 = vld [vmem:[%s1952_s27 + $0x10] sm:$0xff]  }
  0x11   : > { %v1437_v7 = vunpack.c.l.bf16 %v1503_v4  ;;  %v1438_v8 = vunpack.c.h.bf16 %v1503_v4  ;;  %v1433_v9 = vunpack.c.l.bf16 %v1432_v5  ;;  %v1434_v10 = vunpack.c.h.bf16 %v1432_v5  ;;  %v1505_v11 = vld [vmem:[%s1952_s27 + $0x18] sm:$0xff]   ;;  %v1506_v20 = vld [vmem:[%s1952_s27 + $0x20] sm:$0xff]   ;;  %v1507_v25 = vld [vmem:[%s1952_s27 + $0x28] sm:$0xff]  }
  0x12   : > { %v1441_v12 = vunpack.c.l.bf16 %v1504_v6  ;;  %v1442_v13 = vunpack.c.h.bf16 %v1504_v6  ;;  %v1445_v14 = vunpack.c.l.bf16 %v1505_v11  ;;  %v1446_v22 = vunpack.c.h.bf16 %v1505_v11  ;;  %v1508_v30 = vld [vmem:[%s1952_s27 + $0x30] sm:$0xff]   ;;  %v1509_v35 = vld [vmem:[%s1952_s27 + $0x38] sm:$0xff]   ;;  %v1510_v40 = vld [vmem:[%s1952_s27 + $0x40] sm:$0xff]  }
  0x13   : > { %v275_v15 = vmax.f32 %v1437_v7, 0.0  ;;  %v276_v16 = vmax.f32 %v1438_v8, 0.0  ;;  %v273_v17 = vmax.f32 %v1433_v9, 0.0  ;;  %v274_v18 = vmax.f32 %v1434_v10, 0.0  ;;  %v1511_v45 = vld [vmem:[%s1952_s27 + $0x48] sm:$0xff]   ;;  %v1512_v50 = vld [vmem:[%s1952_s27 + $0x50] sm:$0xff]  }
  0x14   : > { %v1958_v19 = vmax.f32 %v1441_v12, 0.0  ;;  %v1965_v21 = vmax.f32 %v1442_v13, 0.0  ;;  %v1971_v23 = vmax.f32 %v1445_v14, 0.0  ;;  %v1449_v24 = vunpack.c.l.bf16 %v1506_v20  ;;  %v1513_v55 = vld [vmem:[%s1952_s27 + $0x58] sm:$0xff]   ;;  %v1514_v60 = vld [vmem:[%s1952_s27 + $0x60] sm:$0xff]   ;;  %v1515_v1 = vld [vmem:[%s1952_s27 + $0x68] sm:$0xff]  }
  0x15   : > { %1626 = vmatprep.mubr.msk.f32.mxu1 %vm318_vm3, %v275_v15  ;;  %1678 = vmatprep.mubr.msk.f32.mxu0 %vm318_vm3, %v273_v17  ;;  %v1980_v26 = vmax.f32 %v1446_v22, 0.0  ;;  %v1450_v27 = vunpack.c.h.bf16 %v1506_v20  ;;  %v1453_v29 = vunpack.c.l.bf16 %v1507_v25  ;;  %v1454_v32 = vunpack.c.h.bf16 %v1507_v25  ;;  %v1516_v6 = vld [vmem:[%s1952_s27 + $0x70] sm:$0xff]   ;;  %v1517_v11 = vld [vmem:[%s1952_s27 + $0x78] sm:$0xff]   ;;  %v1519_v25 = vld [vmem:[%s1952_s27 + $0x88] sm:$0xff]  }
  0x16   : > { %1627 = vmatmul.mubr.msk.f32.vlgmr.msra.gmra.mrb[0].mxu1 %vm318_vm3, %v276_v16  ;;  %1679 = vmatmul.mubr.msk.f32.vlgmr.msra.gmra.mrb[0].mxu0 %vm318_vm3, %v274_v18  ;;  %v1986_v28 = vmax.f32 %v1449_v24, 0.0  ;;  %v1457_v34 = vunpack.c.l.bf16 %v1508_v30  ;;  %v1458_v37 = vunpack.c.h.bf16 %v1508_v30  ;;  %v1461_v39 = vunpack.c.l.bf16 %v1509_v35 }
  0x17   : > { %1797 = vmatpush3.bf16.msk.msra.mxu1 %vm1925_vm2, %v1878_v2  ;;  %1795 = vmatpush3.bf16.msk.msra.mxu0 %vm1925_vm2, %v1879_v3  ;;  %v1993_v31 = vmax.f32 %v1450_v27, 0.0  ;;  %v1999_v33 = vmax.f32 %v1453_v29, 0.0  ;;  %v2006_v36 = vmax.f32 %v1454_v32, 0.0  ;;  %v1462_v42 = vunpack.c.h.bf16 %v1509_v35 }
  0x18   : > { %1629 = vmatprep.mubr.msk.f32.mxu1 %vm318_vm3, %v1958_v19  ;;  %1681 = vmatprep.mubr.msk.f32.mxu0 %vm318_vm3, %v275_v15  ;;  %v2012_v38 = vmax.f32 %v1457_v34, 0.0  ;;  %v2019_v41 = vmax.f32 %v1458_v37, 0.0  ;;  %v2025_v43 = vmax.f32 %v1461_v39, 0.0  ;;  %v1465_v44 = vunpack.c.l.bf16 %v1510_v40 }
  0x19   : > { %v2032_v46 = vmax.f32 %v1462_v42, 0.0  ;;  %v1466_v47 = vunpack.c.h.bf16 %v1510_v40  ;;  %v1469_v49 = vunpack.c.l.bf16 %v1511_v45  ;;  %v1470_v52 = vunpack.c.h.bf16 %v1511_v45 }
  0x1a   : > { %1630 = vmatmul.mubr.msk.f32.gmra.mrb[2].mxu1 %vm318_vm3, %v1965_v21  ;;  %1682 = vmatmul.mubr.msk.f32.gmra.mrb[2].mxu0 %vm318_vm3, %v276_v16  ;;  %v2038_v48 = vmax.f32 %v1465_v44, 0.0  ;;  %v1473_v54 = vunpack.c.l.bf16 %v1512_v50  ;;  %v1474_v57 = vunpack.c.h.bf16 %v1512_v50  ;;  %v1477_v59 = vunpack.c.l.bf16 %v1513_v55  ;;  %v1518_v16 = vld [vmem:[%s1952_s27 + $0x80] sm:$0xff]  }
  0x1b   : > { %1632 = vmatprep.mubr.msk.f32.mxu1 %vm318_vm3, %v1971_v23  ;;  %1684 = vmatprep.mubr.msk.f32.mxu0 %vm318_vm3, %v1958_v19  ;;  %v2045_v51 = vmax.f32 %v1466_v47, 0.0  ;;  %v2051_v53 = vmax.f32 %v1469_v49, 0.0  ;;  %v2058_v56 = vmax.f32 %v1470_v52, 0.0  ;;  %v1478_v62 = vunpack.c.h.bf16 %v1513_v55  ;;  %v2182_v47 = vld [vmem:[%s2332_s2] ss:$0 sm:$0xff] }
  0x1c   : > { %v2064_v58 = vmax.f32 %v1473_v54, 0.0  ;;  %v2071_v61 = vmax.f32 %v1474_v57, 0.0  ;;  %v2077_v63 = vmax.f32 %v1477_v59, 0.0  ;;  %v1481_v0 = vunpack.c.l.bf16 %v1514_v60  ;;  %v2187_v50 = vld [vmem:[%s2333_s3] ss:$0 sm:$0xff] }
  0x1d   : > { %v296_v2 = vmax.f32 %v1478_v62, 0.0  ;;  %v1482_v3 = vunpack.c.h.bf16 %v1514_v60  ;;  %v1485_v5 = vunpack.c.l.bf16 %v1515_v1  ;;  %v1486_v8 = vunpack.c.h.bf16 %v1515_v1 }
  0x1e   : > { %1633 = vmatmul.mubr.msk.f32.gmra.mrb[4].mxu1 %vm318_vm3, %v1980_v26  ;;  %1685 = vmatmul.mubr.msk.f32.gmra.mrb[4].mxu0 %vm318_vm3, %v1965_v21  ;;  %v297_v4 = vmax.f32 %v1481_v0, 0.0  ;;  %v1489_v10 = vunpack.c.l.bf16 %v1516_v6  ;;  %v1490_v13 = vunpack.c.h.bf16 %v1516_v6  ;;  %v1493_v15 = vunpack.c.l.bf16 %v1517_v11 }
  0x1f   : > { %1635 = vmatprep.mubr.msk.f32.mxu1 %vm318_vm3, %v1986_v28  ;;  %1687 = vmatprep.mubr.msk.f32.mxu0 %vm318_vm3, %v1971_v23  ;;  %v298_v7 = vmax.f32 %v1482_v3, 0.0  ;;  %v299_v9 = vmax.f32 %v1485_v5, 0.0  ;;  %v300_v12 = vmax.f32 %v1486_v8, 0.0  ;;  %v1494_v18 = vunpack.c.h.bf16 %v1517_v11 }
  0x20   : > { %v301_v14 = vmax.f32 %v1489_v10, 0.0  ;;  %v302_v17 = vmax.f32 %v1490_v13, 0.0  ;;  %v1497_v20 = vunpack.c.l.bf16 %v1518_v16  ;;  %v1498_v22 = vunpack.c.h.bf16 %v1518_v16 }
  0x21   : > { %v1502_v27 = vunpack.c.h.bf16 %v1519_v25 }
  0x22   : > { %1636 = vmatmul.mubr.msk.f32.gmra.mrb[6].mxu1 %vm318_vm3, %v1993_v31  ;;  %1688 = vmatmul.mubr.msk.f32.gmra.mrb[6].mxu0 %vm318_vm3, %v1980_v26  ;;  %v306_v24 = vmax.f32 %v1498_v22, 0.0 }
  0x23   : > { %1638 = vmatprep.mubr.msk.f32.mxu1 %vm318_vm3, %v1999_v33  ;;  %1690 = vmatprep.mubr.msk.f32.mxu0 %vm318_vm3, %v1986_v28  ;;  %v308_v29 = vmax.f32 %v1502_v27, 0.0 }
  0x26   : > { %1639 = vmatmul.mubr.msk.f32.gmra.mrb[8].mxu1 %vm318_vm3, %v2006_v36  ;;  %1691 = vmatmul.mubr.msk.f32.gmra.mrb[8].mxu0 %vm318_vm3, %v1993_v31 }
  0x27   : > { %1641 = vmatprep.mubr.msk.f32.mxu1 %vm318_vm3, %v2012_v38  ;;  %1693 = vmatprep.mubr.msk.f32.mxu0 %vm318_vm3, %v1999_v33 }
  0x2a   : > { %1642 = vmatmul.mubr.msk.f32.gmra.mrb[10].mxu1 %vm318_vm3, %v2019_v41  ;;  %1694 = vmatmul.mubr.msk.f32.gmra.mrb[10].mxu0 %vm318_vm3, %v2006_v36 }
  0x2b   : > { %1644 = vmatprep.mubr.msk.f32.mxu1 %vm318_vm3, %v2025_v43  ;;  %1696 = vmatprep.mubr.msk.f32.mxu0 %vm318_vm3, %v2012_v38 }
  0x2e   : > { %1645 = vmatmul.mubr.msk.f32.gmra.mrb[12].mxu1 %vm318_vm3, %v2032_v46  ;;  %1697 = vmatmul.mubr.msk.f32.gmra.mrb[12].mxu0 %vm318_vm3, %v2019_v41 }
  0x2f   : > { %1647 = vmatprep.mubr.msk.f32.mxu1 %vm318_vm3, %v2038_v48  ;;  %1699 = vmatprep.mubr.msk.f32.mxu0 %vm318_vm3, %v2025_v43 }
  0x32   : > { %1648 = vmatmul.mubr.msk.f32.gmra.mrb[14].mxu1 %vm318_vm3, %v2045_v51  ;;  %1700 = vmatmul.mubr.msk.f32.gmra.mrb[14].mxu0 %vm318_vm3, %v2032_v46 }
  0x33   : > { %1650 = vmatprep.mubr.msk.f32.mxu1 %vm318_vm3, %v2051_v53  ;;  %1730 = vmatprep.mubr.msk.f32.mxu0 %vm318_vm3, %v1958_v19  ;;  %v303_v19 = vmax.f32 %v1493_v15, 0.0 }
  0x36   : > { %1651 = vmatmul.mubr.msk.f32.gmra.mrb[16].mxu1 %vm318_vm3, %v2058_v56  ;;  %1731 = vmatmul.mubr.msk.f32.vlgmr.msra.gmra.mrb[0].mxu0 %vm318_vm3, %v1965_v21  ;;  %v304_v21 = vmax.f32 %v1494_v18, 0.0 }
  0x37   : > { %1653 = vmatprep.mubr.msk.f32.mxu1 %vm318_vm3, %v2064_v58  ;;  %1733 = vmatprep.mubr.msk.f32.mxu0 %vm318_vm3, %v1971_v23  ;;  %v305_v23 = vmax.f32 %v1497_v20, 0.0 }
  0x3a   : > { %1654 = vmatmul.mubr.msk.f32.gmra.mrb[18].mxu1 %vm318_vm3, %v2071_v61  ;;  %1734 = vmatmul.mubr.msk.f32.gmra.mrb[2].mxu0 %vm318_vm3, %v1980_v26  ;;  %v1501_v26 = vunpack.c.l.bf16 %v1519_v25 }
  0x3b   : > { %1656 = vmatprep.mubr.msk.f32.mxu1 %vm318_vm3, %v2077_v63  ;;  %1736 = vmatprep.mubr.msk.f32.mxu0 %vm318_vm3, %v1986_v28 }
  0x3c   : > { %v307_v28 = vmax.f32 %v1501_v26, 0.0 }
  0x3e   : > { %1657 = vmatmul.mubr.msk.f32.gmra.mrb[20].mxu1 %vm318_vm3, %v296_v2  ;;  %1737 = vmatmul.mubr.msk.f32.gmra.mrb[4].mxu0 %vm318_vm3, %v1993_v31 }
  0x3f   : > { %1659 = vmatprep.mubr.msk.f32.mxu1 %vm318_vm3, %v297_v4  ;;  %1739 = vmatprep.mubr.msk.f32.mxu0 %vm318_vm3, %v1999_v33 }
  0x42   : > { %1660 = vmatmul.mubr.msk.f32.gmra.mrb[22].mxu1 %vm318_vm3, %v298_v7  ;;  %1740 = vmatmul.mubr.msk.f32.gmra.mrb[6].mxu0 %vm318_vm3, %v2006_v36 }
  0x43   : > { %1662 = vmatprep.mubr.msk.f32.mxu1 %vm318_vm3, %v299_v9  ;;  %1742 = vmatprep.mubr.msk.f32.mxu0 %vm318_vm3, %v2012_v38 }
  0x46   : > { %1663 = vmatmul.mubr.msk.f32.gmra.mrb[24].mxu1 %vm318_vm3, %v300_v12  ;;  %1743 = vmatmul.mubr.msk.f32.gmra.mrb[8].mxu0 %vm318_vm3, %v2019_v41 }
  0x47   : > { %1665 = vmatprep.mubr.msk.f32.mxu1 %vm318_vm3, %v301_v14  ;;  %1745 = vmatprep.mubr.msk.f32.mxu0 %vm318_vm3, %v2025_v43 }
  0x4a   : > { %1666 = vmatmul.mubr.msk.f32.gmra.mrb[26].mxu1 %vm318_vm3, %v302_v17  ;;  %1746 = vmatmul.mubr.msk.f32.gmra.mrb[10].mxu0 %vm318_vm3, %v2032_v46 }
  0x4b   : > { %1668 = vmatprep.mubr.msk.f32.mxu1 %vm318_vm3, %v303_v19  ;;  %1748 = vmatprep.mubr.msk.f32.mxu0 %vm318_vm3, %v2038_v48 }
  0x4e   : > { %1669 = vmatmul.mubr.msk.f32.gmra.mrb[28].mxu1 %vm318_vm3, %v304_v21  ;;  %1749 = vmatmul.mubr.msk.f32.gmra.mrb[12].mxu0 %vm318_vm3, %v2045_v51 }
  0x4f   : > { %1671 = vmatprep.mubr.msk.f32.mxu1 %vm318_vm3, %v305_v23  ;;  %1751 = vmatprep.mubr.msk.f32.mxu0 %vm318_vm3, %v2051_v53 }
  0x52   : > { %1672 = vmatmul.mubr.msk.f32.gmra.mrb[30].mxu1 %vm318_vm3, %v306_v24  ;;  %1752 = vmatmul.mubr.msk.f32.gmra.mrb[14].mxu0 %vm318_vm3, %v2058_v56 }
  0x53   : > { %1702 = vmatprep.mubr.msk.f32.mxu1 %vm318_vm3, %v2038_v48  ;;  %1754 = vmatprep.mubr.msk.f32.mxu0 %vm318_vm3, %v2064_v58 }
  0x56   : > { %1703 = vmatmul.mubr.msk.f32.vlgmr.msra.gmra.mrb[16].mxu1 %vm318_vm3, %v2045_v51  ;;  %1755 = vmatmul.mubr.msk.f32.gmra.mrb[16].mxu0 %vm318_vm3, %v2071_v61 }
  0x57   : > { %1705 = vmatprep.mubr.msk.f32.mxu1 %vm318_vm3, %v2051_v53  ;;  %1757 = vmatprep.mubr.msk.f32.mxu0 %vm318_vm3, %v2077_v63 }
  0x5a   : > { %1706 = vmatmul.mubr.msk.f32.gmra.mrb[18].mxu1 %vm318_vm3, %v2058_v56  ;;  %1758 = vmatmul.mubr.msk.f32.gmra.mrb[18].mxu0 %vm318_vm3, %v296_v2 }
  0x5b   : > { %1708 = vmatprep.mubr.msk.f32.mxu1 %vm318_vm3, %v2064_v58  ;;  %1760 = vmatprep.mubr.msk.f32.mxu0 %vm318_vm3, %v297_v4 }
  0x5e   : > { %1709 = vmatmul.mubr.msk.f32.gmra.mrb[20].mxu1 %vm318_vm3, %v2071_v61  ;;  %1761 = vmatmul.mubr.msk.f32.gmra.mrb[20].mxu0 %vm318_vm3, %v298_v7 }
  0x5f   : > { %1711 = vmatprep.mubr.msk.f32.mxu1 %vm318_vm3, %v2077_v63  ;;  %1763 = vmatprep.mubr.msk.f32.mxu0 %vm318_vm3, %v299_v9 }
  0x62   : > { %1712 = vmatmul.mubr.msk.f32.gmra.mrb[22].mxu1 %vm318_vm3, %v296_v2  ;;  %1764 = vmatmul.mubr.msk.f32.gmra.mrb[22].mxu0 %vm318_vm3, %v300_v12 }
  0x63   : > { %1714 = vmatprep.mubr.msk.f32.mxu1 %vm318_vm3, %v297_v4  ;;  %1766 = vmatprep.mubr.msk.f32.mxu0 %vm318_vm3, %v301_v14 }
  0x66   : > { %1715 = vmatmul.mubr.msk.f32.gmra.mrb[24].mxu1 %vm318_vm3, %v298_v7  ;;  %1767 = vmatmul.mubr.msk.f32.gmra.mrb[24].mxu0 %vm318_vm3, %v302_v17 }
  0x67   : > { %1717 = vmatprep.mubr.msk.f32.mxu1 %vm318_vm3, %v299_v9  ;;  %1769 = vmatprep.mubr.msk.f32.mxu0 %vm318_vm3, %v303_v19 }
  0x6a   : > { %1718 = vmatmul.mubr.msk.f32.gmra.mrb[26].mxu1 %vm318_vm3, %v300_v12  ;;  %1770 = vmatmul.mubr.msk.f32.gmra.mrb[26].mxu0 %vm318_vm3, %v304_v21 }
  0x6b   : > { %1720 = vmatprep.mubr.msk.f32.mxu1 %vm318_vm3, %v301_v14  ;;  %1772 = vmatprep.mubr.msk.f32.mxu0 %vm318_vm3, %v305_v23 }
  0x6e   : > { %1721 = vmatmul.mubr.msk.f32.gmra.mrb[28].mxu1 %vm318_vm3, %v302_v17  ;;  %1773 = vmatmul.mubr.msk.f32.gmra.mrb[28].mxu0 %vm318_vm3, %v306_v24 }
  0x6f   : > { %1723 = vmatprep.mubr.msk.f32.mxu1 %vm318_vm3, %v303_v19  ;;  %1775 = vmatprep.mubr.msk.f32.mxu0 %vm318_vm3, %v307_v28 }
  0x72   : > { %1724 = vmatmul.mubr.msk.f32.gmra.mrb[30].mxu1 %vm318_vm3, %v304_v21  ;;  %1776 = vmatmul.mubr.msk.f32.gmra.mrb[30].mxu0 %vm318_vm3, %v308_v29 }
  0xe9   : > { %v1628_v30 = vpop.f32.mrb[0].mxu1 }
  0xea   : > { %v485_v31 = vpop.f32.mrb[1].mxu1 }
  0xed   : > { %v1631_v32 = vpop.f32.mrb[2].mxu1 }
  0xee   : > { %v495_v33 = vpop.f32.mrb[3].mxu1 }
  0xf1   : > { %v1634_v34 = vpop.f32.mrb[4].mxu1 }
  0xf2   : > { %v505_v35 = vpop.f32.mrb[5].mxu1 }
  0xf5   : > { %v1637_v36 = vpop.f32.mrb[6].mxu1 }
  0xf6   : > { %v515_v37 = vpop.f32.mrb[7].mxu1 }
  0xf9   : > { %v1640_v38 = vpop.f32.mrb[8].mxu1 }
  0xfa   : > { %v525_v39 = vpop.f32.mrb[9].mxu1 }
  0xfd   : > { %v1643_v40 = vpop.f32.mrb[10].mxu1 }
  0xfe   : > { %v2167_v41 = vpop.f32.mrb[11].mxu1 }
 0x101   : > { %v2171_v42 = vpop.f32.mrb[12].mxu1 }
 0x102   : > { %v2173_v43 = vpop.f32.mrb[13].mxu1 }
 0x105   : > { %v2175_v44 = vpop.f32.mrb[14].mxu1 }
 0x106   : > { %v2177_v45 = vpop.f32.mrb[15].mxu1 }
 0x109   : > { %v1732_v46 = vpop.f32.mrb[0].mxu0 }
 0x10a   : > { %v1798_v48 = vadd.f32 %v1732_v46, %v1628_v30  ;;  %v958_v49 = vpop.f32.mrb[1].mxu0 }
 0x10b   : > { %v1799_v51 = vadd.f32 %v958_v49, %v485_v31 }
 0x10c   : > { %v1157_v52 = vmul.f32 %v1798_v48, %v2182_v47 }
 0x10d   : > { %v1156_v53 = vmul.f32 %v1799_v51, %v2182_v47  ;;  %v1735_v54 = vpop.f32.mrb[2].mxu0 }
 0x10e   : > { %v1196_v55 = vadd.f32 %v2187_v50, %v1157_v52  ;;  %v1800_v56 = vadd.f32 %v1735_v54, %v1631_v32  ;;  %v968_v57 = vpop.f32.mrb[3].mxu0 }
 0x10f   : > { %v1195_v58 = vadd.f32 %v2187_v50, %v1156_v53  ;;  %v1801_v59 = vadd.f32 %v968_v57, %v495_v33 }
 0x110   : > { %1229 = vst.msk [vmem:[%s2193_s10 + $0x8] sm:$0xff] %vm1227_vm4, %v1196_v55  ;;  %v1159_v60 = vmul.f32 %v1800_v56, %v2182_v47 }
 0x111   : > { %1228 = vst.msk [vmem:[%s2193_s10] sm:$0xff] %vm1227_vm4, %v1195_v58  ;;  %v1158_v61 = vmul.f32 %v1801_v59, %v2182_v47  ;;  %v1738_v62 = vpop.f32.mrb[4].mxu0 }
 0x112   : > { %v1198_v63 = vadd.f32 %v2187_v50, %v1159_v60  ;;  %v1802_v0 = vadd.f32 %v1738_v62, %v1634_v34  ;;  %v978_v1 = vpop.f32.mrb[5].mxu0 }
 0x113   : > { %v1197_v2 = vadd.f32 %v2187_v50, %v1158_v61  ;;  %v1803_v3 = vadd.f32 %v978_v1, %v505_v35 }
 0x114   : > { %1231 = vst.msk [vmem:[%s2193_s10 + $0x18] sm:$0xff] %vm1227_vm4, %v1198_v63  ;;  %v1161_v4 = vmul.f32 %v1802_v0, %v2182_v47 }
 0x115   : > { %1230 = vst.msk [vmem:[%s2193_s10 + $0x10] sm:$0xff] %vm1227_vm4, %v1197_v2  ;;  %v1160_v5 = vmul.f32 %v1803_v3, %v2182_v47  ;;  %v1741_v6 = vpop.f32.mrb[6].mxu0 }
 0x116   : > { %v1200_v7 = vadd.f32 %v2187_v50, %v1161_v4  ;;  %v1804_v8 = vadd.f32 %v1741_v6, %v1637_v36  ;;  %v988_v9 = vpop.f32.mrb[7].mxu0 }
 0x117   : > { %v1199_v10 = vadd.f32 %v2187_v50, %v1160_v5  ;;  %v1805_v11 = vadd.f32 %v988_v9, %v515_v37 }
 0x118   : > { %1233 = vst.msk [vmem:[%s2193_s10 + $0x28] sm:$0xff] %vm1227_vm4, %v1200_v7  ;;  %v1163_v12 = vmul.f32 %v1804_v8, %v2182_v47 }
 0x119   : > { %1232 = vst.msk [vmem:[%s2193_s10 + $0x20] sm:$0xff] %vm1227_vm4, %v1199_v10  ;;  %v1162_v13 = vmul.f32 %v1805_v11, %v2182_v47  ;;  %v1744_v14 = vpop.f32.mrb[8].mxu0 }
 0x11a   : > { %v1202_v15 = vadd.f32 %v2187_v50, %v1163_v12  ;;  %v1806_v16 = vadd.f32 %v1744_v14, %v1640_v38  ;;  %v998_v17 = vpop.f32.mrb[9].mxu0 }
 0x11b   : > { %v1201_v18 = vadd.f32 %v2187_v50, %v1162_v13  ;;  %v1807_v19 = vadd.f32 %v998_v17, %v525_v39 }
 0x11c   : > { %1235 = vst.msk [vmem:[%s2193_s10 + $0x38] sm:$0xff] %vm1227_vm4, %v1202_v15  ;;  %v1165_v20 = vmul.f32 %v1806_v16, %v2182_v47 }
 0x11d   : > { %1234 = vst.msk [vmem:[%s2193_s10 + $0x30] sm:$0xff] %vm1227_vm4, %v1201_v18  ;;  %v1164_v21 = vmul.f32 %v1807_v19, %v2182_v47  ;;  %v1747_v22 = vpop.f32.mrb[10].mxu0 }
 0x11e   : > { %v1204_v23 = vadd.f32 %v2187_v50, %v1165_v20  ;;  %v1808_v24 = vadd.f32 %v1747_v22, %v1643_v40  ;;  %v1008_v25 = vpop.f32.mrb[11].mxu0 }
 0x11f   : > { %v1203_v26 = vadd.f32 %v2187_v50, %v1164_v21  ;;  %v1809_v27 = vadd.f32 %v1008_v25, %v2167_v41 }
 0x120   : > { %1237 = vst.msk [vmem:[%s2193_s10 + $0x48] sm:$0xff] %vm1227_vm4, %v1204_v23  ;;  %v1167_v28 = vmul.f32 %v1808_v24, %v2182_v47 }
 0x121   : > { %1236 = vst.msk [vmem:[%s2193_s10 + $0x40] sm:$0xff] %vm1227_vm4, %v1203_v26  ;;  %v1166_v29 = vmul.f32 %v1809_v27, %v2182_v47  ;;  %v1750_v30 = vpop.f32.mrb[12].mxu0 }
 0x122   : > { %v1206_v31 = vadd.f32 %v2187_v50, %v1167_v28  ;;  %v1810_v32 = vadd.f32 %v1750_v30, %v2171_v42  ;;  %v1018_v33 = vpop.f32.mrb[13].mxu0 }
 0x123   : > { %v1205_v34 = vadd.f32 %v2187_v50, %v1166_v29  ;;  %v1811_v35 = vadd.f32 %v1018_v33, %v2173_v43 }
 0x124   : > { %1239 = vst.msk [vmem:[%s2193_s10 + $0x58] sm:$0xff] %vm1227_vm4, %v1206_v31  ;;  %v1169_v36 = vmul.f32 %v1810_v32, %v2182_v47 }
 0x125   : > { %1238 = vst.msk [vmem:[%s2193_s10 + $0x50] sm:$0xff] %vm1227_vm4, %v1205_v34  ;;  %v1168_v37 = vmul.f32 %v1811_v35, %v2182_v47  ;;  %v1753_v38 = vpop.f32.mrb[14].mxu0 }
 0x126   : > { %v1208_v39 = vadd.f32 %v2187_v50, %v1169_v36  ;;  %v1812_v40 = vadd.f32 %v1753_v38, %v2175_v44  ;;  %v1028_v41 = vpop.f32.mrb[15].mxu0 }
 0x127   : > { %v1207_v42 = vadd.f32 %v2187_v50, %v1168_v37  ;;  %v1813_v43 = vadd.f32 %v1028_v41, %v2177_v45 }
 0x128   : > { %1241 = vst.msk [vmem:[%s2193_s10 + $0x68] sm:$0xff] %vm1227_vm4, %v1208_v39  ;;  %v1171_v46 = vmul.f32 %v1812_v40, %v2182_v47 }
 0x129   : > { %1240 = vst.msk [vmem:[%s2193_s10 + $0x60] sm:$0xff] %vm1227_vm4, %v1207_v42  ;;  %v1170_v48 = vmul.f32 %v1813_v43, %v2182_v47  ;;  %v1704_v49 = vpop.f32.mrb[16].mxu1  ;;  %v1756_v51 = vpop.f32.mrb[16].mxu0 }
 0x12a   : > { %v1210_v52 = vadd.f32 %v2187_v50, %v1171_v46  ;;  %v1814_v44 = vadd.f32 %v1756_v51, %v1704_v49  ;;  %v799_v53 = vpop.f32.mrb[17].mxu1  ;;  %v1038_v54 = vpop.f32.mrb[17].mxu0 }
 0x12b   : > { %v1209_v55 = vadd.f32 %v2187_v50, %v1170_v48  ;;  %v1815_v45 = vadd.f32 %v1038_v54, %v799_v53 }
 0x12c   : > { %1243 = vst.msk [vmem:[%s2193_s10 + $0x78] sm:$0xff] %vm1227_vm4, %v1210_v52  ;;  %v1173_v56 = vmul.f32 %v1814_v44, %v2182_v47 }
 0x12d   : > { %1242 = vst.msk [vmem:[%s2193_s10 + $0x70] sm:$0xff] %vm1227_vm4, %v1209_v55  ;;  %v1172_v57 = vmul.f32 %v1815_v45, %v2182_v47  ;;  %v1707_v58 = vpop.f32.mrb[18].mxu1  ;;  %v1759_v59 = vpop.f32.mrb[18].mxu0 }
 0x12e   : > { %v1212_v60 = vadd.f32 %v2187_v50, %v1173_v56  ;;  %v1816_v61 = vadd.f32 %v1759_v59, %v1707_v58  ;;  %v809_v62 = vpop.f32.mrb[19].mxu1  ;;  %v1048_v63 = vpop.f32.mrb[19].mxu0 }
 0x12f   : > { %v1211_v0 = vadd.f32 %v2187_v50, %v1172_v57  ;;  %v1817_v1 = vadd.f32 %v1048_v63, %v809_v62 }
 0x130   : > { %1245 = vst.msk [vmem:[%s2193_s10 + $0x88] sm:$0xff] %vm1227_vm4, %v1212_v60  ;;  %v1175_v2 = vmul.f32 %v1816_v61, %v2182_v47 }
 0x131   : > { %1244 = vst.msk [vmem:[%s2193_s10 + $0x80] sm:$0xff] %vm1227_vm4, %v1211_v0  ;;  %v1174_v3 = vmul.f32 %v1817_v1, %v2182_v47  ;;  %v1710_v4 = vpop.f32.mrb[20].mxu1  ;;  %v1762_v5 = vpop.f32.mrb[20].mxu0 }
 0x132   : > { %v1214_v6 = vadd.f32 %v2187_v50, %v1175_v2  ;;  %v1818_v7 = vadd.f32 %v1762_v5, %v1710_v4  ;;  %v819_v8 = vpop.f32.mrb[21].mxu1  ;;  %v1058_v9 = vpop.f32.mrb[21].mxu0 }
 0x133   : > { %v1213_v10 = vadd.f32 %v2187_v50, %v1174_v3  ;;  %v1819_v11 = vadd.f32 %v1058_v9, %v819_v8 }
 0x134   : > { %1247 = vst.msk [vmem:[%s2193_s10 + $0x98] sm:$0xff] %vm1227_vm4, %v1214_v6  ;;  %v1177_v12 = vmul.f32 %v1818_v7, %v2182_v47 }
 0x135   : > { %1246 = vst.msk [vmem:[%s2193_s10 + $0x90] sm:$0xff] %vm1227_vm4, %v1213_v10  ;;  %v1176_v13 = vmul.f32 %v1819_v11, %v2182_v47  ;;  %v1713_v14 = vpop.f32.mrb[22].mxu1  ;;  %v1765_v15 = vpop.f32.mrb[22].mxu0 }
 0x136   : > { %v1216_v16 = vadd.f32 %v2187_v50, %v1177_v12  ;;  %v1820_v17 = vadd.f32 %v1765_v15, %v1713_v14  ;;  %v829_v18 = vpop.f32.mrb[23].mxu1  ;;  %v1068_v19 = vpop.f32.mrb[23].mxu0 }
 0x137   : > { %v1215_v20 = vadd.f32 %v2187_v50, %v1176_v13  ;;  %v1821_v21 = vadd.f32 %v1068_v19, %v829_v18 }
 0x138   : > { %1249 = vst.msk [vmem:[%s2193_s10 + $0xa8] sm:$0xff] %vm1227_vm4, %v1216_v16  ;;  %v1179_v22 = vmul.f32 %v1820_v17, %v2182_v47 }
 0x139   : > { %1248 = vst.msk [vmem:[%s2193_s10 + $0xa0] sm:$0xff] %vm1227_vm4, %v1215_v20  ;;  %v1178_v23 = vmul.f32 %v1821_v21, %v2182_v47  ;;  %v1716_v24 = vpop.f32.mrb[24].mxu1  ;;  %v1768_v25 = vpop.f32.mrb[24].mxu0 }
 0x13a   : > { %v1218_v26 = vadd.f32 %v2187_v50, %v1179_v22  ;;  %v1822_v27 = vadd.f32 %v1768_v25, %v1716_v24  ;;  %v839_v28 = vpop.f32.mrb[25].mxu1  ;;  %v1078_v29 = vpop.f32.mrb[25].mxu0 }
 0x13b   : > { %v1217_v30 = vadd.f32 %v2187_v50, %v1178_v23  ;;  %v1823_v31 = vadd.f32 %v1078_v29, %v839_v28 }
 0x13c   : > { %1251 = vst.msk [vmem:[%s2193_s10 + $0xb8] sm:$0xff] %vm1227_vm4, %v1218_v26  ;;  %v1181_v32 = vmul.f32 %v1822_v27, %v2182_v47 }
 0x13d   : > { %1250 = vst.msk [vmem:[%s2193_s10 + $0xb0] sm:$0xff] %vm1227_vm4, %v1217_v30  ;;  %v1180_v33 = vmul.f32 %v1823_v31, %v2182_v47  ;;  %v1719_v34 = vpop.f32.mrb[26].mxu1  ;;  %v1771_v35 = vpop.f32.mrb[26].mxu0 }
 0x13e   : > { %v1220_v36 = vadd.f32 %v2187_v50, %v1181_v32  ;;  %v1824_v37 = vadd.f32 %v1771_v35, %v1719_v34  ;;  %v849_v38 = vpop.f32.mrb[27].mxu1  ;;  %v1088_v39 = vpop.f32.mrb[27].mxu0 }
 0x13f   : > { %v1219_v40 = vadd.f32 %v2187_v50, %v1180_v33  ;;  %v1825_v41 = vadd.f32 %v1088_v39, %v849_v38 }
 0x140   : > { %1253 = vst.msk [vmem:[%s2193_s10 + $0xc8] sm:$0xff] %vm1227_vm4, %v1220_v36  ;;  %v1183_v42 = vmul.f32 %v1824_v37, %v2182_v47 }
 0x141   : > { %1252 = vst.msk [vmem:[%s2193_s10 + $0xc0] sm:$0xff] %vm1227_vm4, %v1219_v40  ;;  %v1182_v43 = vmul.f32 %v1825_v41, %v2182_v47  ;;  %v1722_v46 = vpop.f32.mrb[28].mxu1  ;;  %v1774_v48 = vpop.f32.mrb[28].mxu0 }
 0x142   : > { %v1222_v49 = vadd.f32 %v2187_v50, %v1183_v42  ;;  %v1826_v51 = vadd.f32 %v1774_v48, %v1722_v46  ;;  %v859_v52 = vpop.f32.mrb[29].mxu1  ;;  %v1098_v44 = vpop.f32.mrb[29].mxu0 }
 0x143   : > { %v1221_v53 = vadd.f32 %v2187_v50, %v1182_v43  ;;  %v1827_v54 = vadd.f32 %v1098_v44, %v859_v52 }
 0x144   : > { %1255 = vst.msk [vmem:[%s2193_s10 + $0xd8] sm:$0xff] %vm1227_vm4, %v1222_v49  ;;  %v1185_v55 = vmul.f32 %v1826_v51, %v2182_v47 }
 0x145   : > { %1254 = vst.msk [vmem:[%s2193_s10 + $0xd0] sm:$0xff] %vm1227_vm4, %v1221_v53  ;;  %v1184_v45 = vmul.f32 %v1827_v54, %v2182_v47  ;;  %v1725_v56 = vpop.f32.mrb[30].mxu1  ;;  %v1777_v57 = vpop.f32.mrb[30].mxu0 }
 0x146   : > { %v1224_v58 = vadd.f32 %v2187_v50, %v1185_v55  ;;  %v1828_v59 = vadd.f32 %v1777_v57, %v1725_v56  ;;  %v869_v60 = vpop.f32.mrb[31].mxu1  ;;  %v1108_v61 = vpop.f32.mrb[31].mxu0 }
 0x147   : > { %v1223_v62 = vadd.f32 %v2187_v50, %v1184_v45  ;;  %v1829_v63 = vadd.f32 %v1108_v61, %v869_v60 }
 0x148   : > { %1257 = vst.msk [vmem:[%s2193_s10 + $0xe8] sm:$0xff] %vm1227_vm4, %v1224_v58  ;;  %v1187_v0 = vmul.f32 %v1828_v59, %v2182_v47 }
 0x149   : > { %1256 = vst.msk [vmem:[%s2193_s10 + $0xe0] sm:$0xff] %vm1227_vm4, %v1223_v62  ;;  %v1186_v1 = vmul.f32 %v1829_v63, %v2182_v47 }
 0x14a   : > { %v1226_v2 = vadd.f32 %v2187_v50, %v1187_v0 }
 0x14b   : > { %v1225_v3 = vadd.f32 %v2187_v50, %v1186_v1 }
 0x14c   : > { %1259 = vst.msk [vmem:[%s2193_s10 + $0xf8] sm:$0xff] %vm1227_vm4, %v1226_v2 }
 0x14d   : > { %1258 = vst.msk [vmem:[%s2193_s10 + $0xf0] sm:$0xff] %vm1227_vm4, %v1225_v3 }
 0x14e PF: > { %s14_s15 = sadd.s32 1, %s1886_s15  }
 0x14f   : > { %p11_p5 = scmp.ge.s32.totalorder %s14_s15, 4  }
 0x151   :  { %13 = sbr.rel (!%p11_p5) target bundleno = 1 (0x1), region = 68 }

// kernel: forward.34
= control target key start
LH: loop header
LB: loop body
LE: loop exit
PB: predicated region body
PF: predicated region fallthrough
CT: control target
= control target key end

     0   :  { %s501_s15 = smov 0   ;;  %s543_s0 = inlined_call_operand.vmem [shape: bf16[128,16], index: 0, kind: input, shape index: {}]   ;;  %s544_s1 = inlined_call_operand.vmem [shape: bf16[16,16], index: 1, kind: input, shape index: {}]   ;;  %s545_s2 = inlined_call_operand.vmem [shape: f32[1,16], index: 2, kind: input, shape index: {}]   ;;  %s546_s3 = inlined_call_operand.vmem [shape: f32[1,16], index: 3, kind: input, shape index: {}]   ;;  %s547_s4 = inlined_call_operand.vmem [shape: f32[128,16], index: 4, kind: output, shape index: {}]  }
   0x1 LB: > { %s418_s16 = sadd.s32 4294967295, %s473_s15   ;;  %p422_p0 = scmp.ge.s32.totalorder %s473_s15, 1  ;;  %s473_s15 = sphi %s501_s15, %s14_s15  }
   0x2   : > { %p163_p1 = scmp.lt.s32.totalorder %s473_s15, 3 }
   0x4   : > { %p164_p2 = pnand %p422_p0, %p163_p1 }
   0x5   : > { %v466_v0 = vld [vmem:[%s544_s1] sm:$0xff] (!%p164_p2)   ;;  %s423_s19 = sshll.u32 (!%p164_p2), %s418_s16, 3  ;;  %v475_v4 = vmov (!%p164_p2), 0   ;;  %vm246_vm0 = vcmask (!%p164_p2), 130048  }
   0x6   : > { %167 = sbr.rel (%p164_p2) target bundleno = 243 (0xf3), region = 36  ;;  %p190_p3 = scmp.lt.s32.totalorder (!%p164_p2), %s423_s19, 15  ;;  %445 = vmatprep.subr.bf16.mxu0 (!%p164_p2), %v466_v0  ;;  %455 = vmatprep.subr.bf16.mxu1 (!%p164_p2), %v466_v0  ;;  %v436_v22 = vld [vmem:[%s545_s2] ss:$0 sm:$0xff] (!%p164_p2) }
   0x7   : > { %446 = vmatpush3.bf16.msra.mxu0 (!%p164_p2), %v466_v0  ;;  %456 = vmatpush3.bf16.msra.mxu1 (!%p164_p2), %v466_v0  ;;  %v437_v24 = vld [vmem:[%s546_s3] ss:$0 sm:$0xff] (!%p164_p2) }
   0xd   : > { %s549_s19 = smov (!%p190_p3, %s423_s19), 15 }
   0xe   : > { %s424_s20 = sshll.u32 %s549_s19, 2  ;;  %s426_s26 = sshll.u32 %s549_s19, 3 }
   0xf   : > { %s193_s23 = scalar_lea.vmem %s543_s0, %s424_s20  ;;  %s199_s5 = scalar_lea.vmem %s547_s4, %s426_s26 }
  0x10   : > { %v202_v1 = vld [vmem:[%s193_s23] sm:$0xf]  ;;  %v203_v2 = vld [vmem:[%s193_s23 + $0x4] sm:$0xf]  ;;  %v206_v3 = vld [vmem:[%s193_s23 + $0x10] sm:$0xf] }
  0x11   : > { %v210_v5 = vmax.bf16 %v475_v4, %v202_v1  ;;  %v211_v6 = vmax.bf16 %v475_v4, %v203_v2  ;;  %v207_v7 = vld [vmem:[%s193_s23 + $0x14] sm:$0xf]  ;;  %v214_v8 = vmax.bf16 %v475_v4, %v206_v3  ;;  %v204_v9 = vld [vmem:[%s193_s23 + $0x8] sm:$0xf]  ;;  %v205_v10 = vld [vmem:[%s193_s23 + $0xc] sm:$0xf] }
  0x12   : > { %v215_v11 = vmax.bf16 %v475_v4, %v207_v7  ;;  %v212_v12 = vmax.bf16 %v475_v4, %v204_v9  ;;  %v213_v13 = vmax.bf16 %v475_v4, %v205_v10  ;;  %v208_v14 = vld [vmem:[%s193_s23 + $0x18] sm:$0xf]  ;;  %v209_v15 = vld [vmem:[%s193_s23 + $0x1c] sm:$0xf] }
  0x13   : > { %v427_v16 = vcombine.low %v210_v5, %v211_v6  ;;  %v216_v17 = vmax.bf16 %v475_v4, %v208_v14  ;;  %v217_v18 = vmax.bf16 %v475_v4, %v209_v15 }
  0x14   : > { %v429_v19 = vcombine.low %v214_v8, %v215_v11  ;;  %v428_v20 = vcombine.low %v212_v12, %v213_v13 }
  0x15   : > { %447 = vmatprep.mubr.msk.bf16.mxu0 %vm246_vm0, %v427_v16  ;;  %v430_v21 = vcombine.low %v216_v17, %v217_v18 }
  0x16   : > { %451 = vmatprep.mubr.msk.bf16.mxu1 %vm246_vm0, %v429_v19  ;;  %448 = vmatmul.mubr.msk.bf16.vlgmr.msra.gmra.mrb[0].mxu0 %vm246_vm0, %v428_v20 }
  0x17   : > { %452 = vmatmul.mubr.msk.bf16.vlgmr.msra.gmra.mrb[0].mxu1 %vm246_vm0, %v430_v21 }
  0xe9   : > { %v449_v23 = vpop.f32.mrb[0].mxu0 }
  0xea   : > { %v333_v25 = vmul.f32 %v449_v23, %v436_v22  ;;  %v453_v26 = vpop.f32.mrb[0].mxu1  ;;  %v293_v27 = vpop.f32.mrb[1].mxu0 }
  0xeb   : > { %v337_v28 = vmul.f32 %v453_v26, %v436_v22  ;;  %v331_v29 = vmul.f32 %v436_v22, %v293_v27  ;;  %v309_v30 = vpop.f32.mrb[1].mxu1  ;;  %v450_v31 = vpop.f32.mrb[2].mxu0 }
  0xec   : > { %v348_v32 = vadd.f32 %v437_v24, %v333_v25  ;;  %v335_v33 = vmul.f32 %v436_v22, %v309_v30  ;;  %v334_v34 = vmul.f32 %v450_v31, %v436_v22  ;;  %v454_v35 = vpop.f32.mrb[2].mxu1  ;;  %v296_v36 = vpop.f32.mrb[3].mxu0 }
  0xed   : > { %v352_v37 = vadd.f32 %v437_v24, %v337_v28  ;;  %v346_v38 = vadd.f32 %v437_v24, %v331_v29  ;;  %v338_v39 = vmul.f32 %v454_v35, %v436_v22  ;;  %v332_v40 = vmul.f32 %v436_v22, %v296_v36  ;;  %v312_v41 = vpop.f32.mrb[3].mxu1 }
  0xee   : > { %356 = vst.msk [vmem:[%s199_s5 + $0x10] sm:$0xff] %vm246_vm0, %v348_v32  ;;  %v350_v42 = vadd.f32 %v437_v24, %v335_v33  ;;  %v349_v43 = vadd.f32 %v437_v24, %v334_v34  ;;  %v336_v44 = vmul.f32 %v436_v22, %v312_v41 }
  0xef   : > { %360 = vst.msk [vmem:[%s199_s5 + $0x30] sm:$0xff] %vm246_vm0, %v352_v37  ;;  %354 = vst.msk [vmem:[%s199_s5] sm:$0xff] %vm246_vm0, %v346_v38  ;;  %v353_v45 = vadd.f32 %v437_v24, %v338_v39  ;;  %v347_v46 = vadd.f32 %v437_v24, %v332_v40 }
  0xf0   : > { %358 = vst.msk [vmem:[%s199_s5 + $0x20] sm:$0xff] %vm246_vm0, %v350_v42  ;;  %357 = vst.msk [vmem:[%s199_s5 + $0x18] sm:$0xff] %vm246_vm0, %v349_v43  ;;  %v351_v47 = vadd.f32 %v437_v24, %v336_v44 }
  0xf1   : > { %361 = vst.msk [vmem:[%s199_s5 + $0x38] sm:$0xff] %vm246_vm0, %v353_v45  ;;  %355 = vst.msk [vmem:[%s199_s5 + $0x8] sm:$0xff] %vm246_vm0, %v347_v46 }
  0xf2   : > { %359 = vst.msk [vmem:[%s199_s5 + $0x28] sm:$0xff] %vm246_vm0, %v351_v47 }
  0xf3 PF: > { %s14_s15 = sadd.s32 1, %s473_s15  }
  0xf4   : > { %p11_p4 = scmp.ge.s32.totalorder %s14_s15, 4  }
  0xf6   :  { %13 = sbr.rel (!%p11_p4) target bundleno = 1 (0x1), region = 66 }

// kernel: forward.36
= control target key start
LH: loop header
LB: loop body
LE: loop exit
PB: predicated region body
PF: predicated region fallthrough
CT: control target
= control target key end

     0   :  { %v248_v0 = vmov 0   ;;  %vm116_vm0 = vcmask 130048   ;;  %vm194_vm1 = vcmask 261120   ;;  %s331_s1 = inlined_call_operand.vmem [shape: bf16[144,32], index: 1, kind: input, shape index: {}]   ;;  %s332_s0 = inlined_call_operand.vmem [shape: bf16[32,144], index: 0, kind: input, shape index: {}]   ;;  %s333_s2 = inlined_call_operand.vmem [shape: f32[1,32], index: 2, kind: input, shape index: {}]   ;;  %s334_s3 = inlined_call_operand.vmem [shape: f32[1,32], index: 3, kind: input, shape index: {}]   ;;  %s335_s4 = inlined_call_operand.vmem [shape: f32[32,32], index: 4, kind: output, shape index: {}]  }
   0x1   :  { %123 = vmatprep.subr.bf16.mxu0 %v248_v0  ;;  %220 = vmatprep.subr.bf16.mxu1 %v248_v0  ;;  %v239_v1 = vld [vmem:[%s331_s1] sm:$0xff]   ;;  %v240_v2 = vld [vmem:[%s331_s1 + $0x8] sm:$0xff]   ;;  %v241_v3 = vld [vmem:[%s331_s1 + $0x10] sm:$0xff]  }
   0x2   :  { %124 = vmatpush1.bf16.msra.mxu0 %v239_v1  ;;  %229 = vmatpush1.bf16.msra.mxu1 %v239_v1  ;;  %v18_v4 = vld [vmem:[%s332_s0] sm:$0xff]  ;;  %v19_v5 = vld [vmem:[%s332_s0 + $0x8] sm:$0xff]  ;;  %v20_v6 = vld [vmem:[%s332_s0 + $0x10] sm:$0xff] }
   0x3   :  { %125 = vmatprep.subr.bf16.mxu0 %v248_v0  ;;  %221 = vmatprep.subr.bf16.mxu1 %v248_v0  ;;  %v242_v7 = vld [vmem:[%s331_s1 + $0x18] sm:$0xff]   ;;  %v22_v8 = vmax.bf16 %v248_v0, %v18_v4  ;;  %v23_v9 = vmax.bf16 %v248_v0, %v19_v5  ;;  %v24_v11 = vmax.bf16 %v248_v0, %v20_v6  ;;  %v243_v15 = vld [vmem:[%s331_s1 + $0x20] sm:$0xff]   ;;  %v244_v16 = vld [vmem:[%s331_s1 + $0x28] sm:$0xff]  }
   0x4   :  { %v21_v10 = vld [vmem:[%s332_s0 + $0x18] sm:$0xff]  ;;  %v245_v17 = vld [vmem:[%s331_s1 + $0x30] sm:$0xff]   ;;  %v247_v19 = vld [vmem:[%s331_s1 + $0x40] sm:$0xff]  }
   0x5   :  { %v25_v12 = vmax.bf16 %v248_v0, %v21_v10  ;;  %v204_v13 = vcombine.high %v22_v8, %v23_v9  ;;  %v246_v18 = vld [vmem:[%s331_s1 + $0x38] sm:$0xff]   ;;  %v203_v20 = vcombine.low %v22_v8, %v23_v9  ;;  %v218_v22 = vld [vmem:[%s333_s2] ss:$0 sm:$0xff] }
   0x6   :  { %126 = vmatpush1.bf16.msra.mxu0 %v240_v2  ;;  %230 = vmatpush1.bf16.msra.mxu1 %v240_v2  ;;  %v219_v24 = vld [vmem:[%s334_s3] ss:$0 sm:$0xff] }
   0x7   :  { %127 = vmatprep.subr.bf16.mxu0 %v248_v0  ;;  %222 = vmatprep.subr.bf16.mxu1 %v248_v0  ;;  %v206_v14 = vcombine.high %v24_v11, %v25_v12  ;;  %v205_v21 = vcombine.low %v24_v11, %v25_v12 }
   0x8   :  { %216 = vmatprep.mubr.msk.bf16.mxu0 %vm116_vm0, %v204_v13 }
   0x9   :  { %217 = vmatprep.mubr.msk.bf16.mxu1 %vm116_vm0, %v206_v14 }
   0xa   :  { %128 = vmatpush1.bf16.msra.mxu0 %v241_v3  ;;  %231 = vmatpush1.bf16.msra.mxu1 %v241_v3 }
   0xb   :  { %129 = vmatprep.subr.bf16.mxu0 %v248_v0  ;;  %223 = vmatprep.subr.bf16.mxu1 %v248_v0 }
   0xe   :  { %130 = vmatpush1.bf16.msra.mxu0 %v242_v7  ;;  %232 = vmatpush1.bf16.msra.mxu1 %v242_v7 }
   0xf   :  { %131 = vmatprep.subr.bf16.mxu0 %v248_v0  ;;  %224 = vmatprep.subr.bf16.mxu1 %v248_v0 }
  0x12   :  { %132 = vmatpush1.bf16.msra.mxu0 %v243_v15  ;;  %233 = vmatpush1.bf16.msra.mxu1 %v243_v15 }
  0x13   :  { %133 = vmatprep.subr.bf16.mxu0 %v248_v0  ;;  %225 = vmatprep.subr.bf16.mxu1 %v248_v0 }
  0x16   :  { %134 = vmatpush1.bf16.msra.mxu0 %v244_v16  ;;  %234 = vmatpush1.bf16.msra.mxu1 %v244_v16 }
  0x17   :  { %135 = vmatprep.subr.bf16.mxu0 %v248_v0  ;;  %226 = vmatprep.subr.bf16.mxu1 %v248_v0 }
  0x1a   :  { %136 = vmatpush1.bf16.msra.mxu0 %v245_v17  ;;  %235 = vmatpush1.bf16.msra.mxu1 %v245_v17 }
  0x1b   :  { %137 = vmatprep.subr.bf16.mxu0 %v248_v0  ;;  %227 = vmatprep.subr.bf16.mxu1 %v248_v0 }
  0x1e   :  { %138 = vmatpush1.bf16.msra.mxu0 %v246_v18  ;;  %236 = vmatpush1.bf16.msra.mxu1 %v246_v18 }
  0x1f   :  { %139 = vmatprep.subr.bf16.mxu0 %v248_v0  ;;  %228 = vmatprep.subr.bf16.mxu1 %v248_v0 }
  0x22   :  { %140 = vmatpush1.bf16.msra.mxu0 %v247_v19  ;;  %237 = vmatpush1.bf16.msra.mxu1 %v247_v19 }
  0x25   :  { %156 = vmatmul.mubr.bf16.vlgmr.msra.gmra.mrb[0].mxu0 %v203_v20  ;;  %164 = vmatmul.mubr.bf16.vlgmr.msra.gmra.mrb[0].mxu1 %v205_v21 }
  0xf8   :  { %v157_v23 = vpop.f32.mrb[0].mxu0  ;;  %v165_v25 = vpop.f32.mrb[0].mxu1 }
  0xf9   :  { %v179_v26 = vmul.f32 %v218_v22, %v157_v23  ;;  %v181_v27 = vmul.f32 %v218_v22, %v165_v25  ;;  %v159_v28 = vpop.f32.mrb[1].mxu0  ;;  %v167_v29 = vpop.f32.mrb[1].mxu1 }
  0xfa   :  { %v160_v30 = vpop.f32.mrb[2].mxu0  ;;  %v168_v31 = vpop.f32.mrb[2].mxu1 }
  0xfb   :  { %v190_v32 = vadd.f32 %v219_v24, %v179_v26  ;;  %v192_v33 = vadd.f32 %v219_v24, %v181_v27  ;;  %v180_v34 = vmul.f32 %v218_v22, %v160_v30  ;;  %v182_v35 = vmul.f32 %v218_v22, %v168_v31  ;;  %v162_v36 = vpop.f32.mrb[3].mxu0  ;;  %v170_v37 = vpop.f32.mrb[3].mxu1 }
  0xfd   :  { %195 = vst.msk [vmem:[%s335_s4] sm:$0xff] %vm194_vm1, %v190_v32  ;;  %197 = vst.msk [vmem:[%s335_s4 + $0x10] sm:$0xff] %vm194_vm1, %v192_v33  ;;  %v191_v38 = vadd.f32 %v219_v24, %v180_v34  ;;  %v193_v39 = vadd.f32 %v219_v24, %v182_v35 }
  0xff   :  { %196 = vst.msk [vmem:[%s335_s4 + $0x8] sm:$0xff] %vm194_vm1, %v191_v38  ;;  %198 = vst.msk [vmem:[%s335_s4 + $0x18] sm:$0xff] %vm194_vm1, %v193_v39 }

// kernel: forward.37
= control target key start
LH: loop header
LB: loop body
LE: loop exit
PB: predicated region body
PF: predicated region fallthrough
CT: control target
= control target key end

     0   :  { %v161_v5 = vmov 0   ;;  %vm52_vm0 = vcmask 261120   ;;  %s229_s1 = inlined_call_operand.vmem [shape: bf16[32,32], index: 1, kind: input, shape index: {}]   ;;  %s230_s0 = inlined_call_operand.vmem [shape: bf16[32,32], index: 0, kind: input, shape index: {}]   ;;  %s231_s2 = inlined_call_operand.vmem [shape: f32[1,32], index: 2, kind: input, shape index: {}]   ;;  %s232_s3 = inlined_call_operand.vmem [shape: f32[1,32], index: 3, kind: input, shape index: {}]   ;;  %s233_s4 = inlined_call_operand.vmem [shape: f32[32,32], index: 4, kind: output, shape index: {}]  }
   0x1   :  { %v159_v0 = vld [vmem:[%s229_s1] sm:$0xff]   ;;  %v160_v1 = vld [vmem:[%s229_s1 + $0x8] sm:$0xff]  }
   0x2   :  { %150 = vmatprep.subr.bf16.mxu0 %v159_v0  ;;  %v18_v2 = vld [vmem:[%s230_s0] sm:$0xf]  ;;  %v19_v3 = vld [vmem:[%s230_s0 + $0x4] sm:$0xf]  ;;  %v20_v4 = vld [vmem:[%s230_s0 + $0x8] sm:$0xf] }
   0x3   :  { %151 = vmatpush3.bf16.msra.mxu0 %v159_v0  ;;  %v22_v6 = vmax.bf16 %v161_v5, %v18_v2  ;;  %v23_v7 = vmax.bf16 %v161_v5, %v19_v3  ;;  %v21_v8 = vld [vmem:[%s230_s0 + $0xc] sm:$0xf]  ;;  %v24_v9 = vmax.bf16 %v161_v5, %v20_v4  ;;  %v144_v13 = vld [vmem:[%s231_s2] ss:$0 sm:$0xff] }
   0x4   :  { %152 = vmatprep.subr.bf16.mxu0 %v160_v1  ;;  %v25_v10 = vmax.bf16 %v161_v5, %v21_v8  ;;  %v145_v15 = vld [vmem:[%s232_s3] ss:$0 sm:$0xff] }
   0x5   :  { %v138_v11 = vcombine.low %v22_v6, %v23_v7 }
   0x6   :  { %v139_v12 = vcombine.low %v24_v9, %v25_v10 }
   0x7   :  { %153 = vmatpush3.bf16.msra.mxu0 %v160_v1  ;;  %154 = vmatprep.mubr.msk.bf16.mxu0 %vm52_vm0, %v138_v11 }
   0xa   :  { %155 = vmatmul.mubr.msk.bf16.vlgmr.msra.gmra.mrb[0].mxu0 %vm52_vm0, %v139_v12 }
  0xdd   :  { %v156_v14 = vpop.f32.mrb[0].mxu0 }
  0xde   :  { %v117_v16 = vmul.f32 %v156_v14, %v144_v13  ;;  %v93_v17 = vpop.f32.mrb[1].mxu0 }
  0xdf   :  { %v115_v18 = vmul.f32 %v144_v13, %v93_v17  ;;  %v157_v19 = vpop.f32.mrb[2].mxu0 }
  0xe0   :  { %v128_v20 = vadd.f32 %v145_v15, %v117_v16  ;;  %v118_v21 = vmul.f32 %v157_v19, %v144_v13  ;;  %v96_v22 = vpop.f32.mrb[3].mxu0 }
  0xe1   :  { %v126_v23 = vadd.f32 %v145_v15, %v115_v18  ;;  %v116_v24 = vmul.f32 %v144_v13, %v96_v22 }
  0xe2   :  { %132 = vst.msk [vmem:[%s233_s4 + $0x10] sm:$0xff] %vm52_vm0, %v128_v20  ;;  %v129_v25 = vadd.f32 %v145_v15, %v118_v21 }
  0xe3   :  { %130 = vst.msk [vmem:[%s233_s4] sm:$0xff] %vm52_vm0, %v126_v23  ;;  %v127_v26 = vadd.f32 %v145_v15, %v116_v24 }
  0xe4   :  { %133 = vst.msk [vmem:[%s233_s4 + $0x18] sm:$0xff] %vm52_vm0, %v129_v25 }
  0xe5   :  { %131 = vst.msk [vmem:[%s233_s4 + $0x8] sm:$0xff] %vm52_vm0, %v127_v26 }

// kernel: forward.28
= control target key start
LH: loop header
LB: loop body
LE: loop exit
PB: predicated region body
PF: predicated region fallthrough
CT: control target
= control target key end

     0   :  { %s870_s15 = smov 0   ;;  %s1116_s0 = inlined_call_operand.vmem [shape: bf16[512,8], index: 0, kind: input, shape index: {}]   ;;  %s1117_s1 = inlined_call_operand.vmem [shape: bf16[8,8], index: 1, kind: input, shape index: {}]   ;;  %s1118_s2 = inlined_call_operand.vmem [shape: f32[1,8], index: 2, kind: input, shape index: {}]   ;;  %s1119_s3 = inlined_call_operand.vmem [shape: f32[1,8], index: 3, kind: input, shape index: {}]   ;;  %s1120_s4 = inlined_call_operand.vmem [shape: f32[512,8], index: 4, kind: output, shape index: {}]  }
   0x1 LB: > { %s727_s16 = sadd.s32 4294967295, %s842_s15   ;;  %p731_p0 = scmp.ge.s32.totalorder %s842_s15, 1  ;;  %s842_s15 = sphi %s870_s15, %s14_s15  }
   0x2   : > { %p163_p1 = scmp.lt.s32.totalorder %s842_s15, 3 }
   0x4   : > { %p164_p2 = pnand %p731_p0, %p163_p1 }
   0x5   : > { %v266_v0 = vld [vmem:[%s1117_s1] sm:$0xf] (!%p164_p2)  ;;  %vm396_vm0 = vcmask (!%p164_p2), 1043456   ;;  %s732_s19 = sshll.u32 (!%p164_p2), %s727_s16, 5  ;;  %vm347_vm1 = vcmask (!%p164_p2), 64512   ;;  %v844_v5 = vmov (!%p164_p2), 0  }
   0x6   : > { %167 = sbr.rel (%p164_p2) target bundleno = 267 (0x10b), region = 36  ;;  %825 = vmatprep.subr.msk.bf16.mxu0 (!%p164_p2), %vm396_vm0, %v266_v0  ;;  %826 = vmatprep.subr.msk.bf16.mxu1 (!%p164_p2), %vm396_vm0, %v266_v0  ;;  %v398_v1 = vsel (!%p164_p2), %vm396_vm0, %v266_v0, 0  ;;  %p190_p3 = scmp.lt.s32.totalorder (!%p164_p2), %s732_s19, 63 }
   0x7   : > { %790 = vmatpush3.bf16.msra.mxu0 (!%p164_p2), %v398_v1  ;;  %824 = vmatpush3.bf16.msra.mxu1 (!%p164_p2), %v398_v1 }
   0xd   : > { %s1122_s19 = smov (!%p190_p3, %s732_s19), 63 }
   0xe   : > { %s733_s20 = sshll.u32 %s1122_s19, 2  ;;  %s735_s26 = sshll.u32 %s1122_s19, 3 }
   0xf   : > { %s887_s23 = scalar_lea.vmem %s1116_s0, %s733_s20  ;;  %s984_s5 = scalar_lea.vmem %s1120_s4, %s735_s26 }
  0x10   : > { %v202_v2 = vld [vmem:[%s887_s23] sm:$0xf]  ;;  %v203_v3 = vld [vmem:[%s887_s23 + $0x4] sm:$0xf]  ;;  %v204_v10 = vld [vmem:[%s887_s23 + $0x8] sm:$0xf] }
  0x11   : > { %v218_v4 = vld [vmem:[%s887_s23 + $0x40] sm:$0xf]  ;;  %v234_v6 = vmax.bf16 %v844_v5, %v202_v2  ;;  %v235_v7 = vmax.bf16 %v844_v5, %v203_v3  ;;  %v219_v8 = vld [vmem:[%s887_s23 + $0x44] sm:$0xf]  ;;  %v205_v11 = vld [vmem:[%s887_s23 + $0xc] sm:$0xf]  ;;  %v236_v13 = vmax.bf16 %v844_v5, %v204_v10 }
  0x12   : > { %v250_v9 = vmax.bf16 %v844_v5, %v218_v4  ;;  %v251_v12 = vmax.bf16 %v844_v5, %v219_v8  ;;  %v237_v14 = vmax.bf16 %v844_v5, %v205_v11  ;;  %v220_v15 = vld [vmem:[%s887_s23 + $0x48] sm:$0xf]  ;;  %v221_v16 = vld [vmem:[%s887_s23 + $0x4c] sm:$0xf]  ;;  %v206_v17 = vld [vmem:[%s887_s23 + $0x10] sm:$0xf] }
  0x13   : > { %v736_v18 = vcombine.low %v234_v6, %v235_v7  ;;  %v252_v19 = vmax.bf16 %v844_v5, %v220_v15  ;;  %v253_v20 = vmax.bf16 %v844_v5, %v221_v16  ;;  %v207_v21 = vld [vmem:[%s887_s23 + $0x14] sm:$0xf]  ;;  %v238_v22 = vmax.bf16 %v844_v5, %v206_v17  ;;  %v222_v23 = vld [vmem:[%s887_s23 + $0x50] sm:$0xf]  ;;  %v208_v29 = vld [vmem:[%s887_s23 + $0x18] sm:$0xf] }
  0x14   : > { %v223_v24 = vld [vmem:[%s887_s23 + $0x54] sm:$0xf]  ;;  %v744_v25 = vcombine.low %v250_v9, %v251_v12  ;;  %v737_v26 = vcombine.low %v236_v13, %v237_v14  ;;  %v239_v27 = vmax.bf16 %v844_v5, %v207_v21  ;;  %v254_v28 = vmax.bf16 %v844_v5, %v222_v23  ;;  %v209_v30 = vld [vmem:[%s887_s23 + $0x1c] sm:$0xf]  ;;  %v224_v31 = vld [vmem:[%s887_s23 + $0x58] sm:$0xf] }
  0x15   : > { %791 = vmatprep.mubr.msk.bf16.mxu0 %vm347_vm1, %v736_v18  ;;  %v745_v32 = vcombine.low %v252_v19, %v253_v20  ;;  %v255_v33 = vmax.bf16 %v844_v5, %v223_v24  ;;  %v240_v34 = vmax.bf16 %v844_v5, %v208_v29  ;;  %v225_v35 = vld [vmem:[%s887_s23 + $0x5c] sm:$0xf]  ;;  %v210_v36 = vld [vmem:[%s887_s23 + $0x20] sm:$0xf]  ;;  %v211_v37 = vld [vmem:[%s887_s23 + $0x24] sm:$0xf]  ;;  %v241_v39 = vmax.bf16 %v844_v5, %v209_v30 }
  0x16   : > { %807 = vmatprep.mubr.msk.bf16.mxu1 %vm347_vm1, %v744_v25  ;;  %792 = vmatmul.mubr.msk.bf16.vlgmr.msra.gmra.mrb[0].mxu0 %vm347_vm1, %v737_v26  ;;  %v738_v38 = vcombine.low %v238_v22, %v239_v27  ;;  %v256_v40 = vmax.bf16 %v844_v5, %v224_v31  ;;  %v226_v41 = vld [vmem:[%s887_s23 + $0x60] sm:$0xf]  ;;  %v227_v42 = vld [vmem:[%s887_s23 + $0x64] sm:$0xf]  ;;  %v257_v44 = vmax.bf16 %v844_v5, %v225_v35  ;;  %v212_v52 = vld [vmem:[%s887_s23 + $0x28] sm:$0xf] }
  0x17   : > { %808 = vmatmul.mubr.msk.bf16.vlgmr.msra.gmra.mrb[0].mxu1 %vm347_vm1, %v745_v32  ;;  %v746_v43 = vcombine.low %v254_v28, %v255_v33  ;;  %v242_v45 = vmax.bf16 %v844_v5, %v210_v36  ;;  %v243_v46 = vmax.bf16 %v844_v5, %v211_v37  ;;  %v258_v47 = vmax.bf16 %v844_v5, %v226_v41  ;;  %v213_v53 = vld [vmem:[%s887_s23 + $0x2c] sm:$0xf]  ;;  %v228_v54 = vld [vmem:[%s887_s23 + $0x68] sm:$0xf]  ;;  %v214_v57 = vld [vmem:[%s887_s23 + $0x30] sm:$0xf] }
  0x18   : > { %795 = vmatprep.mubr.msk.bf16.mxu0 %vm347_vm1, %v738_v38  ;;  %v259_v48 = vmax.bf16 %v844_v5, %v227_v42  ;;  %v739_v49 = vcombine.low %v240_v34, %v241_v39  ;;  %v747_v50 = vcombine.low %v256_v40, %v257_v44  ;;  %v229_v56 = vld [vmem:[%s887_s23 + $0x6c] sm:$0xf]  ;;  %v215_v58 = vld [vmem:[%s887_s23 + $0x34] sm:$0xf]  ;;  %v230_v59 = vld [vmem:[%s887_s23 + $0x70] sm:$0xf]  ;;  %v244_v61 = vmax.bf16 %v844_v5, %v212_v52 }
  0x19   : > { %811 = vmatprep.mubr.msk.bf16.mxu1 %vm347_vm1, %v746_v43  ;;  %v740_v51 = vcombine.low %v242_v45, %v243_v46  ;;  %v231_v60 = vld [vmem:[%s887_s23 + $0x74] sm:$0xf]  ;;  %v245_v62 = vmax.bf16 %v844_v5, %v213_v53  ;;  %v260_v63 = vmax.bf16 %v844_v5, %v228_v54  ;;  %v261_v0 = vmax.bf16 %v844_v5, %v229_v56  ;;  %v216_v9 = vld [vmem:[%s887_s23 + $0x38] sm:$0xf]  ;;  %v217_v10 = vld [vmem:[%s887_s23 + $0x3c] sm:$0xf] }
  0x1a   : > { %v748_v55 = vcombine.low %v258_v47, %v259_v48  ;;  %v246_v1 = vmax.bf16 %v844_v5, %v214_v57  ;;  %v247_v2 = vmax.bf16 %v844_v5, %v215_v58  ;;  %v262_v3 = vmax.bf16 %v844_v5, %v230_v59  ;;  %v232_v12 = vld [vmem:[%s887_s23 + $0x78] sm:$0xf]  ;;  %v233_v13 = vld [vmem:[%s887_s23 + $0x7c] sm:$0xf]  ;;  %v972_v20 = vld [vmem:[%s1118_s2] ss:$0 sm:$0xff] }
  0x1b   : > { %v263_v4 = vmax.bf16 %v844_v5, %v231_v60  ;;  %v741_v6 = vcombine.low %v244_v61, %v245_v62  ;;  %v749_v7 = vcombine.low %v260_v63, %v261_v0  ;;  %v248_v14 = vmax.bf16 %v844_v5, %v216_v9  ;;  %v978_v22 = vld [vmem:[%s1119_s3] ss:$0 sm:$0xff] }
  0x1c   : > { %v742_v8 = vcombine.low %v246_v1, %v247_v2  ;;  %v249_v15 = vmax.bf16 %v844_v5, %v217_v10  ;;  %v264_v16 = vmax.bf16 %v844_v5, %v232_v12  ;;  %v265_v17 = vmax.bf16 %v844_v5, %v233_v13 }
  0x1d   : > { %v750_v11 = vcombine.low %v262_v3, %v263_v4 }
  0x1e   : > { %796 = vmatmul.mubr.msk.bf16.gmra.mrb[4].mxu0 %vm347_vm1, %v739_v49  ;;  %v743_v18 = vcombine.low %v248_v14, %v249_v15  ;;  %v751_v19 = vcombine.low %v264_v16, %v265_v17 }
  0x1f   : > { %812 = vmatmul.mubr.msk.bf16.gmra.mrb[4].mxu1 %vm347_vm1, %v747_v50  ;;  %799 = vmatprep.mubr.msk.bf16.mxu0 %vm347_vm1, %v740_v51 }
  0x20   : > { %815 = vmatprep.mubr.msk.bf16.mxu1 %vm347_vm1, %v748_v55 }
  0x26   : > { %800 = vmatmul.mubr.msk.bf16.gmra.mrb[8].mxu0 %vm347_vm1, %v741_v6 }
  0x27   : > { %816 = vmatmul.mubr.msk.bf16.gmra.mrb[8].mxu1 %vm347_vm1, %v749_v7  ;;  %803 = vmatprep.mubr.msk.bf16.mxu0 %vm347_vm1, %v742_v8 }
  0x28   : > { %819 = vmatprep.mubr.msk.bf16.mxu1 %vm347_vm1, %v750_v11 }
  0x2e   : > { %804 = vmatmul.mubr.msk.bf16.gmra.mrb[12].mxu0 %vm347_vm1, %v743_v18 }
  0x2f   : > { %820 = vmatmul.mubr.msk.bf16.gmra.mrb[12].mxu1 %vm347_vm1, %v751_v19 }
  0xe9   : > { %v793_v21 = vpop.f32.mrb[0].mxu0 }
  0xea   : > { %v570_v5 = vmul.f32 %v793_v21, %v972_v20  ;;  %v809_v23 = vpop.f32.mrb[0].mxu1  ;;  %v434_v24 = vpop.f32.mrb[1].mxu0 }
  0xeb   : > { %v586_v25 = vmul.f32 %v809_v23, %v972_v20  ;;  %v568_v26 = vmul.f32 %v972_v20, %v434_v24  ;;  %v498_v27 = vpop.f32.mrb[1].mxu1  ;;  %v794_v28 = vpop.f32.mrb[2].mxu0 }
  0xec   : > { %v609_v29 = vadd.f32 %v978_v22, %v570_v5  ;;  %v584_v30 = vmul.f32 %v972_v20, %v498_v27  ;;  %v571_v31 = vmul.f32 %v794_v28, %v972_v20  ;;  %v810_v32 = vpop.f32.mrb[2].mxu1  ;;  %v437_v33 = vpop.f32.mrb[3].mxu0 }
  0xed   : > { %v625_v34 = vadd.f32 %v978_v22, %v586_v25  ;;  %v607_v35 = vadd.f32 %v978_v22, %v568_v26  ;;  %v587_v36 = vmul.f32 %v810_v32, %v972_v20  ;;  %v569_v37 = vmul.f32 %v972_v20, %v437_v33  ;;  %v501_v38 = vpop.f32.mrb[3].mxu1 }
  0xee   : > { %641 = vst.msk [vmem:[%s984_s5 + $0x10] sm:$0xff] %vm347_vm1, %v609_v29  ;;  %v623_v39 = vadd.f32 %v978_v22, %v584_v30  ;;  %v610_v40 = vadd.f32 %v978_v22, %v571_v31  ;;  %v585_v41 = vmul.f32 %v972_v20, %v501_v38 }
  0xef   : > { %657 = vst.msk [vmem:[%s984_s5 + $0x90] sm:$0xff] %vm347_vm1, %v625_v34  ;;  %639 = vst.msk [vmem:[%s984_s5] sm:$0xff] %vm347_vm1, %v607_v35  ;;  %v626_v42 = vadd.f32 %v978_v22, %v587_v36  ;;  %v608_v43 = vadd.f32 %v978_v22, %v569_v37 }
  0xf0   : > { %655 = vst.msk [vmem:[%s984_s5 + $0x80] sm:$0xff] %vm347_vm1, %v623_v39  ;;  %642 = vst.msk [vmem:[%s984_s5 + $0x18] sm:$0xff] %vm347_vm1, %v610_v40  ;;  %v624_v44 = vadd.f32 %v978_v22, %v585_v41 }
  0xf1   : > { %658 = vst.msk [vmem:[%s984_s5 + $0x98] sm:$0xff] %vm347_vm1, %v626_v42  ;;  %640 = vst.msk [vmem:[%s984_s5 + $0x8] sm:$0xff] %vm347_vm1, %v608_v43  ;;  %v797_v45 = vpop.f32.mrb[4].mxu0 }
  0xf2   : > { %656 = vst.msk [vmem:[%s984_s5 + $0x88] sm:$0xff] %vm347_vm1, %v624_v44  ;;  %v574_v46 = vmul.f32 %v797_v45, %v972_v20  ;;  %v813_v47 = vpop.f32.mrb[4].mxu1  ;;  %v450_v48 = vpop.f32.mrb[5].mxu0 }
  0xf3   : > { %v590_v49 = vmul.f32 %v813_v47, %v972_v20  ;;  %v572_v50 = vmul.f32 %v972_v20, %v450_v48  ;;  %v514_v51 = vpop.f32.mrb[5].mxu1  ;;  %v798_v52 = vpop.f32.mrb[6].mxu0 }
  0xf4   : > { %v613_v53 = vadd.f32 %v978_v22, %v574_v46  ;;  %v588_v54 = vmul.f32 %v972_v20, %v514_v51  ;;  %v575_v55 = vmul.f32 %v798_v52, %v972_v20  ;;  %v814_v56 = vpop.f32.mrb[6].mxu1  ;;  %v453_v57 = vpop.f32.mrb[7].mxu0 }
  0xf5   : > { %v629_v58 = vadd.f32 %v978_v22, %v590_v49  ;;  %v611_v59 = vadd.f32 %v978_v22, %v572_v50  ;;  %v591_v60 = vmul.f32 %v814_v56, %v972_v20  ;;  %v573_v61 = vmul.f32 %v972_v20, %v453_v57  ;;  %v517_v62 = vpop.f32.mrb[7].mxu1 }
  0xf6   : > { %645 = vst.msk [vmem:[%s984_s5 + $0x30] sm:$0xff] %vm347_vm1, %v613_v53  ;;  %v627_v63 = vadd.f32 %v978_v22, %v588_v54  ;;  %v614_v0 = vadd.f32 %v978_v22, %v575_v55  ;;  %v589_v1 = vmul.f32 %v972_v20, %v517_v62 }
  0xf7   : > { %661 = vst.msk [vmem:[%s984_s5 + $0xb0] sm:$0xff] %vm347_vm1, %v629_v58  ;;  %643 = vst.msk [vmem:[%s984_s5 + $0x20] sm:$0xff] %vm347_vm1, %v611_v59  ;;  %v630_v2 = vadd.f32 %v978_v22, %v591_v60  ;;  %v612_v3 = vadd.f32 %v978_v22, %v573_v61 }
  0xf8   : > { %659 = vst.msk [vmem:[%s984_s5 + $0xa0] sm:$0xff] %vm347_vm1, %v627_v63  ;;  %646 = vst.msk [vmem:[%s984_s5 + $0x38] sm:$0xff] %vm347_vm1, %v614_v0  ;;  %v628_v4 = vadd.f32 %v978_v22, %v589_v1 }
  0xf9   : > { %662 = vst.msk [vmem:[%s984_s5 + $0xb8] sm:$0xff] %vm347_vm1, %v630_v2  ;;  %644 = vst.msk [vmem:[%s984_s5 + $0x28] sm:$0xff] %vm347_vm1, %v612_v3  ;;  %v801_v6 = vpop.f32.mrb[8].mxu0 }
  0xfa   : > { %660 = vst.msk [vmem:[%s984_s5 + $0xa8] sm:$0xff] %vm347_vm1, %v628_v4  ;;  %v578_v7 = vmul.f32 %v801_v6, %v972_v20  ;;  %v817_v8 = vpop.f32.mrb[8].mxu1  ;;  %v466_v9 = vpop.f32.mrb[9].mxu0 }
  0xfb   : > { %v594_v10 = vmul.f32 %v817_v8, %v972_v20  ;;  %v576_v11 = vmul.f32 %v972_v20, %v466_v9  ;;  %v530_v12 = vpop.f32.mrb[9].mxu1  ;;  %v802_v13 = vpop.f32.mrb[10].mxu0 }
  0xfc   : > { %v617_v14 = vadd.f32 %v978_v22, %v578_v7  ;;  %v592_v15 = vmul.f32 %v972_v20, %v530_v12  ;;  %v579_v16 = vmul.f32 %v802_v13, %v972_v20  ;;  %v818_v17 = vpop.f32.mrb[10].mxu1  ;;  %v469_v18 = vpop.f32.mrb[11].mxu0 }
  0xfd   : > { %v633_v19 = vadd.f32 %v978_v22, %v594_v10  ;;  %v615_v21 = vadd.f32 %v978_v22, %v576_v11  ;;  %v595_v5 = vmul.f32 %v818_v17, %v972_v20  ;;  %v577_v23 = vmul.f32 %v972_v20, %v469_v18  ;;  %v533_v24 = vpop.f32.mrb[11].mxu1 }
  0xfe   : > { %649 = vst.msk [vmem:[%s984_s5 + $0x50] sm:$0xff] %vm347_vm1, %v617_v14  ;;  %v631_v25 = vadd.f32 %v978_v22, %v592_v15  ;;  %v618_v26 = vadd.f32 %v978_v22, %v579_v16  ;;  %v593_v27 = vmul.f32 %v972_v20, %v533_v24 }
  0xff   : > { %665 = vst.msk [vmem:[%s984_s5 + $0xd0] sm:$0xff] %vm347_vm1, %v633_v19  ;;  %647 = vst.msk [vmem:[%s984_s5 + $0x40] sm:$0xff] %vm347_vm1, %v615_v21  ;;  %v634_v28 = vadd.f32 %v978_v22, %v595_v5  ;;  %v616_v29 = vadd.f32 %v978_v22, %v577_v23 }
 0x100   : > { %663 = vst.msk [vmem:[%s984_s5 + $0xc0] sm:$0xff] %vm347_vm1, %v631_v25  ;;  %650 = vst.msk [vmem:[%s984_s5 + $0x58] sm:$0xff] %vm347_vm1, %v618_v26  ;;  %v632_v30 = vadd.f32 %v978_v22, %v593_v27 }
 0x101   : > { %666 = vst.msk [vmem:[%s984_s5 + $0xd8] sm:$0xff] %vm347_vm1, %v634_v28  ;;  %648 = vst.msk [vmem:[%s984_s5 + $0x48] sm:$0xff] %vm347_vm1, %v616_v29  ;;  %v805_v31 = vpop.f32.mrb[12].mxu0 }
 0x102   : > { %664 = vst.msk [vmem:[%s984_s5 + $0xc8] sm:$0xff] %vm347_vm1, %v632_v30  ;;  %v582_v32 = vmul.f32 %v805_v31, %v972_v20  ;;  %v821_v33 = vpop.f32.mrb[12].mxu1  ;;  %v482_v34 = vpop.f32.mrb[13].mxu0 }
 0x103   : > { %v598_v35 = vmul.f32 %v821_v33, %v972_v20  ;;  %v580_v36 = vmul.f32 %v972_v20, %v482_v34  ;;  %v546_v37 = vpop.f32.mrb[13].mxu1  ;;  %v806_v38 = vpop.f32.mrb[14].mxu0 }
 0x104   : > { %v621_v39 = vadd.f32 %v978_v22, %v582_v32  ;;  %v596_v40 = vmul.f32 %v972_v20, %v546_v37  ;;  %v583_v41 = vmul.f32 %v806_v38, %v972_v20  ;;  %v822_v42 = vpop.f32.mrb[14].mxu1  ;;  %v485_v43 = vpop.f32.mrb[15].mxu0 }
 0x105   : > { %v637_v44 = vadd.f32 %v978_v22, %v598_v35  ;;  %v619_v45 = vadd.f32 %v978_v22, %v580_v36  ;;  %v599_v46 = vmul.f32 %v822_v42, %v972_v20  ;;  %v581_v47 = vmul.f32 %v972_v20, %v485_v43  ;;  %v549_v48 = vpop.f32.mrb[15].mxu1 }
 0x106   : > { %653 = vst.msk [vmem:[%s984_s5 + $0x70] sm:$0xff] %vm347_vm1, %v621_v39  ;;  %v635_v49 = vadd.f32 %v978_v22, %v596_v40  ;;  %v622_v50 = vadd.f32 %v978_v22, %v583_v41  ;;  %v597_v51 = vmul.f32 %v972_v20, %v549_v48 }
 0x107   : > { %669 = vst.msk [vmem:[%s984_s5 + $0xf0] sm:$0xff] %vm347_vm1, %v637_v44  ;;  %651 = vst.msk [vmem:[%s984_s5 + $0x60] sm:$0xff] %vm347_vm1, %v619_v45  ;;  %v638_v52 = vadd.f32 %v978_v22, %v599_v46  ;;  %v620_v53 = vadd.f32 %v978_v22, %v581_v47 }
 0x108   : > { %667 = vst.msk [vmem:[%s984_s5 + $0xe0] sm:$0xff] %vm347_vm1, %v635_v49  ;;  %654 = vst.msk [vmem:[%s984_s5 + $0x78] sm:$0xff] %vm347_vm1, %v622_v50  ;;  %v636_v54 = vadd.f32 %v978_v22, %v597_v51 }
 0x109   : > { %670 = vst.msk [vmem:[%s984_s5 + $0xf8] sm:$0xff] %vm347_vm1, %v638_v52  ;;  %652 = vst.msk [vmem:[%s984_s5 + $0x68] sm:$0xff] %vm347_vm1, %v620_v53 }
 0x10a   : > { %668 = vst.msk [vmem:[%s984_s5 + $0xe8] sm:$0xff] %vm347_vm1, %v636_v54 }
 0x10b PF: > { %s14_s15 = sadd.s32 1, %s842_s15  }
 0x10c   : > { %p11_p4 = scmp.ge.s32.totalorder %s14_s15, 4  }
 0x10e   :  { %13 = sbr.rel (!%p11_p4) target bundleno = 1 (0x1), region = 66 }

// kernel: forward.31
= control target key start
LH: loop header
LB: loop body
LE: loop exit
PB: predicated region body
PF: predicated region fallthrough
CT: control target
= control target key end

     0   :  { %s564_s15 = smov 0   ;;  %s618_s0 = inlined_call_operand.vmem [shape: bf16[128,72], index: 0, kind: input, shape index: {}]   ;;  %s619_s1 = inlined_call_operand.vmem [shape: bf16[72,16], index: 1, kind: input, shape index: {}]   ;;  %s620_s2 = inlined_call_operand.vmem [shape: f32[1,16], index: 2, kind: input, shape index: {}]   ;;  %s621_s3 = inlined_call_operand.vmem [shape: f32[1,16], index: 3, kind: input, shape index: {}]   ;;  %s622_s4 = inlined_call_operand.vmem [shape: f32[128,16], index: 4, kind: output, shape index: {}]  }
   0x1 LB: > { %s451_s16 = sadd.s32 4294967295, %s536_s15   ;;  %p455_p0 = scmp.ge.s32.totalorder %s536_s15, 1  ;;  %s536_s15 = sphi %s564_s15, %s14_s15  }
   0x2   : > { %p163_p1 = scmp.lt.s32.totalorder %s536_s15, 3 }
   0x4   : > { %p164_p2 = pnand %p455_p0, %p163_p1 }
   0x5   : > { %v525_v0 = vld [vmem:[%s619_s1] sm:$0xff] (!%p164_p2)   ;;  %v526_v1 = vld [vmem:[%s619_s1 + $0x8] sm:$0xff] (!%p164_p2)   ;;  %s456_s21 = sshll.u32 (!%p164_p2), %s451_s16, 3  ;;  %v527_v2 = vld [vmem:[%s619_s1 + $0x10] sm:$0xff] (!%p164_p2)   ;;  %v538_v7 = vmov (!%p164_p2), 0   ;;  %vm274_vm0 = vcmask (!%p164_p2), 588800  }
   0x6   : > { %167 = sbr.rel (%p164_p2) target bundleno = 246 (0xf6), region = 36  ;;  %486 = vmatprep.subr.bf16.mxu0 (!%p164_p2), %v525_v0  ;;  %504 = vmatprep.subr.bf16.mxu1 (!%p164_p2), %v525_v0  ;;  %p190_p3 = scmp.lt.s32.totalorder (!%p164_p2), %s456_s21, 15  ;;  %v528_v3 = vld [vmem:[%s619_s1 + $0x18] sm:$0xff] (!%p164_p2)   ;;  %v529_v18 = vld [vmem:[%s619_s1 + $0x20] ss:$0 sps:$4 sm:$0xff] (!%p164_p2)   ;;  %vm287_vm1 = vcmask (!%p164_p2), 1043456  }
   0x7   : > { %487 = vmatpush3.bf16.msra.mxu0 (!%p164_p2), %v525_v0  ;;  %509 = vmatpush3.bf16.msra.mxu1 (!%p164_p2), %v525_v0  ;;  %v289_v24 = vsel (!%p164_p2), %vm287_vm1, %v529_v18, 0  ;;  %v473_v27 = vld [vmem:[%s620_s2] ss:$0 sm:$0xff] (!%p164_p2)  ;;  %vm386_vm2 = vcmask (!%p164_p2), 130048  }
   0x8   : > { %488 = vmatprep.subr.bf16.mxu0 (!%p164_p2), %v526_v1  ;;  %505 = vmatprep.subr.bf16.mxu1 (!%p164_p2), %v526_v1  ;;  %v474_v29 = vld [vmem:[%s621_s3] ss:$0 sm:$0xff] (!%p164_p2) }
   0xb   : > { %489 = vmatpush3.bf16.msra.mxu0 (!%p164_p2), %v526_v1  ;;  %510 = vmatpush3.bf16.msra.mxu1 (!%p164_p2), %v526_v1 }
   0xc   : > { %490 = vmatprep.subr.bf16.mxu0 (!%p164_p2), %v527_v2  ;;  %506 = vmatprep.subr.bf16.mxu1 (!%p164_p2), %v527_v2 }
   0xd   : > { %s624_s21 = smov (!%p190_p3, %s456_s21), 15 }
   0xe   : > { %s457_s24 = sshll.u32 %s624_s21, 2  ;;  %s459_s8 = sshll.u32 %s624_s21, 3 }
   0xf   : > { %s193_s29 = scalar_lea.vmem %s618_s0, %s457_s24  ;;  %491 = vmatpush3.bf16.msra.mxu0 %v527_v2  ;;  %511 = vmatpush3.bf16.msra.mxu1 %v527_v2  ;;  %s199_s13 = scalar_lea.vmem %s622_s4, %s459_s8 }
  0x10   : > { %v202_v4 = vld [vmem:[%s193_s29] sm:$0xf]  ;;  %v203_v5 = vld [vmem:[%s193_s29 + $0x4] sm:$0xf]  ;;  %v206_v6 = vld [vmem:[%s193_s29 + $0x10] sm:$0xf]  ;;  %492 = vmatprep.subr.bf16.mxu0 %v528_v3  ;;  %507 = vmatprep.subr.bf16.mxu1 %v528_v3 }
  0x11   : > { %v210_v8 = vmax.bf16 %v538_v7, %v202_v4  ;;  %v211_v9 = vmax.bf16 %v538_v7, %v203_v5  ;;  %v207_v10 = vld [vmem:[%s193_s29 + $0x14] sm:$0xf]  ;;  %v214_v11 = vmax.bf16 %v538_v7, %v206_v6  ;;  %v204_v13 = vld [vmem:[%s193_s29 + $0x8] sm:$0xf]  ;;  %v205_v15 = vld [vmem:[%s193_s29 + $0xc] sm:$0xf] }
  0x12   : > { %v215_v12 = vmax.bf16 %v538_v7, %v207_v10  ;;  %v208_v16 = vld [vmem:[%s193_s29 + $0x18] sm:$0xf]  ;;  %v209_v17 = vld [vmem:[%s193_s29 + $0x1c] sm:$0xf]  ;;  %v212_v20 = vmax.bf16 %v538_v7, %v204_v13  ;;  %v213_v21 = vmax.bf16 %v538_v7, %v205_v15 }
  0x13   : > { %v460_v14 = vcombine.low %v210_v8, %v211_v9  ;;  %v216_v22 = vmax.bf16 %v538_v7, %v208_v16  ;;  %v217_v23 = vmax.bf16 %v538_v7, %v209_v17  ;;  %493 = vmatpush3.bf16.msra.mxu0 %v528_v3  ;;  %512 = vmatpush3.bf16.msra.mxu1 %v528_v3 }
  0x14   : > { %v462_v19 = vcombine.low %v214_v11, %v215_v12  ;;  %514 = vmatprep.subr.msk.bf16.mxu0 %vm287_vm1, %v529_v18  ;;  %515 = vmatprep.subr.msk.bf16.mxu1 %vm287_vm1, %v529_v18  ;;  %v461_v25 = vcombine.low %v212_v20, %v213_v21 }
  0x15   : > { %496 = vmatprep.mubr.msk.bf16.mxu0 %vm274_vm0, %v460_v14  ;;  %v463_v26 = vcombine.low %v216_v22, %v217_v23 }
  0x16   : > { %500 = vmatprep.mubr.msk.bf16.mxu1 %vm274_vm0, %v462_v19 }
  0x17   : > { %495 = vmatpush3.bf16.msra.mxu0 %v289_v24  ;;  %513 = vmatpush3.bf16.msra.mxu1 %v289_v24 }
  0x1a   : > { %497 = vmatmul.mubr.msk.bf16.vlgmr.msra.gmra.mrb[0].mxu0 %vm274_vm0, %v461_v25  ;;  %501 = vmatmul.mubr.msk.bf16.vlgmr.msra.gmra.mrb[0].mxu1 %vm274_vm0, %v463_v26 }
  0xed   : > { %v498_v28 = vpop.f32.mrb[0].mxu0  ;;  %v502_v30 = vpop.f32.mrb[0].mxu1 }
  0xee   : > { %v365_v31 = vmul.f32 %v498_v28, %v473_v27  ;;  %v369_v32 = vmul.f32 %v502_v30, %v473_v27  ;;  %v325_v33 = vpop.f32.mrb[1].mxu0  ;;  %v341_v34 = vpop.f32.mrb[1].mxu1 }
  0xef   : > { %v363_v35 = vmul.f32 %v473_v27, %v325_v33  ;;  %v367_v36 = vmul.f32 %v473_v27, %v341_v34  ;;  %v499_v37 = vpop.f32.mrb[2].mxu0  ;;  %v503_v38 = vpop.f32.mrb[2].mxu1 }
  0xf0   : > { %v380_v39 = vadd.f32 %v474_v29, %v365_v31  ;;  %v384_v40 = vadd.f32 %v474_v29, %v369_v32  ;;  %v366_v41 = vmul.f32 %v499_v37, %v473_v27  ;;  %v370_v42 = vmul.f32 %v503_v38, %v473_v27  ;;  %v328_v43 = vpop.f32.mrb[3].mxu0  ;;  %v344_v44 = vpop.f32.mrb[3].mxu1 }
  0xf1   : > { %v378_v45 = vadd.f32 %v474_v29, %v363_v35  ;;  %v382_v46 = vadd.f32 %v474_v29, %v367_v36  ;;  %v364_v47 = vmul.f32 %v473_v27, %v328_v43  ;;  %v368_v48 = vmul.f32 %v473_v27, %v344_v44 }
  0xf2   : > { %389 = vst.msk [vmem:[%s199_s13 + $0x10] sm:$0xff] %vm386_vm2, %v380_v39  ;;  %393 = vst.msk [vmem:[%s199_s13 + $0x30] sm:$0xff] %vm386_vm2, %v384_v40  ;;  %v381_v49 = vadd.f32 %v474_v29, %v366_v41  ;;  %v385_v50 = vadd.f32 %v474_v29, %v370_v42 }
  0xf3   : > { %387 = vst.msk [vmem:[%s199_s13] sm:$0xff] %vm386_vm2, %v378_v45  ;;  %391 = vst.msk [vmem:[%s199_s13 + $0x20] sm:$0xff] %vm386_vm2, %v382_v46  ;;  %v379_v51 = vadd.f32 %v474_v29, %v364_v47  ;;  %v383_v52 = vadd.f32 %v474_v29, %v368_v48 }
  0xf4   : > { %390 = vst.msk [vmem:[%s199_s13 + $0x18] sm:$0xff] %vm386_vm2, %v381_v49  ;;  %394 = vst.msk [vmem:[%s199_s13 + $0x38] sm:$0xff] %vm386_vm2, %v385_v50 }
  0xf5   : > { %388 = vst.msk [vmem:[%s199_s13 + $0x8] sm:$0xff] %vm386_vm2, %v379_v51  ;;  %392 = vst.msk [vmem:[%s199_s13 + $0x28] sm:$0xff] %vm386_vm2, %v383_v52 }
  0xf6 PF: > { %s14_s15 = sadd.s32 1, %s536_s15  }
  0xf7   : > { %p11_p4 = scmp.ge.s32.totalorder %s14_s15, 4  }
  0xf9   :  { %13 = sbr.rel (!%p11_p4) target bundleno = 1 (0x1), region = 66 }

// kernel: forward.27
= control target key start
LH: loop header
LB: loop body
LE: loop exit
PB: predicated region body
PF: predicated region fallthrough
CT: control target
= control target key end

     0   :  { %s879_s15 = smov 0   ;;  %s1125_s0 = inlined_call_operand.vmem [shape: bf16[512,12], index: 0, kind: input, shape index: {}]   ;;  %s1126_s1 = inlined_call_operand.vmem [shape: bf16[12,8], index: 1, kind: input, shape index: {}]   ;;  %s1127_s2 = inlined_call_operand.vmem [shape: f32[1,8], index: 2, kind: input, shape index: {}]   ;;  %s1128_s3 = inlined_call_operand.vmem [shape: f32[1,8], index: 3, kind: input, shape index: {}]   ;;  %s1129_s4 = inlined_call_operand.vmem [shape: f32[512,8], index: 4, kind: output, shape index: {}]  }
   0x1 LB: > { %s734_s16 = sadd.s32 4294967295, %s851_s15   ;;  %p738_p0 = scmp.ge.s32.totalorder %s851_s15, 1  ;;  %s851_s15 = sphi %s879_s15, %s14_s15  }
   0x2   : > { %p163_p1 = scmp.lt.s32.totalorder %s851_s15, 3 }
   0x4   : > { %p164_p2 = pnand %p738_p0, %p163_p1 }
   0x5   : > { %v844_v0 = vld [vmem:[%s1126_s1] sm:$0x3f] (!%p164_p2)   ;;  %vm402_vm0 = vcmask (!%p164_p2), 1045504   ;;  %s739_s19 = sshll.u32 (!%p164_p2), %s734_s16, 5  ;;  %vm353_vm1 = vcmask (!%p164_p2), 97280   ;;  %v853_v5 = vmov (!%p164_p2), 0  }
   0x6   : > { %167 = sbr.rel (%p164_p2) target bundleno = 267 (0x10b), region = 36  ;;  %833 = vmatprep.subr.msk.bf16.mxu0 (!%p164_p2), %vm402_vm0, %v844_v0  ;;  %834 = vmatprep.subr.msk.bf16.mxu1 (!%p164_p2), %vm402_vm0, %v844_v0  ;;  %v404_v1 = vsel (!%p164_p2), %vm402_vm0, %v844_v0, 0  ;;  %p190_p3 = scmp.lt.s32.totalorder (!%p164_p2), %s739_s19, 63  ;;  %vm645_vm2 = vcmask (!%p164_p2), 64512  }
   0x7   : > { %798 = vmatpush3.bf16.msra.mxu0 (!%p164_p2), %v404_v1  ;;  %832 = vmatpush3.bf16.msra.mxu1 (!%p164_p2), %v404_v1 }
   0xd   : > { %s1131_s19 = smov (!%p190_p3, %s739_s19), 63 }
   0xe   : > { %s740_s20 = sshll.u32 %s1131_s19, 2  ;;  %s742_s26 = sshll.u32 %s1131_s19, 3 }
   0xf   : > { %s896_s23 = scalar_lea.vmem %s1125_s0, %s740_s20  ;;  %s993_s5 = scalar_lea.vmem %s1129_s4, %s742_s26 }
  0x10   : > { %v202_v2 = vld [vmem:[%s896_s23] sm:$0xf]  ;;  %v203_v3 = vld [vmem:[%s896_s23 + $0x4] sm:$0xf]  ;;  %v204_v10 = vld [vmem:[%s896_s23 + $0x8] sm:$0xf] }
  0x11   : > { %v218_v4 = vld [vmem:[%s896_s23 + $0x40] sm:$0xf]  ;;  %v234_v6 = vmax.bf16 %v853_v5, %v202_v2  ;;  %v235_v7 = vmax.bf16 %v853_v5, %v203_v3  ;;  %v219_v8 = vld [vmem:[%s896_s23 + $0x44] sm:$0xf]  ;;  %v205_v11 = vld [vmem:[%s896_s23 + $0xc] sm:$0xf]  ;;  %v236_v13 = vmax.bf16 %v853_v5, %v204_v10 }
  0x12   : > { %v250_v9 = vmax.bf16 %v853_v5, %v218_v4  ;;  %v251_v12 = vmax.bf16 %v853_v5, %v219_v8  ;;  %v237_v14 = vmax.bf16 %v853_v5, %v205_v11  ;;  %v220_v15 = vld [vmem:[%s896_s23 + $0x48] sm:$0xf]  ;;  %v221_v16 = vld [vmem:[%s896_s23 + $0x4c] sm:$0xf]  ;;  %v206_v17 = vld [vmem:[%s896_s23 + $0x10] sm:$0xf] }
  0x13   : > { %v743_v18 = vcombine.low %v234_v6, %v235_v7  ;;  %v252_v19 = vmax.bf16 %v853_v5, %v220_v15  ;;  %v253_v20 = vmax.bf16 %v853_v5, %v221_v16  ;;  %v207_v21 = vld [vmem:[%s896_s23 + $0x14] sm:$0xf]  ;;  %v238_v22 = vmax.bf16 %v853_v5, %v206_v17  ;;  %v222_v23 = vld [vmem:[%s896_s23 + $0x50] sm:$0xf]  ;;  %v208_v29 = vld [vmem:[%s896_s23 + $0x18] sm:$0xf] }
  0x14   : > { %v223_v24 = vld [vmem:[%s896_s23 + $0x54] sm:$0xf]  ;;  %v751_v25 = vcombine.low %v250_v9, %v251_v12  ;;  %v744_v26 = vcombine.low %v236_v13, %v237_v14  ;;  %v239_v27 = vmax.bf16 %v853_v5, %v207_v21  ;;  %v254_v28 = vmax.bf16 %v853_v5, %v222_v23  ;;  %v209_v30 = vld [vmem:[%s896_s23 + $0x1c] sm:$0xf]  ;;  %v224_v31 = vld [vmem:[%s896_s23 + $0x58] sm:$0xf] }
  0x15   : > { %799 = vmatprep.mubr.msk.bf16.mxu0 %vm353_vm1, %v743_v18  ;;  %v752_v32 = vcombine.low %v252_v19, %v253_v20  ;;  %v255_v33 = vmax.bf16 %v853_v5, %v223_v24  ;;  %v240_v34 = vmax.bf16 %v853_v5, %v208_v29  ;;  %v225_v35 = vld [vmem:[%s896_s23 + $0x5c] sm:$0xf]  ;;  %v210_v36 = vld [vmem:[%s896_s23 + $0x20] sm:$0xf]  ;;  %v211_v37 = vld [vmem:[%s896_s23 + $0x24] sm:$0xf]  ;;  %v241_v39 = vmax.bf16 %v853_v5, %v209_v30 }
  0x16   : > { %815 = vmatprep.mubr.msk.bf16.mxu1 %vm353_vm1, %v751_v25  ;;  %800 = vmatmul.mubr.msk.bf16.vlgmr.msra.gmra.mrb[0].mxu0 %vm353_vm1, %v744_v26  ;;  %v745_v38 = vcombine.low %v238_v22, %v239_v27  ;;  %v256_v40 = vmax.bf16 %v853_v5, %v224_v31  ;;  %v226_v41 = vld [vmem:[%s896_s23 + $0x60] sm:$0xf]  ;;  %v227_v42 = vld [vmem:[%s896_s23 + $0x64] sm:$0xf]  ;;  %v257_v44 = vmax.bf16 %v853_v5, %v225_v35  ;;  %v212_v52 = vld [vmem:[%s896_s23 + $0x28] sm:$0xf] }
  0x17   : > { %816 = vmatmul.mubr.msk.bf16.vlgmr.msra.gmra.mrb[0].mxu1 %vm353_vm1, %v752_v32  ;;  %v753_v43 = vcombine.low %v254_v28, %v255_v33  ;;  %v242_v45 = vmax.bf16 %v853_v5, %v210_v36  ;;  %v243_v46 = vmax.bf16 %v853_v5, %v211_v37  ;;  %v258_v47 = vmax.bf16 %v853_v5, %v226_v41  ;;  %v213_v53 = vld [vmem:[%s896_s23 + $0x2c] sm:$0xf]  ;;  %v228_v54 = vld [vmem:[%s896_s23 + $0x68] sm:$0xf]  ;;  %v214_v57 = vld [vmem:[%s896_s23 + $0x30] sm:$0xf] }
  0x18   : > { %803 = vmatprep.mubr.msk.bf16.mxu0 %vm353_vm1, %v745_v38  ;;  %v259_v48 = vmax.bf16 %v853_v5, %v227_v42  ;;  %v746_v49 = vcombine.low %v240_v34, %v241_v39  ;;  %v754_v50 = vcombine.low %v256_v40, %v257_v44  ;;  %v229_v56 = vld [vmem:[%s896_s23 + $0x6c] sm:$0xf]  ;;  %v215_v58 = vld [vmem:[%s896_s23 + $0x34] sm:$0xf]  ;;  %v230_v59 = vld [vmem:[%s896_s23 + $0x70] sm:$0xf]  ;;  %v244_v61 = vmax.bf16 %v853_v5, %v212_v52 }
  0x19   : > { %819 = vmatprep.mubr.msk.bf16.mxu1 %vm353_vm1, %v753_v43  ;;  %v747_v51 = vcombine.low %v242_v45, %v243_v46  ;;  %v231_v60 = vld [vmem:[%s896_s23 + $0x74] sm:$0xf]  ;;  %v245_v62 = vmax.bf16 %v853_v5, %v213_v53  ;;  %v260_v63 = vmax.bf16 %v853_v5, %v228_v54  ;;  %v261_v0 = vmax.bf16 %v853_v5, %v229_v56  ;;  %v216_v9 = vld [vmem:[%s896_s23 + $0x38] sm:$0xf]  ;;  %v217_v10 = vld [vmem:[%s896_s23 + $0x3c] sm:$0xf] }
  0x1a   : > { %v755_v55 = vcombine.low %v258_v47, %v259_v48  ;;  %v246_v1 = vmax.bf16 %v853_v5, %v214_v57  ;;  %v247_v2 = vmax.bf16 %v853_v5, %v215_v58  ;;  %v262_v3 = vmax.bf16 %v853_v5, %v230_v59  ;;  %v232_v12 = vld [vmem:[%s896_s23 + $0x78] sm:$0xf]  ;;  %v233_v13 = vld [vmem:[%s896_s23 + $0x7c] sm:$0xf]  ;;  %v981_v20 = vld [vmem:[%s1127_s2] ss:$0 sm:$0xff] }
  0x1b   : > { %v263_v4 = vmax.bf16 %v853_v5, %v231_v60  ;;  %v748_v6 = vcombine.low %v244_v61, %v245_v62  ;;  %v756_v7 = vcombine.low %v260_v63, %v261_v0  ;;  %v248_v14 = vmax.bf16 %v853_v5, %v216_v9  ;;  %v987_v22 = vld [vmem:[%s1128_s3] ss:$0 sm:$0xff] }
  0x1c   : > { %v749_v8 = vcombine.low %v246_v1, %v247_v2  ;;  %v249_v15 = vmax.bf16 %v853_v5, %v217_v10  ;;  %v264_v16 = vmax.bf16 %v853_v5, %v232_v12  ;;  %v265_v17 = vmax.bf16 %v853_v5, %v233_v13 }
  0x1d   : > { %v757_v11 = vcombine.low %v262_v3, %v263_v4 }
  0x1e   : > { %804 = vmatmul.mubr.msk.bf16.gmra.mrb[4].mxu0 %vm353_vm1, %v746_v49  ;;  %v750_v18 = vcombine.low %v248_v14, %v249_v15  ;;  %v758_v19 = vcombine.low %v264_v16, %v265_v17 }
  0x1f   : > { %820 = vmatmul.mubr.msk.bf16.gmra.mrb[4].mxu1 %vm353_vm1, %v754_v50  ;;  %807 = vmatprep.mubr.msk.bf16.mxu0 %vm353_vm1, %v747_v51 }
  0x20   : > { %823 = vmatprep.mubr.msk.bf16.mxu1 %vm353_vm1, %v755_v55 }
  0x26   : > { %808 = vmatmul.mubr.msk.bf16.gmra.mrb[8].mxu0 %vm353_vm1, %v748_v6 }
  0x27   : > { %824 = vmatmul.mubr.msk.bf16.gmra.mrb[8].mxu1 %vm353_vm1, %v756_v7  ;;  %811 = vmatprep.mubr.msk.bf16.mxu0 %vm353_vm1, %v749_v8 }
  0x28   : > { %827 = vmatprep.mubr.msk.bf16.mxu1 %vm353_vm1, %v757_v11 }
  0x2e   : > { %812 = vmatmul.mubr.msk.bf16.gmra.mrb[12].mxu0 %vm353_vm1, %v750_v18 }
  0x2f   : > { %828 = vmatmul.mubr.msk.bf16.gmra.mrb[12].mxu1 %vm353_vm1, %v758_v19 }
  0xe9   : > { %v801_v21 = vpop.f32.mrb[0].mxu0 }
  0xea   : > { %v576_v5 = vmul.f32 %v801_v21, %v981_v20  ;;  %v817_v23 = vpop.f32.mrb[0].mxu1  ;;  %v440_v24 = vpop.f32.mrb[1].mxu0 }
  0xeb   : > { %v592_v25 = vmul.f32 %v817_v23, %v981_v20  ;;  %v574_v26 = vmul.f32 %v981_v20, %v440_v24  ;;  %v504_v27 = vpop.f32.mrb[1].mxu1  ;;  %v802_v28 = vpop.f32.mrb[2].mxu0 }
  0xec   : > { %v615_v29 = vadd.f32 %v987_v22, %v576_v5  ;;  %v590_v30 = vmul.f32 %v981_v20, %v504_v27  ;;  %v577_v31 = vmul.f32 %v802_v28, %v981_v20  ;;  %v818_v32 = vpop.f32.mrb[2].mxu1  ;;  %v443_v33 = vpop.f32.mrb[3].mxu0 }
  0xed   : > { %v631_v34 = vadd.f32 %v987_v22, %v592_v25  ;;  %v613_v35 = vadd.f32 %v987_v22, %v574_v26  ;;  %v593_v36 = vmul.f32 %v818_v32, %v981_v20  ;;  %v575_v37 = vmul.f32 %v981_v20, %v443_v33  ;;  %v507_v38 = vpop.f32.mrb[3].mxu1 }
  0xee   : > { %648 = vst.msk [vmem:[%s993_s5 + $0x10] sm:$0xff] %vm645_vm2, %v615_v29  ;;  %v629_v39 = vadd.f32 %v987_v22, %v590_v30  ;;  %v616_v40 = vadd.f32 %v987_v22, %v577_v31  ;;  %v591_v41 = vmul.f32 %v981_v20, %v507_v38 }
  0xef   : > { %664 = vst.msk [vmem:[%s993_s5 + $0x90] sm:$0xff] %vm645_vm2, %v631_v34  ;;  %646 = vst.msk [vmem:[%s993_s5] sm:$0xff] %vm645_vm2, %v613_v35  ;;  %v632_v42 = vadd.f32 %v987_v22, %v593_v36  ;;  %v614_v43 = vadd.f32 %v987_v22, %v575_v37 }
  0xf0   : > { %662 = vst.msk [vmem:[%s993_s5 + $0x80] sm:$0xff] %vm645_vm2, %v629_v39  ;;  %649 = vst.msk [vmem:[%s993_s5 + $0x18] sm:$0xff] %vm645_vm2, %v616_v40  ;;  %v630_v44 = vadd.f32 %v987_v22, %v591_v41 }
  0xf1   : > { %665 = vst.msk [vmem:[%s993_s5 + $0x98] sm:$0xff] %vm645_vm2, %v632_v42  ;;  %647 = vst.msk [vmem:[%s993_s5 + $0x8] sm:$0xff] %vm645_vm2, %v614_v43  ;;  %v805_v45 = vpop.f32.mrb[4].mxu0 }
  0xf2   : > { %663 = vst.msk [vmem:[%s993_s5 + $0x88] sm:$0xff] %vm645_vm2, %v630_v44  ;;  %v580_v46 = vmul.f32 %v805_v45, %v981_v20  ;;  %v821_v47 = vpop.f32.mrb[4].mxu1  ;;  %v456_v48 = vpop.f32.mrb[5].mxu0 }
  0xf3   : > { %v596_v49 = vmul.f32 %v821_v47, %v981_v20  ;;  %v578_v50 = vmul.f32 %v981_v20, %v456_v48  ;;  %v520_v51 = vpop.f32.mrb[5].mxu1  ;;  %v806_v52 = vpop.f32.mrb[6].mxu0 }
  0xf4   : > { %v619_v53 = vadd.f32 %v987_v22, %v580_v46  ;;  %v594_v54 = vmul.f32 %v981_v20, %v520_v51  ;;  %v581_v55 = vmul.f32 %v806_v52, %v981_v20  ;;  %v822_v56 = vpop.f32.mrb[6].mxu1  ;;  %v459_v57 = vpop.f32.mrb[7].mxu0 }
  0xf5   : > { %v635_v58 = vadd.f32 %v987_v22, %v596_v49  ;;  %v617_v59 = vadd.f32 %v987_v22, %v578_v50  ;;  %v597_v60 = vmul.f32 %v822_v56, %v981_v20  ;;  %v579_v61 = vmul.f32 %v981_v20, %v459_v57  ;;  %v523_v62 = vpop.f32.mrb[7].mxu1 }
  0xf6   : > { %652 = vst.msk [vmem:[%s993_s5 + $0x30] sm:$0xff] %vm645_vm2, %v619_v53  ;;  %v633_v63 = vadd.f32 %v987_v22, %v594_v54  ;;  %v620_v0 = vadd.f32 %v987_v22, %v581_v55  ;;  %v595_v1 = vmul.f32 %v981_v20, %v523_v62 }
  0xf7   : > { %668 = vst.msk [vmem:[%s993_s5 + $0xb0] sm:$0xff] %vm645_vm2, %v635_v58  ;;  %650 = vst.msk [vmem:[%s993_s5 + $0x20] sm:$0xff] %vm645_vm2, %v617_v59  ;;  %v636_v2 = vadd.f32 %v987_v22, %v597_v60  ;;  %v618_v3 = vadd.f32 %v987_v22, %v579_v61 }
  0xf8   : > { %666 = vst.msk [vmem:[%s993_s5 + $0xa0] sm:$0xff] %vm645_vm2, %v633_v63  ;;  %653 = vst.msk [vmem:[%s993_s5 + $0x38] sm:$0xff] %vm645_vm2, %v620_v0  ;;  %v634_v4 = vadd.f32 %v987_v22, %v595_v1 }
  0xf9   : > { %669 = vst.msk [vmem:[%s993_s5 + $0xb8] sm:$0xff] %vm645_vm2, %v636_v2  ;;  %651 = vst.msk [vmem:[%s993_s5 + $0x28] sm:$0xff] %vm645_vm2, %v618_v3  ;;  %v809_v6 = vpop.f32.mrb[8].mxu0 }
  0xfa   : > { %667 = vst.msk [vmem:[%s993_s5 + $0xa8] sm:$0xff] %vm645_vm2, %v634_v4  ;;  %v584_v7 = vmul.f32 %v809_v6, %v981_v20  ;;  %v825_v8 = vpop.f32.mrb[8].mxu1  ;;  %v472_v9 = vpop.f32.mrb[9].mxu0 }
  0xfb   : > { %v600_v10 = vmul.f32 %v825_v8, %v981_v20  ;;  %v582_v11 = vmul.f32 %v981_v20, %v472_v9  ;;  %v536_v12 = vpop.f32.mrb[9].mxu1  ;;  %v810_v13 = vpop.f32.mrb[10].mxu0 }
  0xfc   : > { %v623_v14 = vadd.f32 %v987_v22, %v584_v7  ;;  %v598_v15 = vmul.f32 %v981_v20, %v536_v12  ;;  %v585_v16 = vmul.f32 %v810_v13, %v981_v20  ;;  %v826_v17 = vpop.f32.mrb[10].mxu1  ;;  %v475_v18 = vpop.f32.mrb[11].mxu0 }
  0xfd   : > { %v639_v19 = vadd.f32 %v987_v22, %v600_v10  ;;  %v621_v21 = vadd.f32 %v987_v22, %v582_v11  ;;  %v601_v5 = vmul.f32 %v826_v17, %v981_v20  ;;  %v583_v23 = vmul.f32 %v981_v20, %v475_v18  ;;  %v539_v24 = vpop.f32.mrb[11].mxu1 }
  0xfe   : > { %656 = vst.msk [vmem:[%s993_s5 + $0x50] sm:$0xff] %vm645_vm2, %v623_v14  ;;  %v637_v25 = vadd.f32 %v987_v22, %v598_v15  ;;  %v624_v26 = vadd.f32 %v987_v22, %v585_v16  ;;  %v599_v27 = vmul.f32 %v981_v20, %v539_v24 }
  0xff   : > { %672 = vst.msk [vmem:[%s993_s5 + $0xd0] sm:$0xff] %vm645_vm2, %v639_v19  ;;  %654 = vst.msk [vmem:[%s993_s5 + $0x40] sm:$0xff] %vm645_vm2, %v621_v21  ;;  %v640_v28 = vadd.f32 %v987_v22, %v601_v5  ;;  %v622_v29 = vadd.f32 %v987_v22, %v583_v23 }
 0x100   : > { %670 = vst.msk [vmem:[%s993_s5 + $0xc0] sm:$0xff] %vm645_vm2, %v637_v25  ;;  %657 = vst.msk [vmem:[%s993_s5 + $0x58] sm:$0xff] %vm645_vm2, %v624_v26  ;;  %v638_v30 = vadd.f32 %v987_v22, %v599_v27 }
 0x101   : > { %673 = vst.msk [vmem:[%s993_s5 + $0xd8] sm:$0xff] %vm645_vm2, %v640_v28  ;;  %655 = vst.msk [vmem:[%s993_s5 + $0x48] sm:$0xff] %vm645_vm2, %v622_v29  ;;  %v813_v31 = vpop.f32.mrb[12].mxu0 }
 0x102   : > { %671 = vst.msk [vmem:[%s993_s5 + $0xc8] sm:$0xff] %vm645_vm2, %v638_v30  ;;  %v588_v32 = vmul.f32 %v813_v31, %v981_v20  ;;  %v829_v33 = vpop.f32.mrb[12].mxu1  ;;  %v488_v34 = vpop.f32.mrb[13].mxu0 }
 0x103   : > { %v604_v35 = vmul.f32 %v829_v33, %v981_v20  ;;  %v586_v36 = vmul.f32 %v981_v20, %v488_v34  ;;  %v552_v37 = vpop.f32.mrb[13].mxu1  ;;  %v814_v38 = vpop.f32.mrb[14].mxu0 }
 0x104   : > { %v627_v39 = vadd.f32 %v987_v22, %v588_v32  ;;  %v602_v40 = vmul.f32 %v981_v20, %v552_v37  ;;  %v589_v41 = vmul.f32 %v814_v38, %v981_v20  ;;  %v830_v42 = vpop.f32.mrb[14].mxu1  ;;  %v491_v43 = vpop.f32.mrb[15].mxu0 }
 0x105   : > { %v643_v44 = vadd.f32 %v987_v22, %v604_v35  ;;  %v625_v45 = vadd.f32 %v987_v22, %v586_v36  ;;  %v605_v46 = vmul.f32 %v830_v42, %v981_v20  ;;  %v587_v47 = vmul.f32 %v981_v20, %v491_v43  ;;  %v555_v48 = vpop.f32.mrb[15].mxu1 }
 0x106   : > { %660 = vst.msk [vmem:[%s993_s5 + $0x70] sm:$0xff] %vm645_vm2, %v627_v39  ;;  %v641_v49 = vadd.f32 %v987_v22, %v602_v40  ;;  %v628_v50 = vadd.f32 %v987_v22, %v589_v41  ;;  %v603_v51 = vmul.f32 %v981_v20, %v555_v48 }
 0x107   : > { %676 = vst.msk [vmem:[%s993_s5 + $0xf0] sm:$0xff] %vm645_vm2, %v643_v44  ;;  %658 = vst.msk [vmem:[%s993_s5 + $0x60] sm:$0xff] %vm645_vm2, %v625_v45  ;;  %v644_v52 = vadd.f32 %v987_v22, %v605_v46  ;;  %v626_v53 = vadd.f32 %v987_v22, %v587_v47 }
 0x108   : > { %674 = vst.msk [vmem:[%s993_s5 + $0xe0] sm:$0xff] %vm645_vm2, %v641_v49  ;;  %661 = vst.msk [vmem:[%s993_s5 + $0x78] sm:$0xff] %vm645_vm2, %v628_v50  ;;  %v642_v54 = vadd.f32 %v987_v22, %v603_v51 }
 0x109   : > { %677 = vst.msk [vmem:[%s993_s5 + $0xf8] sm:$0xff] %vm645_vm2, %v644_v52  ;;  %659 = vst.msk [vmem:[%s993_s5 + $0x68] sm:$0xff] %vm645_vm2, %v626_v53 }
 0x10a   : > { %675 = vst.msk [vmem:[%s993_s5 + $0xe8] sm:$0xff] %vm645_vm2, %v642_v54 }
 0x10b PF: > { %s14_s15 = sadd.s32 1, %s851_s15  }
 0x10c   : > { %p11_p4 = scmp.ge.s32.totalorder %s14_s15, 4  }
 0x10e   :  { %13 = sbr.rel (!%p11_p4) target bundleno = 1 (0x1), region = 66 }

// kernel: forward.33
= control target key start
LH: loop header
LB: loop body
LE: loop exit
PB: predicated region body
PF: predicated region fallthrough
CT: control target
= control target key end

     0   :  { %s951_s15 = smov 0   ;;  %s1035_s0 = inlined_call_operand.vmem [shape: bf16[160,24], index: 0, kind: input, shape index: {}]   ;;  %s1036_s1 = inlined_call_operand.vmem [shape: bf16[3,24,8], index: 1, kind: input, shape index: {}]   ;;  %s1037_s2 = inlined_call_operand.vmem [shape: f32[1,8], index: 2, kind: input, shape index: {}]   ;;  %s1038_s3 = inlined_call_operand.vmem [shape: f32[1,8], index: 3, kind: input, shape index: {}]   ;;  %s1039_s4 = inlined_call_operand.vmem [shape: f32[128,8], index: 4, kind: output, shape index: {}]  }
   0x1 LB: > { %s700_s16 = sadd.s32 4294967295, %s924_s15   ;;  %p704_p0 = scmp.ge.s32.totalorder %s924_s15, 1  ;;  %s924_s15 = sphi %s951_s15, %s14_s15  }
   0x2   : > { %p163_p1 = scmp.lt.s32.totalorder %s924_s15, 3 }
   0x4   : > { %p164_p2 = pnand %p704_p0, %p163_p1 }
   0x5   : > { %v763_v0 = vld [vmem:[%s1036_s1] sm:$0xff] (!%p164_p2)   ;;  %v783_v1 = vld [vmem:[%s1036_s1 + $0x10] sm:$0xff] (!%p164_p2)   ;;  %s189_s23 = smul.u32 (!%p164_p2), 10, %s700_s16  ;;  %v784_v6 = vld [vmem:[%s1036_s1 + $0x18] sm:$0xff] (!%p164_p2)   ;;  %vm244_vm0 = vcmask (!%p164_p2), 195584   ;;  %s706_s6 = sshll.u32 (!%p164_p2), %s700_s16, 3 }
   0x6   : > { %167 = sbr.rel (%p164_p2) target bundleno = 262 (0x106), region = 36  ;;  %v782_v2 = vld [vmem:[%s1036_s1 + $0x8] ss:$24 sps:$4 sm:$0xff] (!%p164_p2)   ;;  %v917_v3 = vld [vmem:[%s1036_s1 + $0xc] sm:$0xff] (!%p164_p2)  ;;  %877 = vmatprep.subr.bf16.mxu0 (!%p164_p2), %v763_v0  ;;  %v773_v4 = vunpack.c.h.bf16 (!%p164_p2), %v783_v1  ;;  %p196_p4 = scmp.lt.s32.totalorder (!%p164_p2), %s706_s6, 15  ;;  %vm635_vm1 = vcmask (!%p164_p2), 64512  }
   0x7   : > { %v768_v5 = vunpack.c.l.bf16 (!%p164_p2), %v782_v2  ;;  %879 = vmatpush3.bf16.msra.mxu0 (!%p164_p2), %v763_v0  ;;  %p190_p3 = scmp.lt.s32.totalorder (!%p164_p2), %s189_s23, 19  ;;  %873 = vmatprep.subr.bf16.mxu1 (!%p164_p2), %v917_v3  ;;  %v488_v21 = vunpack.c.h.bf16 (!%p164_p2), %v782_v2  ;;  %v738_v38 = vld [vmem:[%s1037_s2] ss:$0 sm:$0xff] (!%p164_p2) }
   0x8   : > { %875 = vmatpush3.bf16.msra.mxu1 (!%p164_p2), %v917_v3  ;;  %v739_v41 = vld [vmem:[%s1038_s3] ss:$0 sm:$0xff] (!%p164_p2) }
   0x9   : > { %840 = vmatprep.subr.mxu0 (!%p164_p2), %v768_v5  ;;  %822 = vmatprep.subr.mxu1 (!%p164_p2), %v773_v4 }
   0xb   : > { %841 = vmatpush3.msra.mxu0 (!%p164_p2), %v768_v5 }
   0xc   : > { %881 = vmatprep.subr.bf16.mxu0 (!%p164_p2), %v784_v6  ;;  %823 = vmatpush3.msra.mxu1 (!%p164_p2), %v773_v4 }
   0xd   : > { %s1041_s23 = smov (!%p190_p3, %s189_s23), 19  ;;  %884 = vmatprep.subr.bf16.mxu1 %v763_v0  ;;  %s1043_s6 = smov (!%p196_p4, %s706_s6), 15 }
   0xe   : > { %s705_s28 = sshll.u32 %s1041_s23, 2  ;;  %s707_s9 = sshll.u32 %s1043_s6, 3 }
   0xf   : > { %s193_s5 = scalar_lea.vmem %s1035_s0, %s705_s28  ;;  %s1014_s14 = scalar_lea.vmem %s1039_s4, %s707_s9 }
  0x10   : > { %v743_v7 = vld [vmem:[%s193_s5] sm:$0xff]   ;;  %v778_v8 = vld [vmem:[%s193_s5 + $0x8] sm:$0xff]   ;;  %v779_v9 = vld [vmem:[%s193_s5 + $0x10] sm:$0xff]  }
  0x11   : > { %v745_v10 = vunpack.c.h.bf16 %v743_v7  ;;  %v744_v11 = vunpack.c.l.bf16 %v743_v7  ;;  %v748_v12 = vunpack.c.l.bf16 %v778_v8  ;;  %v749_v13 = vunpack.c.h.bf16 %v778_v8  ;;  %v780_v19 = vld [vmem:[%s193_s5 + $0x18] sm:$0xff]   ;;  %v781_v26 = vld [vmem:[%s193_s5 + $0x20] sm:$0xff]  }
  0x12   : > { %v752_v14 = vunpack.c.l.bf16 %v779_v9  ;;  %v753_v18 = vunpack.c.h.bf16 %v779_v9  ;;  %v756_v23 = vunpack.c.l.bf16 %v780_v19  ;;  %v757_v25 = vunpack.c.h.bf16 %v780_v19 }
  0x13   : > { %v222_v15 = vmax.f32 %v745_v10, 0.0  ;;  %v221_v16 = vmax.f32 %v744_v11, 0.0  ;;  %v223_v17 = vmax.f32 %v748_v12, 0.0  ;;  %v224_v20 = vmax.f32 %v749_v13, 0.0 }
  0x14   : > { %v225_v22 = vmax.f32 %v752_v14, 0.0  ;;  %v226_v24 = vmax.f32 %v753_v18, 0.0  ;;  %v227_v27 = vmax.f32 %v756_v23, 0.0  ;;  %v760_v28 = vunpack.c.l.bf16 %v781_v26 }
  0x15   : > { %824 = vmatprep.mubr.msk.f32.mxu1 %vm244_vm0, %v222_v15  ;;  %842 = vmatprep.mubr.msk.f32.mxu0 %vm244_vm0, %v221_v16  ;;  %v228_v29 = vmax.f32 %v757_v25, 0.0  ;;  %v761_v31 = vunpack.c.h.bf16 %v781_v26 }
  0x16   : > { %825 = vmatmul.mubr.msk.f32.vlgmr.msra.gmra.mrb[0].mxu1 %vm244_vm0, %v223_v17  ;;  %843 = vmatmul.mubr.msk.f32.vlgmr.msra.gmra.mrb[0].mxu0 %vm244_vm0, %v222_v15  ;;  %v229_v30 = vmax.f32 %v760_v28, 0.0 }
  0x17   : > { %886 = vmatpush3.bf16.msra.mxu1 %v763_v0  ;;  %883 = vmatpush3.bf16.msra.mxu0 %v784_v6  ;;  %v230_v32 = vmax.f32 %v761_v31, 0.0 }
  0x18   : > { %827 = vmatprep.mubr.msk.f32.mxu1 %vm244_vm0, %v224_v20  ;;  %845 = vmatprep.mubr.msk.f32.mxu0 %vm244_vm0, %v223_v17 }
  0x19   : > { %858 = vmatprep.subr.mxu0 %v488_v21  ;;  %885 = vmatprep.subr.mxu1 %v768_v5 }
  0x1a   : > { %828 = vmatmul.mubr.msk.f32.gmra.mrb[2].mxu1 %vm244_vm0, %v225_v22  ;;  %846 = vmatmul.mubr.msk.f32.gmra.mrb[2].mxu0 %vm244_vm0, %v224_v20 }
  0x1b   : > { %859 = vmatpush3.msra.mxu0 %v488_v21  ;;  %830 = vmatprep.mubr.msk.f32.mxu1 %vm244_vm0, %v226_v24 }
  0x1c   : > { %860 = vmatprep.mubr.msk.f32.mxu0 %vm244_vm0, %v223_v17  ;;  %887 = vmatpush3.msra.mxu1 %v768_v5 }
  0x1e   : > { %831 = vmatmul.mubr.msk.f32.gmra.mrb[4].mxu1 %vm244_vm0, %v227_v27  ;;  %861 = vmatmul.mubr.msk.f32.vlgmr.msra.gmra.mrb[0].mxu0 %vm244_vm0, %v224_v20 }
  0x1f   : > { %833 = vmatprep.mubr.msk.f32.mxu1 %vm244_vm0, %v228_v29  ;;  %863 = vmatprep.mubr.msk.f32.mxu0 %vm244_vm0, %v225_v22 }
  0x22   : > { %834 = vmatmul.mubr.msk.f32.gmra.mrb[6].mxu1 %vm244_vm0, %v229_v30  ;;  %864 = vmatmul.mubr.msk.f32.gmra.mrb[2].mxu0 %vm244_vm0, %v226_v24 }
  0x23   : > { %848 = vmatprep.mubr.msk.f32.mxu1 %vm244_vm0, %v225_v22  ;;  %866 = vmatprep.mubr.msk.f32.mxu0 %vm244_vm0, %v227_v27 }
  0x26   : > { %849 = vmatmul.mubr.msk.f32.vlgmr.msra.gmra.mrb[4].mxu1 %vm244_vm0, %v226_v24  ;;  %867 = vmatmul.mubr.msk.f32.gmra.mrb[4].mxu0 %vm244_vm0, %v228_v29 }
  0x27   : > { %851 = vmatprep.mubr.msk.f32.mxu1 %vm244_vm0, %v227_v27  ;;  %869 = vmatprep.mubr.msk.f32.mxu0 %vm244_vm0, %v229_v30 }
  0x2a   : > { %852 = vmatmul.mubr.msk.f32.gmra.mrb[6].mxu1 %vm244_vm0, %v228_v29  ;;  %870 = vmatmul.mubr.msk.f32.gmra.mrb[6].mxu0 %vm244_vm0, %v230_v32 }
  0xe9   : > { %v826_v33 = vpop.f32.mrb[0].mxu1 }
  0xea   : > { %v335_v34 = vpop.f32.mrb[1].mxu1 }
  0xed   : > { %v829_v35 = vpop.f32.mrb[2].mxu1 }
  0xee   : > { %v345_v36 = vpop.f32.mrb[3].mxu1 }
  0xf1   : > { %v862_v37 = vpop.f32.mrb[0].mxu0 }
  0xf2   : > { %v888_v39 = vadd.f32 %v862_v37, %v826_v33  ;;  %v558_v40 = vpop.f32.mrb[1].mxu0 }
  0xf3   : > { %v889_v42 = vadd.f32 %v558_v40, %v335_v34 }
  0xf4   : > { %v613_v43 = vmul.f32 %v888_v39, %v738_v38 }
  0xf5   : > { %v612_v44 = vmul.f32 %v889_v42, %v738_v38  ;;  %v865_v45 = vpop.f32.mrb[2].mxu0 }
  0xf6   : > { %v628_v46 = vadd.f32 %v739_v41, %v613_v43  ;;  %v890_v47 = vadd.f32 %v865_v45, %v829_v35  ;;  %v568_v48 = vpop.f32.mrb[3].mxu0 }
  0xf7   : > { %v627_v49 = vadd.f32 %v739_v41, %v612_v44  ;;  %v891_v50 = vadd.f32 %v568_v48, %v345_v36 }
  0xf8   : > { %637 = vst.msk [vmem:[%s1014_s14 + $0x8] sm:$0xff] %vm635_vm1, %v628_v46  ;;  %v615_v51 = vmul.f32 %v890_v47, %v738_v38 }
  0xf9   : > { %636 = vst.msk [vmem:[%s1014_s14] sm:$0xff] %vm635_vm1, %v627_v49  ;;  %v614_v52 = vmul.f32 %v891_v50, %v738_v38  ;;  %v850_v53 = vpop.f32.mrb[4].mxu1  ;;  %v868_v54 = vpop.f32.mrb[4].mxu0 }
  0xfa   : > { %v630_v55 = vadd.f32 %v739_v41, %v615_v51  ;;  %v892_v56 = vadd.f32 %v868_v54, %v850_v53  ;;  %v463_v57 = vpop.f32.mrb[5].mxu1  ;;  %v578_v58 = vpop.f32.mrb[5].mxu0 }
  0xfb   : > { %v629_v59 = vadd.f32 %v739_v41, %v614_v52  ;;  %v893_v60 = vadd.f32 %v578_v58, %v463_v57 }
  0xfc   : > { %639 = vst.msk [vmem:[%s1014_s14 + $0x18] sm:$0xff] %vm635_vm1, %v630_v55  ;;  %v617_v61 = vmul.f32 %v892_v56, %v738_v38 }
  0xfd   : > { %638 = vst.msk [vmem:[%s1014_s14 + $0x10] sm:$0xff] %vm635_vm1, %v629_v59  ;;  %v616_v62 = vmul.f32 %v893_v60, %v738_v38  ;;  %v853_v63 = vpop.f32.mrb[6].mxu1  ;;  %v871_v0 = vpop.f32.mrb[6].mxu0 }
  0xfe   : > { %v632_v1 = vadd.f32 %v739_v41, %v617_v61  ;;  %v894_v2 = vadd.f32 %v871_v0, %v853_v63  ;;  %v473_v3 = vpop.f32.mrb[7].mxu1  ;;  %v588_v4 = vpop.f32.mrb[7].mxu0 }
  0xff   : > { %v631_v5 = vadd.f32 %v739_v41, %v616_v62  ;;  %v895_v6 = vadd.f32 %v588_v4, %v473_v3 }
 0x100   : > { %641 = vst.msk [vmem:[%s1014_s14 + $0x28] sm:$0xff] %vm635_vm1, %v632_v1  ;;  %v619_v7 = vmul.f32 %v894_v2, %v738_v38 }
 0x101   : > { %640 = vst.msk [vmem:[%s1014_s14 + $0x20] sm:$0xff] %vm635_vm1, %v631_v5  ;;  %v618_v8 = vmul.f32 %v895_v6, %v738_v38 }
 0x102   : > { %v634_v9 = vadd.f32 %v739_v41, %v619_v7 }
 0x103   : > { %v633_v10 = vadd.f32 %v739_v41, %v618_v8 }
 0x104   : > { %643 = vst.msk [vmem:[%s1014_s14 + $0x38] sm:$0xff] %vm635_vm1, %v634_v9 }
 0x105   : > { %642 = vst.msk [vmem:[%s1014_s14 + $0x30] sm:$0xff] %vm635_vm1, %v633_v10 }
 0x106 PF: > { %s14_s15 = sadd.s32 1, %s924_s15  }
 0x107   : > { %p11_p5 = scmp.ge.s32.totalorder %s14_s15, 4  }
 0x109   :  { %13 = sbr.rel (!%p11_p5) target bundleno = 1 (0x1), region = 68 }

// kernel: forward.40
= control target key start
LH: loop header
LB: loop body
LE: loop exit
PB: predicated region body
PF: predicated region fallthrough
CT: control target
= control target key end

     0   :  { %v247_v0 = vmov 0   ;;  %vm116_vm0 = vcmask 130048   ;;  %s336_s1 = inlined_call_operand.vmem [shape: bf16[144,16], index: 1, kind: input, shape index: {}]   ;;  %s337_s0 = inlined_call_operand.vmem [shape: bf16[32,144], index: 0, kind: input, shape index: {}]   ;;  %s338_s2 = inlined_call_operand.vmem [shape: f32[1,16], index: 2, kind: input, shape index: {}]   ;;  %s339_s3 = inlined_call_operand.vmem [shape: f32[1,16], index: 3, kind: input, shape index: {}]   ;;  %s340_s4 = inlined_call_operand.vmem [shape: f32[32,16], index: 4, kind: output, shape index: {}]  }
   0x1   :  { %123 = vmatprep.subr.bf16.mxu0 %v247_v0  ;;  %219 = vmatprep.subr.bf16.mxu1 %v247_v0  ;;  %v238_v1 = vld [vmem:[%s336_s1] sm:$0xff]   ;;  %v239_v2 = vld [vmem:[%s336_s1 + $0x8] sm:$0xff]   ;;  %v240_v3 = vld [vmem:[%s336_s1 + $0x10] sm:$0xff]  }
   0x2   :  { %124 = vmatpush1.bf16.msra.mxu0 %v238_v1  ;;  %228 = vmatpush1.bf16.msra.mxu1 %v238_v1  ;;  %v18_v4 = vld [vmem:[%s337_s0] sm:$0xff]  ;;  %v19_v5 = vld [vmem:[%s337_s0 + $0x8] sm:$0xff]  ;;  %v20_v6 = vld [vmem:[%s337_s0 + $0x10] sm:$0xff] }
   0x3   :  { %125 = vmatprep.subr.bf16.mxu0 %v247_v0  ;;  %220 = vmatprep.subr.bf16.mxu1 %v247_v0  ;;  %v241_v7 = vld [vmem:[%s336_s1 + $0x18] sm:$0xff]   ;;  %v22_v8 = vmax.bf16 %v247_v0, %v18_v4  ;;  %v23_v9 = vmax.bf16 %v247_v0, %v19_v5  ;;  %v24_v11 = vmax.bf16 %v247_v0, %v20_v6  ;;  %v242_v15 = vld [vmem:[%s336_s1 + $0x20] sm:$0xff]   ;;  %v243_v16 = vld [vmem:[%s336_s1 + $0x28] sm:$0xff]  }
   0x4   :  { %v21_v10 = vld [vmem:[%s337_s0 + $0x18] sm:$0xff]  ;;  %v244_v17 = vld [vmem:[%s336_s1 + $0x30] sm:$0xff]   ;;  %v246_v19 = vld [vmem:[%s336_s1 + $0x40] sm:$0xff]  }
   0x5   :  { %v25_v12 = vmax.bf16 %v247_v0, %v21_v10  ;;  %v203_v13 = vcombine.high %v22_v8, %v23_v9  ;;  %v245_v18 = vld [vmem:[%s336_s1 + $0x38] sm:$0xff]   ;;  %v202_v20 = vcombine.low %v22_v8, %v23_v9  ;;  %v217_v22 = vld [vmem:[%s338_s2] ss:$0 sm:$0xff] }
   0x6   :  { %126 = vmatpush1.bf16.msra.mxu0 %v239_v2  ;;  %229 = vmatpush1.bf16.msra.mxu1 %v239_v2  ;;  %v218_v24 = vld [vmem:[%s339_s3] ss:$0 sm:$0xff] }
   0x7   :  { %127 = vmatprep.subr.bf16.mxu0 %v247_v0  ;;  %221 = vmatprep.subr.bf16.mxu1 %v247_v0  ;;  %v205_v14 = vcombine.high %v24_v11, %v25_v12  ;;  %v204_v21 = vcombine.low %v24_v11, %v25_v12 }
   0x8   :  { %215 = vmatprep.mubr.msk.bf16.mxu0 %vm116_vm0, %v203_v13 }
   0x9   :  { %216 = vmatprep.mubr.msk.bf16.mxu1 %vm116_vm0, %v205_v14 }
   0xa   :  { %128 = vmatpush1.bf16.msra.mxu0 %v240_v3  ;;  %230 = vmatpush1.bf16.msra.mxu1 %v240_v3 }
   0xb   :  { %129 = vmatprep.subr.bf16.mxu0 %v247_v0  ;;  %222 = vmatprep.subr.bf16.mxu1 %v247_v0 }
   0xe   :  { %130 = vmatpush1.bf16.msra.mxu0 %v241_v7  ;;  %231 = vmatpush1.bf16.msra.mxu1 %v241_v7 }
   0xf   :  { %131 = vmatprep.subr.bf16.mxu0 %v247_v0  ;;  %223 = vmatprep.subr.bf16.mxu1 %v247_v0 }
  0x12   :  { %132 = vmatpush1.bf16.msra.mxu0 %v242_v15  ;;  %232 = vmatpush1.bf16.msra.mxu1 %v242_v15 }
  0x13   :  { %133 = vmatprep.subr.bf16.mxu0 %v247_v0  ;;  %224 = vmatprep.subr.bf16.mxu1 %v247_v0 }
  0x16   :  { %134 = vmatpush1.bf16.msra.mxu0 %v243_v16  ;;  %233 = vmatpush1.bf16.msra.mxu1 %v243_v16 }
  0x17   :  { %135 = vmatprep.subr.bf16.mxu0 %v247_v0  ;;  %225 = vmatprep.subr.bf16.mxu1 %v247_v0 }
  0x1a   :  { %136 = vmatpush1.bf16.msra.mxu0 %v244_v17  ;;  %234 = vmatpush1.bf16.msra.mxu1 %v244_v17 }
  0x1b   :  { %137 = vmatprep.subr.bf16.mxu0 %v247_v0  ;;  %226 = vmatprep.subr.bf16.mxu1 %v247_v0 }
  0x1e   :  { %138 = vmatpush1.bf16.msra.mxu0 %v245_v18  ;;  %235 = vmatpush1.bf16.msra.mxu1 %v245_v18 }
  0x1f   :  { %139 = vmatprep.subr.bf16.mxu0 %v247_v0  ;;  %227 = vmatprep.subr.bf16.mxu1 %v247_v0 }
  0x22   :  { %140 = vmatpush1.bf16.msra.mxu0 %v246_v19  ;;  %236 = vmatpush1.bf16.msra.mxu1 %v246_v19 }
  0x25   :  { %156 = vmatmul.mubr.bf16.vlgmr.msra.gmra.mrb[0].mxu0 %v202_v20  ;;  %164 = vmatmul.mubr.bf16.vlgmr.msra.gmra.mrb[0].mxu1 %v204_v21 }
  0xf8   :  { %v157_v23 = vpop.f32.mrb[0].mxu0  ;;  %v165_v25 = vpop.f32.mrb[0].mxu1 }
  0xf9   :  { %v179_v26 = vmul.f32 %v217_v22, %v157_v23  ;;  %v181_v27 = vmul.f32 %v217_v22, %v165_v25  ;;  %v159_v28 = vpop.f32.mrb[1].mxu0  ;;  %v167_v29 = vpop.f32.mrb[1].mxu1 }
  0xfa   :  { %v160_v30 = vpop.f32.mrb[2].mxu0  ;;  %v168_v31 = vpop.f32.mrb[2].mxu1 }
  0xfb   :  { %v190_v32 = vadd.f32 %v218_v24, %v179_v26  ;;  %v192_v33 = vadd.f32 %v218_v24, %v181_v27  ;;  %v180_v34 = vmul.f32 %v217_v22, %v160_v30  ;;  %v182_v35 = vmul.f32 %v217_v22, %v168_v31  ;;  %v162_v36 = vpop.f32.mrb[3].mxu0  ;;  %v170_v37 = vpop.f32.mrb[3].mxu1 }
  0xfd   :  { %194 = vst.msk [vmem:[%s340_s4] sm:$0xff] %vm116_vm0, %v190_v32  ;;  %196 = vst.msk [vmem:[%s340_s4 + $0x10] sm:$0xff] %vm116_vm0, %v192_v33  ;;  %v191_v38 = vadd.f32 %v218_v24, %v180_v34  ;;  %v193_v39 = vadd.f32 %v218_v24, %v182_v35 }
  0xff   :  { %195 = vst.msk [vmem:[%s340_s4 + $0x8] sm:$0xff] %vm116_vm0, %v191_v38  ;;  %197 = vst.msk [vmem:[%s340_s4 + $0x18] sm:$0xff] %vm116_vm0, %v193_v39 }

// kernel: forward.41
= control target key start
LH: loop header
LB: loop body
LE: loop exit
PB: predicated region body
PF: predicated region fallthrough
CT: control target
= control target key end

     0   :  { %12 = vsyncpa [#allocation3], 0  ;;  %v275_v3 = vmov 0.0|0.0   ;;  %vm276_vm0 = vmmov 0   ;;  %v277_v6 = vmov 0.0   ;;  %s377_s0 = inlined_call_operand.vmem [shape: f32[2,16,32], index: 0, kind: input, shape index: {}]   ;;  %s378_s1 = inlined_call_operand.vmem [shape: f32[1,1,32], index: 1, kind: input, shape index: {}]   ;;  %s379_s2 = inlined_call_operand.vmem [shape: f32[1,1,32], index: 2, kind: input, shape index: {}]   ;;  %s380_s3 = inlined_call_operand.vmem [shape: f32[32,10], index: 3, kind: input, shape index: {}]   ;;  %s381_s4 = inlined_call_operand.vmem [shape: f32[1,10], index: 4, kind: input, shape index: {}]   ;;  %s382_s5 = inlined_call_operand.hbm [shape: f32[2,32], index: 5, kind: output, shape index: {0}]   ;;  %s383_s6 = inlined_call_operand.hbm [shape: f32[2,10], index: 6, kind: output, shape index: {1}]  }
   0x1   :  { %v83_v0 = vld [vmem:[%s380_s3] sm:$0xff]  ;;  %v84_v1 = vld [vmem:[%s380_s3 + $0x8] sm:$0xff]  ;;  %v85_v2 = vld [vmem:[%s380_s3 + $0x10] sm:$0xff]  ;;  %216 = vmatprep.subr.bf16.mxu0 %v275_v3  ;;  %213 = vmatprep.mubr.msk.f32.mxu0 %vm276_vm0, %v277_v6 }
   0x2   :  { %v217_v4 = vpack.c.bf16 %v84_v1, %v83_v0  ;;  %v86_v5 = vld [vmem:[%s380_s3 + $0x18] sm:$0xff]  ;;  %v24_v7 = vld [vmem:[%s377_s0] sm:$0xff]  ;;  %v25_v8 = vld [vmem:[%s377_s0 + $0x8] sm:$0xff] }
   0x3   :  { %v220_v9 = vpack.c.bf16 %v86_v5, %v85_v2  ;;  %v26_v10 = vld [vmem:[%s377_s0 + $0x10] sm:$0xff]  ;;  %v27_v11 = vld [vmem:[%s377_s0 + $0x18] sm:$0xff]  ;;  %v196_v12 = vld [vmem:[%s378_s1] ss:$0 sm:$0xff] }
   0x4   :  { %218 = vmatpush3.bf16.msra.mxu0 %v217_v4  ;;  %v35_v13 = vmul.f32 %v196_v12, %v24_v7  ;;  %v36_v14 = vmul.f32 %v196_v12, %v25_v8  ;;  %v37_v15 = vmul.f32 %v196_v12, %v26_v10  ;;  %v38_v16 = vmul.f32 %v196_v12, %v27_v11  ;;  %v197_v17 = vld [vmem:[%s379_s2] ss:$0 sm:$0xff] }
   0x5   :  { %13 = vsyncpa [#allocation5], 0  ;;  %219 = vmatprep.subr.bf16.mxu0 %v275_v3  ;;  %vm54_vm1 = vcmask 261120   ;;  %vm78_vm2 = vcmask 1041409   ;;  %vm81_vm3 = vcmask 254976   ;;  %s278_s0 = smov [#allocation2]  }
   0x6   :  { %v46_v18 = vadd.f32 %v197_v17, %v35_v13  ;;  %v47_v19 = vadd.f32 %v197_v17, %v36_v14  ;;  %v48_v20 = vadd.f32 %v197_v17, %v37_v15  ;;  %v49_v21 = vadd.f32 %v197_v17, %v38_v16  ;;  %s174_s1 = sshll.u32 %s278_s0, 4  ;;  %s175_s1 = int_to_ptr.vmem [resolvable:$true] %s174_s1 }
   0x7   :  { %s227_s2 = scalar_lea.vmem %s175_s1, 32  ;;  %p232_p1 = scmp.lt.s32.totalorder %s175_s1, %s175_s1 }
   0x8   :  { %221 = vmatpush3.bf16.msra.mxu0 %v220_v9  ;;  %v50_v22 = vmax.f32 %v46_v18, 0.0  ;;  %v51_v23 = vmax.f32 %v47_v19, 0.0  ;;  %v52_v24 = vmax.f32 %v48_v20, 0.0  ;;  %v53_v25 = vmax.f32 %v49_v21, 0.0  ;;  %p228_p0 = scmp.ne.s32.totalorder %s175_s1, %s227_s2  ;;  %p233_p2 = scmp.lt.s32.totalorder %s227_s2, %s227_s2 }
   0xa   :  { %v55_v26 = vsel %vm54_vm1, %v50_v22, 0.0  ;;  %v56_v27 = vsel %vm54_vm1, %v51_v23, 0.0  ;;  %v64_v28 = vsel %vm54_vm1, %v52_v24, 0.0  ;;  %v65_v29 = vsel %vm54_vm1, %v53_v25, 0.0  ;;  %p234_p3 = por %p233_p2, %p232_p1 }
   0xb   :  { %v57_v30 = vadd.f32 %v56_v27, %v55_v26  ;;  %v66_v31 = vadd.f32 %v65_v29, %v64_v28 }
   0xc   :  { %p235_p4 = pnand %p234_p3, %p228_p0 }
   0xd   :  { %v58_v32 = vrot.slane %v57_v30, 4  ;;  %v67_v33 = vrot.slane %v66_v31, 4 }
   0xf   :  { %v59_v34 = vadd.f32 %v58_v32, %v57_v30  ;;  %v68_v35 = vadd.f32 %v67_v33, %v66_v31 }
  0x11   :  { %v60_v36 = vrot.slane %v59_v34, 2  ;;  %v69_v37 = vrot.slane %v68_v35, 2 }
  0x13   :  { %v61_v38 = vadd.f32 %v60_v36, %v59_v34  ;;  %v70_v39 = vadd.f32 %v69_v37, %v68_v35 }
  0x15   :  { %v62_v40 = vrot.slane %v61_v38, 1  ;;  %v71_v41 = vrot.slane %v70_v39, 1 }
  0x17   :  { %v63_v42 = vadd.f32 %v62_v40, %v61_v38  ;;  %v72_v43 = vadd.f32 %v71_v41, %v70_v39 }
  0x19   :  { %v74_v44 = vmul.f32 0.0625, %v63_v42  ;;  %v75_v45 = vmul.f32 0.0625, %v72_v43 }
  0x1b   :  { %v79_v46 = vsel %vm78_vm2, %v75_v45, %v74_v44 }
  0x1c   :  { %214 = vmatmul.mubr.msk.f32.vlgmr.msra.gmra.mrb[0].mxu0 %vm54_vm1, %v79_v46  ;;  %82 = vst.msk [vmem:[#allocation2] sm:$0x3] %vm81_vm3, %v79_v46 }
  0x1d   :  { %238 = shalt.err (!%p235_p4)
}
  0x1e   :  { %s239_s18 = scalar_lea.hbm %s382_s5, 32 }
  0x1f   :  { %p240_p5 = scmp.ne.s32.totalorder %s382_s5, %s239_s18  ;;  %p243_p6 = scmp.lt.u32.totalorder %s239_s18, %s382_s5 }
  0x21   :  { %p245_p7 = pnand %p243_p6, %p240_p5 }
  0x23   :  { %248 = shalt.err (!%p245_p7)
}
  0x24   :  { %177 = dma.vmem_to_hbm [thread:$0]  %s175_s1, 32, %s382_s5, [#allocation3]   ;;  %v198_v47 = vld [vmem:[%s381_s4] ss:$0 sm:$0xff]  ;;  %vm166_vm4 = vcmask 74752  }
  0x25   :  { %s279_s27 = smov [#allocation4]  }
  0x26   :  { %s184_s28 = sshll.u32 %s279_s27, 4  ;;  %s185_s28 = int_to_ptr.vmem [resolvable:$true] %s184_s28 }
  0x27   :  { %s249_s29 = scalar_lea.vmem %s185_s28, 32  ;;  %p254_p9 = scmp.lt.s32.totalorder %s185_s28, %s185_s28 }
  0x28   :  { %p250_p8 = scmp.ne.s32.totalorder %s185_s28, %s249_s29  ;;  %p255_p10 = scmp.lt.s32.totalorder %s249_s29, %s249_s29 }
  0x2a   :  { %p256_p11 = por %p255_p10, %p254_p9 }
  0x2c   :  { %p257_p12 = pnand %p256_p11, %p250_p8 }
  0xef   :  { %v162_v48 = vpop.f32.mrb[0].mxu0 }
  0xf0   :  { %v163_v49 = vadd.f32 %v198_v47, %v162_v48  ;;  %v215_v50 = vpop.f32.mrb[1].mxu0 }
  0xf2   :  { %167 = vst.msk [vmem:[#allocation4] sm:$0x3] %vm166_vm4, %v163_v49 }
  0xf3   :  { %260 = shalt.err (!%p257_p12)
}
  0xf4   :  { %s261_s7 = scalar_lea.hbm %s383_s6, 32 }
  0xf5   :  { %p262_p13 = scmp.ne.s32.totalorder %s383_s6, %s261_s7  ;;  %p265_p0 = scmp.lt.u32.totalorder %s261_s7, %s383_s6 }
  0xf7   :  { %p267_p1 = pnand %p265_p0, %p262_p13 }
  0xf9   :  { %270 = shalt.err (!%p267_p1)
}
  0xfa   :  { %187 = dma.vmem_to_hbm [thread:$0]  %s185_s28, 32, %s383_s6, [#allocation5]  }
  0xfb   :  { %271 = dma.done.wait [#allocation3], 32  }
  0xfc   :  { %272 = vsyncadd [#allocation3], 4294967264 }
  0xfd   :  { %273 = dma.done.wait [#allocation5], 32  }
  0xfe   :  { %274 = vsyncadd [#allocation5], 4294967264 }
  0xff   :  { %194 = vsyncpa [#allocation3], 1 }
 0x100   :  { %195 = vsyncpa [#allocation5], 1 }

</bundles_post_ra>
